<compile_context>
chip_gen: v7x
topology: tpu7x:2x2x1
jax: 0.10.0
libtpu: 0.0.40
codegen_flags: <defaults>
</compile_context>

<pallas_src>
import functools

import jax
import jax.numpy as jnp
from jax import lax
from jax.experimental import pallas as pl
from jax.experimental.pallas import tpu as pltpu


def _pick_tile(total, preferred=512):
    """Largest tile <= preferred that divides `total`; prefer multiples of 128, then 8."""
    best8 = None
    for t in range(min(preferred, total), 0, -1):
        if total % t:
            continue
        if t % 128 == 0:
            return t
        if best8 is None and t % 8 == 0:
            best8 = t
    return best8 if best8 is not None else total


# ---------------------------------------------------------------------------
# Kernel 1: fused (query + key) NonLinearMapping: conv3x3 -> ELU -> conv3x3.
# ---------------------------------------------------------------------------
def _fused_qk_conv_kernel(x_ref, w1_ref, b1_ref, w2_ref, b2_ref, o_ref, ypad_ref,
                          *, height, width, pad):
    hw = height * width

    # Column masks for the kx = 0 / kx = 2 taps (zero padding along image columns).
    # Row (ky) out-of-image reads are already zero thanks to the lane padding.
    col = lax.broadcasted_iota(jnp.int32, (1, hw), 1) % width
    not_left = col != 0
    not_right = col != (width - 1)

    def conv3x3(load_tap, w_ref, b_ref):
        cout = w_ref.shape[1]
        acc = jnp.zeros((cout, hw), jnp.float32)
        for ky in range(3):
            for kx in range(3):
                t = ky * 3 + kx
                start = pad + (ky - 1) * width + (kx - 1)    # static lane offset
                tap = load_tap(start)                         # (Cin, HW)
                contrib = lax.dot_general(
                    w_ref[t], tap, (((1,), (0,)), ((), ())),
                    preferred_element_type=jnp.float32)       # (Cout, HW)
                if kx == 0:
                    contrib = jnp.where(not_left, contrib, 0.0)
                elif kx == 2:
                    contrib = jnp.where(not_right, contrib, 0.0)
                acc = acc + contrib
        return acc + b_ref[...]

    # conv1 (+bias) over the lane-padded input, query & key output channels at once.
    y1 = conv3x3(lambda s: x_ref[0, :, s:s + hw], w1_ref, b1_ref)
    # ELU (alpha = 1), overflow-safe in the discarded branch.
    y1 = jnp.where(y1 > 0.0, y1, jnp.exp(jnp.minimum(y1, 0.0)) - 1.0)

    # Lane-pad the intermediate in VMEM scratch, then conv2 (+bias), block-diag weights.
    ypad_ref[...] = jnp.zeros_like(ypad_ref)
    ypad_ref[:, pad:pad + hw] = y1
    y2 = conv3x3(lambda s: ypad_ref[:, s:s + hw], w2_ref, b2_ref)
    o_ref[0] = y2.astype(o_ref.dtype)


def _block_diag_taps(wq, wk):
    """(Cp,Cp,3,3) x2 -> (9, 2Cp, 2Cp) block-diagonal per-tap conv2 weight."""
    cp = wq.shape[0]
    wq_t = jnp.transpose(wq, (2, 3, 0, 1)).reshape(9, cp, cp)
    wk_t = jnp.transpose(wk, (2, 3, 0, 1)).reshape(9, cp, cp)
    z = jnp.zeros_like(wq_t)
    top = jnp.concatenate([wq_t, z], axis=2)   # query outputs read query channels
    bot = jnp.concatenate([z, wk_t], axis=2)   # key outputs read key channels
    return jnp.concatenate([top, bot], axis=1)


def _fused_qk_nonlinear_mapping(x, q_params, k_params):
    n, cin, h, w = x.shape
    hw = h * w
    cp = q_params[0].shape[0]
    cout = 2 * cp
    pad = w + 1                      # covers the largest |tap offset| = W + 1
    hwp = hw + 2 * pad

    # --- glue: pure layout (flatten + lane-pad x once; pack q/k weights) ---
    x_pad = jnp.pad(x.reshape(n, cin, hw), ((0, 0), (0, 0), (pad, pad)))
    wq1, bq1, wq2, bq2 = q_params
    wk1, bk1, wk2, bk2 = k_params
    w1 = jnp.transpose(jnp.concatenate([wq1, wk1], axis=0),
                       (2, 3, 0, 1)).reshape(9, cout, cin)
    b1 = jnp.concatenate([bq1, bk1]).reshape(cout, 1)
    w2 = _block_diag_taps(wq2, wk2)
    b2 = jnp.concatenate([bq2, bk2]).reshape(cout, 1)

    kernel = functools.partial(_fused_qk_conv_kernel, height=h, width=w, pad=pad)
    y = pl.pallas_call(
        kernel,
        out_shape=jax.ShapeDtypeStruct((n, cout, hw), x.dtype),
        grid=(n,),
        in_specs=[
            pl.BlockSpec((1, cin, hwp), lambda b: (b, 0, 0)),
            pl.BlockSpec((9, cout, cin), lambda b: (0, 0, 0)),
            pl.BlockSpec((cout, 1), lambda b: (0, 0)),
            pl.BlockSpec((9, cout, cout), lambda b: (0, 0, 0)),
            pl.BlockSpec((cout, 1), lambda b: (0, 0)),
        ],
        out_specs=pl.BlockSpec((1, cout, hw), lambda b: (b, 0, 0)),
        scratch_shapes=[pltpu.VMEM((cout, hwp), jnp.float32)],
        compiler_params=pltpu.CompilerParams(
            dimension_semantics=("parallel",),
            vmem_limit_bytes=32 * 1024 * 1024,
        ),
    )(x_pad, w1, b1, w2, b2)
    # Channel-major, lane-dense split: query channels first, key channels second.
    return y[:, :cp, :], y[:, cp:, :]


# ---------------------------------------------------------------------------
# Kernel 2: fused energy = Q^T K + row softmax  ->  attention map.
# ---------------------------------------------------------------------------
def _attn_map_kernel(q_ref, k_ref, o_ref):
    # q_ref: (1, Cp, TQ), k_ref: (1, Cp, HW), o_ref: (1, TQ, HW)
    q = q_ref[0].astype(jnp.bfloat16)
    k = k_ref[0].astype(jnp.bfloat16)
    # energy[i, j] = sum_c q[c, i] * k[c, j]   (contract on Cp; MXU, f32 accumulate)
    energy = lax.dot_general(q, k, (((0,), (0,)), ((), ())),
                             preferred_element_type=jnp.float32)     # (TQ, HW)
    m = jnp.max(energy, axis=-1, keepdims=True)
    p = jnp.exp(energy - m)
    denom = jnp.sum(p, axis=-1, keepdims=True)
    o_ref[0] = (p * pl.reciprocal(denom, approx=True)).astype(o_ref.dtype)


def self_attention_map(x, params):
    """x: (N, C, H, W). params: {'query': (w1, b1, w2, b2), 'key': (w1, b1, w2, b2)}."""
    n, c, h, w = x.shape
    hw = h * w
    q, k = _fused_qk_nonlinear_mapping(x, params["query"], params["key"])
    cp = q.shape[1]

    tq = _pick_tile(hw, preferred=512)
    # Keep double-buffered (TQ, HW) f32 output tiles comfortably inside v7x's 64 MiB VMEM.
    while tq > 128 and tq % 2 == 0 and 2 * tq * hw * 4 > 24 * 1024 * 1024:
        tq //= 2
    # Keep >= 2 total grid steps so both v7x TensorCores have work.
    if n * (hw // tq) < 2 and tq % 256 == 0:
        tq //= 2

    grid = (n, hw // tq)
    attn = pl.pallas_call(
        _attn_map_kernel,
        out_shape=jax.ShapeDtypeStruct((n, hw, hw), jnp.float32),
        grid=grid,
        in_specs=[
            pl.BlockSpec((1, cp, tq), lambda b, i: (b, 0, i)),
            pl.BlockSpec((1, cp, hw), lambda b, i: (b, 0, 0)),
        ],
        out_specs=pl.BlockSpec((1, tq, hw), lambda b, i: (b, i, 0)),
        compiler_params=pltpu.CompilerParams(
            dimension_semantics=("parallel", "parallel"),
            vmem_limit_bytes=32 * 1024 * 1024,
        ),
    )(q, k)
    return attn


if __name__ == "__main__":
    key = jax.random.PRNGKey(0)
    # in_dim must be >= 16 so that in_dim // 16 >= 1 (as the module implies).
    n, c, h, w = 2, 64, 16, 16
    cp = c // 16
    keys = jax.random.split(key, 9)
    x = jax.random.normal(keys[0], (n, c, h, w), dtype=jnp.float32)

    def init_branch(k0, k1, k2, k3):
        w1 = 0.05 * jax.random.normal(k0, (cp, c, 3, 3), jnp.float32)
        b1 = 0.05 * jax.random.normal(k1, (cp,), jnp.float32)
        w2 = 0.05 * jax.random.normal(k2, (cp, cp, 3, 3), jnp.float32)
        b2 = 0.05 * jax.random.normal(k3, (cp,), jnp.float32)
        return (w1, b1, w2, b2)

    params = {
        "query": init_branch(*keys[1:5]),
        "key": init_branch(*keys[5:9]),
    }

    attn = jax.jit(self_attention_map)(x, params)
    attn = jax.block_until_ready(attn)

    # --- pure-JAX reference mirroring the PyTorch forward ---
    def conv_ref(xx, ww, bb):
        out = lax.conv_general_dilated(
            xx, ww, window_strides=(1, 1), padding=((1, 1), (1, 1)),
            dimension_numbers=("NCHW", "OIHW", "NCHW"))
        return out + bb.reshape(1, -1, 1, 1)

    def nlm_ref(xx, p):
        w1, b1, w2, b2 = p
        y = conv_ref(xx, w1, b1)
        y = jnp.where(y > 0.0, y, jnp.exp(jnp.minimum(y, 0.0)) - 1.0)   # ELU
        return conv_ref(y, w2, b2)

    q_r = nlm_ref(x, params["query"]).reshape(n, cp, h * w).transpose(0, 2, 1)
    k_r = nlm_ref(x, params["key"]).reshape(n, cp, h * w)
    energy_r = jnp.einsum("bqc,bck->bqk", q_r, k_r)
    attn_r = jax.nn.softmax(energy_r, axis=-1)

    assert attn.shape == (n, h * w, h * w)
    assert jnp.allclose(attn, attn_r, atol=5e-4, rtol=2e-3), "mismatch vs reference"

    print("KERNEL_OK")
</pallas_src>

<mosaic_0001>
module attributes {stable_mosaic.version = 11 : i64} {
  func.func @_fused_qk_conv_kernel(%arg0: i32, %arg1: memref<1x64x290xf32, #tpu.memory_space<vmem>>, %arg2: memref<9x8x64xf32, #tpu.memory_space<vmem>>, %arg3: memref<8x1xf32, #tpu.memory_space<vmem>>, %arg4: memref<9x8x8xf32, #tpu.memory_space<vmem>>, %arg5: memref<8x1xf32, #tpu.memory_space<vmem>>, %arg6: memref<1x8x256xf32, #tpu.memory_space<vmem>>, %arg7: memref<8x290xf32, #tpu.memory_space<vmem>>) attributes {dimension_semantics = [#tpu.dimension_semantics<parallel>], iteration_bounds = array<i64: 2>, scalar_prefetch = 0 : i64, scratch_operands = 1 : i64, tpu.core_type = #tpu.core_type<tc>, window_params = [{transform_indices = @transform_0, window_bounds = array<i64: 1, 64, 290>}, {pipeline_mode = #tpu.pipeline_mode<synchronous>, transform_indices = @transform_1, window_bounds = array<i64: 9, 8, 64>}, {pipeline_mode = #tpu.pipeline_mode<synchronous>, transform_indices = @transform_2, window_bounds = array<i64: 8, 1>}, {pipeline_mode = #tpu.pipeline_mode<synchronous>, transform_indices = @transform_3, window_bounds = array<i64: 9, 8, 8>}, {pipeline_mode = #tpu.pipeline_mode<synchronous>, transform_indices = @transform_4, window_bounds = array<i64: 8, 1>}, {transform_indices = @transform_5, window_bounds = array<i64: 1, 8, 256>}]} {
    %0 = tpu.iota {dimensions = array<i32: 1>} : vector<1x256xi32>
    %c16_i32 = arith.constant 16 : i32
    %c0_i32 = arith.constant 0 : i32
    %1 = arith.cmpi eq, %c16_i32, %c0_i32 : i32
    %c1_i32 = arith.constant 1 : i32
    %2 = arith.select %1, %c1_i32, %c16_i32 : i32
    %3 = vector.broadcast %2 : i32 to vector<1x256xi32>
    %4 = arith.remsi %0, %3 : vector<1x256xi32>
    %c0_i32_0 = arith.constant 0 : i32
    %5 = vector.broadcast %c0_i32_0 : i32 to vector<1x256xi32>
    %6 = arith.cmpi ne, %4, %5 : vector<1x256xi32>
    %c0_i32_1 = arith.constant 0 : i32
    %7 = vector.broadcast %c0_i32_1 : i32 to vector<1x256xi32>
    %8 = arith.cmpi slt, %4, %7 : vector<1x256xi32>
    %c0_i32_2 = arith.constant 0 : i32
    %9 = arith.cmpi slt, %2, %c0_i32_2 : i32
    %10 = vector.broadcast %9 : i1 to vector<1x256xi1>
    %11 = vector.broadcast %10 : vector<1x256xi1> to vector<1x256xi1>
    %12 = arith.xori %8, %11 : vector<1x256xi1>
    %13 = arith.andi %12, %6 : vector<1x256xi1>
    %14 = vector.broadcast %2 : i32 to vector<1x256xi32>
    %15 = arith.addi %4, %14 : vector<1x256xi32>
    %16 = arith.select %13, %15, %4 : vector<1x256xi1>, vector<1x256xi32>
    %c0_i32_3 = arith.constant 0 : i32
    %17 = vector.broadcast %c0_i32_3 : i32 to vector<1x256xi32>
    %18 = arith.cmpi ne, %16, %17 : vector<1x256xi32>
    %c15_i32 = arith.constant 15 : i32
    %19 = vector.broadcast %c15_i32 : i32 to vector<1x256xi32>
    %20 = arith.cmpi ne, %16, %19 : vector<1x256xi32>
    %cst = arith.constant 0.000000e+00 : f32
    %21 = vector.broadcast %cst : f32 to vector<8x256xf32>
    %c0 = arith.constant 0 : index
    %c0_4 = arith.constant 0 : index
    %c0_5 = arith.constant 0 : index
    %22 = vector.load %arg1[%c0, %c0_4, %c0_5] : memref<1x64x290xf32, #tpu.memory_space<vmem>>, vector<1x64x256xf32>
    %23 = vector.shape_cast %22 : vector<1x64x256xf32> to vector<64x256xf32>
    %c0_6 = arith.constant 0 : index
    %c0_7 = arith.constant 0 : index
    %c0_8 = arith.constant 0 : index
    %24 = vector.load %arg2[%c0_6, %c0_7, %c0_8] : memref<9x8x64xf32, #tpu.memory_space<vmem>>, vector<1x8x64xf32>
    %25 = vector.shape_cast %24 : vector<1x8x64xf32> to vector<8x64xf32>
    %cst_9 = arith.constant dense<0.000000e+00> : vector<8x256xf32>
    %26 = tpu.matmul %25, %23, %cst_9 {dimension_numbers = #tpu.dot_dimension_numbers<[1], [0], [0], [1], [0, 0, 1, 1], [], []>} : vector<8x64xf32>, vector<64x256xf32>, vector<8x256xf32> -> vector<8x256xf32>
    %cst_10 = arith.constant 0.000000e+00 : f32
    %27 = vector.shape_cast %18 : vector<1x256xi1> to vector<1x256xi1>
    %28 = vector.broadcast %27 : vector<1x256xi1> to vector<8x256xi1>
    %29 = vector.broadcast %cst_10 : f32 to vector<8x256xf32>
    %30 = arith.select %28, %26, %29 : vector<8x256xi1>, vector<8x256xf32>
    %31 = arith.addf %21, %30 : vector<8x256xf32>
    %c0_11 = arith.constant 0 : index
    %c0_12 = arith.constant 0 : index
    %c1 = arith.constant 1 : index
    %32 = vector.load %arg1[%c0_11, %c0_12, %c1] : memref<1x64x290xf32, #tpu.memory_space<vmem>>, vector<1x64x256xf32>
    %33 = vector.shape_cast %32 : vector<1x64x256xf32> to vector<64x256xf32>
    %c1_13 = arith.constant 1 : index
    %c0_14 = arith.constant 0 : index
    %c0_15 = arith.constant 0 : index
    %34 = vector.load %arg2[%c1_13, %c0_14, %c0_15] : memref<9x8x64xf32, #tpu.memory_space<vmem>>, vector<1x8x64xf32>
    %35 = vector.shape_cast %34 : vector<1x8x64xf32> to vector<8x64xf32>
    %cst_16 = arith.constant dense<0.000000e+00> : vector<8x256xf32>
    %36 = tpu.matmul %35, %33, %cst_16 {dimension_numbers = #tpu.dot_dimension_numbers<[1], [0], [0], [1], [0, 0, 1, 1], [], []>} : vector<8x64xf32>, vector<64x256xf32>, vector<8x256xf32> -> vector<8x256xf32>
    %37 = arith.addf %31, %36 : vector<8x256xf32>
    %c0_17 = arith.constant 0 : index
    %c0_18 = arith.constant 0 : index
    %c2 = arith.constant 2 : index
    %38 = vector.load %arg1[%c0_17, %c0_18, %c2] : memref<1x64x290xf32, #tpu.memory_space<vmem>>, vector<1x64x256xf32>
    %39 = vector.shape_cast %38 : vector<1x64x256xf32> to vector<64x256xf32>
    %c2_19 = arith.constant 2 : index
    %c0_20 = arith.constant 0 : index
    %c0_21 = arith.constant 0 : index
    %40 = vector.load %arg2[%c2_19, %c0_20, %c0_21] : memref<9x8x64xf32, #tpu.memory_space<vmem>>, vector<1x8x64xf32>
    %41 = vector.shape_cast %40 : vector<1x8x64xf32> to vector<8x64xf32>
    %cst_22 = arith.constant dense<0.000000e+00> : vector<8x256xf32>
    %42 = tpu.matmul %41, %39, %cst_22 {dimension_numbers = #tpu.dot_dimension_numbers<[1], [0], [0], [1], [0, 0, 1, 1], [], []>} : vector<8x64xf32>, vector<64x256xf32>, vector<8x256xf32> -> vector<8x256xf32>
    %cst_23 = arith.constant 0.000000e+00 : f32
    %43 = vector.shape_cast %20 : vector<1x256xi1> to vector<1x256xi1>
    %44 = vector.broadcast %43 : vector<1x256xi1> to vector<8x256xi1>
    %45 = vector.broadcast %cst_23 : f32 to vector<8x256xf32>
    %46 = arith.select %44, %42, %45 : vector<8x256xi1>, vector<8x256xf32>
    %47 = arith.addf %37, %46 : vector<8x256xf32>
    %c0_24 = arith.constant 0 : index
    %c0_25 = arith.constant 0 : index
    %c16 = arith.constant 16 : index
    %48 = vector.load %arg1[%c0_24, %c0_25, %c16] : memref<1x64x290xf32, #tpu.memory_space<vmem>>, vector<1x64x256xf32>
    %49 = vector.shape_cast %48 : vector<1x64x256xf32> to vector<64x256xf32>
    %c3 = arith.constant 3 : index
    %c0_26 = arith.constant 0 : index
    %c0_27 = arith.constant 0 : index
    %50 = vector.load %arg2[%c3, %c0_26, %c0_27] : memref<9x8x64xf32, #tpu.memory_space<vmem>>, vector<1x8x64xf32>
    %51 = vector.shape_cast %50 : vector<1x8x64xf32> to vector<8x64xf32>
    %cst_28 = arith.constant dense<0.000000e+00> : vector<8x256xf32>
    %52 = tpu.matmul %51, %49, %cst_28 {dimension_numbers = #tpu.dot_dimension_numbers<[1], [0], [0], [1], [0, 0, 1, 1], [], []>} : vector<8x64xf32>, vector<64x256xf32>, vector<8x256xf32> -> vector<8x256xf32>
    %cst_29 = arith.constant 0.000000e+00 : f32
    %53 = vector.shape_cast %18 : vector<1x256xi1> to vector<1x256xi1>
    %54 = vector.broadcast %53 : vector<1x256xi1> to vector<8x256xi1>
    %55 = vector.broadcast %cst_29 : f32 to vector<8x256xf32>
    %56 = arith.select %54, %52, %55 : vector<8x256xi1>, vector<8x256xf32>
    %57 = arith.addf %47, %56 : vector<8x256xf32>
    %c0_30 = arith.constant 0 : index
    %c0_31 = arith.constant 0 : index
    %c17 = arith.constant 17 : index
    %58 = vector.load %arg1[%c0_30, %c0_31, %c17] : memref<1x64x290xf32, #tpu.memory_space<vmem>>, vector<1x64x256xf32>
    %59 = vector.shape_cast %58 : vector<1x64x256xf32> to vector<64x256xf32>
    %c4 = arith.constant 4 : index
    %c0_32 = arith.constant 0 : index
    %c0_33 = arith.constant 0 : index
    %60 = vector.load %arg2[%c4, %c0_32, %c0_33] : memref<9x8x64xf32, #tpu.memory_space<vmem>>, vector<1x8x64xf32>
    %61 = vector.shape_cast %60 : vector<1x8x64xf32> to vector<8x64xf32>
    %cst_34 = arith.constant dense<0.000000e+00> : vector<8x256xf32>
    %62 = tpu.matmul %61, %59, %cst_34 {dimension_numbers = #tpu.dot_dimension_numbers<[1], [0], [0], [1], [0, 0, 1, 1], [], []>} : vector<8x64xf32>, vector<64x256xf32>, vector<8x256xf32> -> vector<8x256xf32>
    %63 = arith.addf %57, %62 : vector<8x256xf32>
    %c0_35 = arith.constant 0 : index
    %c0_36 = arith.constant 0 : index
    %c18 = arith.constant 18 : index
    %64 = vector.load %arg1[%c0_35, %c0_36, %c18] : memref<1x64x290xf32, #tpu.memory_space<vmem>>, vector<1x64x256xf32>
    %65 = vector.shape_cast %64 : vector<1x64x256xf32> to vector<64x256xf32>
    %c5 = arith.constant 5 : index
    %c0_37 = arith.constant 0 : index
    %c0_38 = arith.constant 0 : index
    %66 = vector.load %arg2[%c5, %c0_37, %c0_38] : memref<9x8x64xf32, #tpu.memory_space<vmem>>, vector<1x8x64xf32>
    %67 = vector.shape_cast %66 : vector<1x8x64xf32> to vector<8x64xf32>
    %cst_39 = arith.constant dense<0.000000e+00> : vector<8x256xf32>
    %68 = tpu.matmul %67, %65, %cst_39 {dimension_numbers = #tpu.dot_dimension_numbers<[1], [0], [0], [1], [0, 0, 1, 1], [], []>} : vector<8x64xf32>, vector<64x256xf32>, vector<8x256xf32> -> vector<8x256xf32>
    %cst_40 = arith.constant 0.000000e+00 : f32
    %69 = vector.shape_cast %20 : vector<1x256xi1> to vector<1x256xi1>
    %70 = vector.broadcast %69 : vector<1x256xi1> to vector<8x256xi1>
    %71 = vector.broadcast %cst_40 : f32 to vector<8x256xf32>
    %72 = arith.select %70, %68, %71 : vector<8x256xi1>, vector<8x256xf32>
    %73 = arith.addf %63, %72 : vector<8x256xf32>
    %c0_41 = arith.constant 0 : index
    %c0_42 = arith.constant 0 : index
    %c32 = arith.constant 32 : index
    %74 = vector.load %arg1[%c0_41, %c0_42, %c32] : memref<1x64x290xf32, #tpu.memory_space<vmem>>, vector<1x64x256xf32>
    %75 = vector.shape_cast %74 : vector<1x64x256xf32> to vector<64x256xf32>
    %c6 = arith.constant 6 : index
    %c0_43 = arith.constant 0 : index
    %c0_44 = arith.constant 0 : index
    %76 = vector.load %arg2[%c6, %c0_43, %c0_44] : memref<9x8x64xf32, #tpu.memory_space<vmem>>, vector<1x8x64xf32>
    %77 = vector.shape_cast %76 : vector<1x8x64xf32> to vector<8x64xf32>
    %cst_45 = arith.constant dense<0.000000e+00> : vector<8x256xf32>
    %78 = tpu.matmul %77, %75, %cst_45 {dimension_numbers = #tpu.dot_dimension_numbers<[1], [0], [0], [1], [0, 0, 1, 1], [], []>} : vector<8x64xf32>, vector<64x256xf32>, vector<8x256xf32> -> vector<8x256xf32>
    %cst_46 = arith.constant 0.000000e+00 : f32
    %79 = vector.shape_cast %18 : vector<1x256xi1> to vector<1x256xi1>
    %80 = vector.broadcast %79 : vector<1x256xi1> to vector<8x256xi1>
    %81 = vector.broadcast %cst_46 : f32 to vector<8x256xf32>
    %82 = arith.select %80, %78, %81 : vector<8x256xi1>, vector<8x256xf32>
    %83 = arith.addf %73, %82 : vector<8x256xf32>
    %c0_47 = arith.constant 0 : index
    %c0_48 = arith.constant 0 : index
    %c33 = arith.constant 33 : index
    %84 = vector.load %arg1[%c0_47, %c0_48, %c33] : memref<1x64x290xf32, #tpu.memory_space<vmem>>, vector<1x64x256xf32>
    %85 = vector.shape_cast %84 : vector<1x64x256xf32> to vector<64x256xf32>
    %c7 = arith.constant 7 : index
    %c0_49 = arith.constant 0 : index
    %c0_50 = arith.constant 0 : index
    %86 = vector.load %arg2[%c7, %c0_49, %c0_50] : memref<9x8x64xf32, #tpu.memory_space<vmem>>, vector<1x8x64xf32>
    %87 = vector.shape_cast %86 : vector<1x8x64xf32> to vector<8x64xf32>
    %cst_51 = arith.constant dense<0.000000e+00> : vector<8x256xf32>
    %88 = tpu.matmul %87, %85, %cst_51 {dimension_numbers = #tpu.dot_dimension_numbers<[1], [0], [0], [1], [0, 0, 1, 1], [], []>} : vector<8x64xf32>, vector<64x256xf32>, vector<8x256xf32> -> vector<8x256xf32>
    %89 = arith.addf %83, %88 : vector<8x256xf32>
    %c0_52 = arith.constant 0 : index
    %c0_53 = arith.constant 0 : index
    %c34 = arith.constant 34 : index
    %90 = vector.load %arg1[%c0_52, %c0_53, %c34] : memref<1x64x290xf32, #tpu.memory_space<vmem>>, vector<1x64x256xf32>
    %91 = vector.shape_cast %90 : vector<1x64x256xf32> to vector<64x256xf32>
    %c8 = arith.constant 8 : index
    %c0_54 = arith.constant 0 : index
    %c0_55 = arith.constant 0 : index
    %92 = vector.load %arg2[%c8, %c0_54, %c0_55] : memref<9x8x64xf32, #tpu.memory_space<vmem>>, vector<1x8x64xf32>
    %93 = vector.shape_cast %92 : vector<1x8x64xf32> to vector<8x64xf32>
    %cst_56 = arith.constant dense<0.000000e+00> : vector<8x256xf32>
    %94 = tpu.matmul %93, %91, %cst_56 {dimension_numbers = #tpu.dot_dimension_numbers<[1], [0], [0], [1], [0, 0, 1, 1], [], []>} : vector<8x64xf32>, vector<64x256xf32>, vector<8x256xf32> -> vector<8x256xf32>
    %cst_57 = arith.constant 0.000000e+00 : f32
    %95 = vector.shape_cast %20 : vector<1x256xi1> to vector<1x256xi1>
    %96 = vector.broadcast %95 : vector<1x256xi1> to vector<8x256xi1>
    %97 = vector.broadcast %cst_57 : f32 to vector<8x256xf32>
    %98 = arith.select %96, %94, %97 : vector<8x256xi1>, vector<8x256xf32>
    %99 = arith.addf %89, %98 : vector<8x256xf32>
    %c0_58 = arith.constant 0 : index
    %c0_59 = arith.constant 0 : index
    %100 = vector.load %arg3[%c0_58, %c0_59] : memref<8x1xf32, #tpu.memory_space<vmem>>, vector<8x1xf32>
    %101 = vector.broadcast %100 : vector<8x1xf32> to vector<8x256xf32>
    %102 = arith.addf %99, %101 : vector<8x256xf32>
    %cst_60 = arith.constant 0.000000e+00 : f32
    %103 = vector.broadcast %cst_60 : f32 to vector<8x256xf32>
    %104 = arith.cmpf ogt, %102, %103 : vector<8x256xf32>
    %cst_61 = arith.constant 0.000000e+00 : f32
    %105 = vector.broadcast %cst_61 : f32 to vector<8x256xf32>
    %106 = arith.minimumf %102, %105 : vector<8x256xf32>
    %107 = math.exp %106 : vector<8x256xf32>
    %cst_62 = arith.constant 1.000000e+00 : f32
    %108 = vector.broadcast %cst_62 : f32 to vector<8x256xf32>
    %109 = arith.subf %107, %108 : vector<8x256xf32>
    %110 = arith.select %104, %102, %109 : vector<8x256xi1>, vector<8x256xf32>
    %cst_63 = arith.constant 0.000000e+00 : f32
    %111 = vector.broadcast %cst_63 : f32 to vector<8x290xf32>
    %c0_64 = arith.constant 0 : index
    %c0_65 = arith.constant 0 : index
    %112 = vector.load %arg7[%c0_64, %c0_65] : memref<8x290xf32, #tpu.memory_space<vmem>>, vector<8x290xf32>
    tpu.vector_store %arg7[%c0_64, %c0_65], %111 {strides = array<i32>} : memref<8x290xf32, #tpu.memory_space<vmem>>, vector<8x290xf32>,
    %c0_66 = arith.constant 0 : index
    %c17_67 = arith.constant 17 : index
    %113 = vector.load %arg7[%c0_66, %c17_67] : memref<8x290xf32, #tpu.memory_space<vmem>>, vector<8x256xf32>
    tpu.vector_store %arg7[%c0_66, %c17_67], %110 {strides = array<i32>} : memref<8x290xf32, #tpu.memory_space<vmem>>, vector<8x256xf32>,
    %cst_68 = arith.constant 0.000000e+00 : f32
    %114 = vector.broadcast %cst_68 : f32 to vector<8x256xf32>
    %c0_69 = arith.constant 0 : index
    %c0_70 = arith.constant 0 : index
    %115 = vector.load %arg7[%c0_69, %c0_70] : memref<8x290xf32, #tpu.memory_space<vmem>>, vector<8x256xf32>
    %c0_71 = arith.constant 0 : index
    %c0_72 = arith.constant 0 : index
    %c0_73 = arith.constant 0 : index
    %116 = vector.load %arg4[%c0_71, %c0_72, %c0_73] : memref<9x8x8xf32, #tpu.memory_space<vmem>>, vector<1x8x8xf32>
    %117 = vector.shape_cast %116 : vector<1x8x8xf32> to vector<8x8xf32>
    %cst_74 = arith.constant dense<0.000000e+00> : vector<8x256xf32>
    %118 = tpu.matmul %117, %115, %cst_74 {dimension_numbers = #tpu.dot_dimension_numbers<[1], [0], [0], [1], [0, 0, 1, 1], [], []>} : vector<8x8xf32>, vector<8x256xf32>, vector<8x256xf32> -> vector<8x256xf32>
    %cst_75 = arith.constant 0.000000e+00 : f32
    %119 = vector.shape_cast %18 : vector<1x256xi1> to vector<1x256xi1>
    %120 = vector.broadcast %119 : vector<1x256xi1> to vector<8x256xi1>
    %121 = vector.broadcast %cst_75 : f32 to vector<8x256xf32>
    %122 = arith.select %120, %118, %121 : vector<8x256xi1>, vector<8x256xf32>
    %123 = arith.addf %114, %122 : vector<8x256xf32>
    %c0_76 = arith.constant 0 : index
    %c1_77 = arith.constant 1 : index
    %124 = vector.load %arg7[%c0_76, %c1_77] : memref<8x290xf32, #tpu.memory_space<vmem>>, vector<8x256xf32>
    %c1_78 = arith.constant 1 : index
    %c0_79 = arith.constant 0 : index
    %c0_80 = arith.constant 0 : index
    %125 = vector.load %arg4[%c1_78, %c0_79, %c0_80] : memref<9x8x8xf32, #tpu.memory_space<vmem>>, vector<1x8x8xf32>
    %126 = vector.shape_cast %125 : vector<1x8x8xf32> to vector<8x8xf32>
    %cst_81 = arith.constant dense<0.000000e+00> : vector<8x256xf32>
    %127 = tpu.matmul %126, %124, %cst_81 {dimension_numbers = #tpu.dot_dimension_numbers<[1], [0], [0], [1], [0, 0, 1, 1], [], []>} : vector<8x8xf32>, vector<8x256xf32>, vector<8x256xf32> -> vector<8x256xf32>
    %128 = arith.addf %123, %127 : vector<8x256xf32>
    %c0_82 = arith.constant 0 : index
    %c2_83 = arith.constant 2 : index
    %129 = vector.load %arg7[%c0_82, %c2_83] : memref<8x290xf32, #tpu.memory_space<vmem>>, vector<8x256xf32>
    %c2_84 = arith.constant 2 : index
    %c0_85 = arith.constant 0 : index
    %c0_86 = arith.constant 0 : index
    %130 = vector.load %arg4[%c2_84, %c0_85, %c0_86] : memref<9x8x8xf32, #tpu.memory_space<vmem>>, vector<1x8x8xf32>
    %131 = vector.shape_cast %130 : vector<1x8x8xf32> to vector<8x8xf32>
    %cst_87 = arith.constant dense<0.000000e+00> : vector<8x256xf32>
    %132 = tpu.matmul %131, %129, %cst_87 {dimension_numbers = #tpu.dot_dimension_numbers<[1], [0], [0], [1], [0, 0, 1, 1], [], []>} : vector<8x8xf32>, vector<8x256xf32>, vector<8x256xf32> -> vector<8x256xf32>
    %cst_88 = arith.constant 0.000000e+00 : f32
    %133 = vector.shape_cast %20 : vector<1x256xi1> to vector<1x256xi1>
    %134 = vector.broadcast %133 : vector<1x256xi1> to vector<8x256xi1>
    %135 = vector.broadcast %cst_88 : f32 to vector<8x256xf32>
    %136 = arith.select %134, %132, %135 : vector<8x256xi1>, vector<8x256xf32>
    %137 = arith.addf %128, %136 : vector<8x256xf32>
    %c0_89 = arith.constant 0 : index
    %c16_90 = arith.constant 16 : index
    %138 = vector.load %arg7[%c0_89, %c16_90] : memref<8x290xf32, #tpu.memory_space<vmem>>, vector<8x256xf32>
    %c3_91 = arith.constant 3 : index
    %c0_92 = arith.constant 0 : index
    %c0_93 = arith.constant 0 : index
    %139 = vector.load %arg4[%c3_91, %c0_92, %c0_93] : memref<9x8x8xf32, #tpu.memory_space<vmem>>, vector<1x8x8xf32>
    %140 = vector.shape_cast %139 : vector<1x8x8xf32> to vector<8x8xf32>
    %cst_94 = arith.constant dense<0.000000e+00> : vector<8x256xf32>
    %141 = tpu.matmul %140, %138, %cst_94 {dimension_numbers = #tpu.dot_dimension_numbers<[1], [0], [0], [1], [0, 0, 1, 1], [], []>} : vector<8x8xf32>, vector<8x256xf32>, vector<8x256xf32> -> vector<8x256xf32>
    %cst_95 = arith.constant 0.000000e+00 : f32
    %142 = vector.shape_cast %18 : vector<1x256xi1> to vector<1x256xi1>
    %143 = vector.broadcast %142 : vector<1x256xi1> to vector<8x256xi1>
    %144 = vector.broadcast %cst_95 : f32 to vector<8x256xf32>
    %145 = arith.select %143, %141, %144 : vector<8x256xi1>, vector<8x256xf32>
    %146 = arith.addf %137, %145 : vector<8x256xf32>
    %c0_96 = arith.constant 0 : index
    %c17_97 = arith.constant 17 : index
    %147 = vector.load %arg7[%c0_96, %c17_97] : memref<8x290xf32, #tpu.memory_space<vmem>>, vector<8x256xf32>
    %c4_98 = arith.constant 4 : index
    %c0_99 = arith.constant 0 : index
    %c0_100 = arith.constant 0 : index
    %148 = vector.load %arg4[%c4_98, %c0_99, %c0_100] : memref<9x8x8xf32, #tpu.memory_space<vmem>>, vector<1x8x8xf32>
    %149 = vector.shape_cast %148 : vector<1x8x8xf32> to vector<8x8xf32>
    %cst_101 = arith.constant dense<0.000000e+00> : vector<8x256xf32>
    %150 = tpu.matmul %149, %147, %cst_101 {dimension_numbers = #tpu.dot_dimension_numbers<[1], [0], [0], [1], [0, 0, 1, 1], [], []>} : vector<8x8xf32>, vector<8x256xf32>, vector<8x256xf32> -> vector<8x256xf32>
    %151 = arith.addf %146, %150 : vector<8x256xf32>
    %c0_102 = arith.constant 0 : index
    %c18_103 = arith.constant 18 : index
    %152 = vector.load %arg7[%c0_102, %c18_103] : memref<8x290xf32, #tpu.memory_space<vmem>>, vector<8x256xf32>
    %c5_104 = arith.constant 5 : index
    %c0_105 = arith.constant 0 : index
    %c0_106 = arith.constant 0 : index
    %153 = vector.load %arg4[%c5_104, %c0_105, %c0_106] : memref<9x8x8xf32, #tpu.memory_space<vmem>>, vector<1x8x8xf32>
    %154 = vector.shape_cast %153 : vector<1x8x8xf32> to vector<8x8xf32>
    %cst_107 = arith.constant dense<0.000000e+00> : vector<8x256xf32>
    %155 = tpu.matmul %154, %152, %cst_107 {dimension_numbers = #tpu.dot_dimension_numbers<[1], [0], [0], [1], [0, 0, 1, 1], [], []>} : vector<8x8xf32>, vector<8x256xf32>, vector<8x256xf32> -> vector<8x256xf32>
    %cst_108 = arith.constant 0.000000e+00 : f32
    %156 = vector.shape_cast %20 : vector<1x256xi1> to vector<1x256xi1>
    %157 = vector.broadcast %156 : vector<1x256xi1> to vector<8x256xi1>
    %158 = vector.broadcast %cst_108 : f32 to vector<8x256xf32>
    %159 = arith.select %157, %155, %158 : vector<8x256xi1>, vector<8x256xf32>
    %160 = arith.addf %151, %159 : vector<8x256xf32>
    %c0_109 = arith.constant 0 : index
    %c32_110 = arith.constant 32 : index
    %161 = vector.load %arg7[%c0_109, %c32_110] : memref<8x290xf32, #tpu.memory_space<vmem>>, vector<8x256xf32>
    %c6_111 = arith.constant 6 : index
    %c0_112 = arith.constant 0 : index
    %c0_113 = arith.constant 0 : index
    %162 = vector.load %arg4[%c6_111, %c0_112, %c0_113] : memref<9x8x8xf32, #tpu.memory_space<vmem>>, vector<1x8x8xf32>
    %163 = vector.shape_cast %162 : vector<1x8x8xf32> to vector<8x8xf32>
    %cst_114 = arith.constant dense<0.000000e+00> : vector<8x256xf32>
    %164 = tpu.matmul %163, %161, %cst_114 {dimension_numbers = #tpu.dot_dimension_numbers<[1], [0], [0], [1], [0, 0, 1, 1], [], []>} : vector<8x8xf32>, vector<8x256xf32>, vector<8x256xf32> -> vector<8x256xf32>
    %cst_115 = arith.constant 0.000000e+00 : f32
    %165 = vector.shape_cast %18 : vector<1x256xi1> to vector<1x256xi1>
    %166 = vector.broadcast %165 : vector<1x256xi1> to vector<8x256xi1>
    %167 = vector.broadcast %cst_115 : f32 to vector<8x256xf32>
    %168 = arith.select %166, %164, %167 : vector<8x256xi1>, vector<8x256xf32>
    %169 = arith.addf %160, %168 : vector<8x256xf32>
    %c0_116 = arith.constant 0 : index
    %c33_117 = arith.constant 33 : index
    %170 = vector.load %arg7[%c0_116, %c33_117] : memref<8x290xf32, #tpu.memory_space<vmem>>, vector<8x256xf32>
    %c7_118 = arith.constant 7 : index
    %c0_119 = arith.constant 0 : index
    %c0_120 = arith.constant 0 : index
    %171 = vector.load %arg4[%c7_118, %c0_119, %c0_120] : memref<9x8x8xf32, #tpu.memory_space<vmem>>, vector<1x8x8xf32>
    %172 = vector.shape_cast %171 : vector<1x8x8xf32> to vector<8x8xf32>
    %cst_121 = arith.constant dense<0.000000e+00> : vector<8x256xf32>
    %173 = tpu.matmul %172, %170, %cst_121 {dimension_numbers = #tpu.dot_dimension_numbers<[1], [0], [0], [1], [0, 0, 1, 1], [], []>} : vector<8x8xf32>, vector<8x256xf32>, vector<8x256xf32> -> vector<8x256xf32>
    %174 = arith.addf %169, %173 : vector<8x256xf32>
    %c0_122 = arith.constant 0 : index
    %c34_123 = arith.constant 34 : index
    %175 = vector.load %arg7[%c0_122, %c34_123] : memref<8x290xf32, #tpu.memory_space<vmem>>, vector<8x256xf32>
    %c8_124 = arith.constant 8 : index
    %c0_125 = arith.constant 0 : index
    %c0_126 = arith.constant 0 : index
    %176 = vector.load %arg4[%c8_124, %c0_125, %c0_126] : memref<9x8x8xf32, #tpu.memory_space<vmem>>, vector<1x8x8xf32>
    %177 = vector.shape_cast %176 : vector<1x8x8xf32> to vector<8x8xf32>
    %cst_127 = arith.constant dense<0.000000e+00> : vector<8x256xf32>
    %178 = tpu.matmul %177, %175, %cst_127 {dimension_numbers = #tpu.dot_dimension_numbers<[1], [0], [0], [1], [0, 0, 1, 1], [], []>} : vector<8x8xf32>, vector<8x256xf32>, vector<8x256xf32> -> vector<8x256xf32>
    %cst_128 = arith.constant 0.000000e+00 : f32
    %179 = vector.shape_cast %20 : vector<1x256xi1> to vector<1x256xi1>
    %180 = vector.broadcast %179 : vector<1x256xi1> to vector<8x256xi1>
    %181 = vector.broadcast %cst_128 : f32 to vector<8x256xf32>
    %182 = arith.select %180, %178, %181 : vector<8x256xi1>, vector<8x256xf32>
    %183 = arith.addf %174, %182 : vector<8x256xf32>
    %c0_129 = arith.constant 0 : index
    %c0_130 = arith.constant 0 : index
    %184 = vector.load %arg5[%c0_129, %c0_130] : memref<8x1xf32, #tpu.memory_space<vmem>>, vector<8x1xf32>
    %185 = vector.broadcast %184 : vector<8x1xf32> to vector<8x256xf32>
    %186 = arith.addf %183, %185 : vector<8x256xf32>
    %c0_131 = arith.constant 0 : index
    %c0_132 = arith.constant 0 : index
    %c0_133 = arith.constant 0 : index
    %187 = vector.load %arg6[%c0_131, %c0_132, %c0_133] : memref<1x8x256xf32, #tpu.memory_space<vmem>>, vector<1x8x256xf32>
    %188 = vector.shape_cast %187 : vector<1x8x256xf32> to vector<8x256xf32>
    %189 = vector.shape_cast %186 : vector<8x256xf32> to vector<1x8x256xf32>
    tpu.vector_store %arg6[%c0_131, %c0_132, %c0_133], %189 {strides = array<i32>} : memref<1x8x256xf32, #tpu.memory_space<vmem>>, vector<1x8x256xf32>,
    return
  }
  func.func @transform_0(%arg0: i32) -> (i32, i32, i32) {
    %c0_i32 = arith.constant 0 : i32
    %c0_i32_0 = arith.constant 0 : i32
    %c0_i32_1 = arith.constant 0 : i32
    return %arg0, %c0_i32, %c0_i32_0 : i32, i32, i32
  }
  func.func @transform_1(%arg0: i32) -> (i32, i32, i32) {
    %c0_i32 = arith.constant 0 : i32
    %c0_i32_0 = arith.constant 0 : i32
    %c0_i32_1 = arith.constant 0 : i32
    %c0_i32_2 = arith.constant 0 : i32
    return %c0_i32, %c0_i32_0, %c0_i32_1 : i32, i32, i32
  }
  func.func @transform_2(%arg0: i32) -> (i32, i32) {
    %c0_i32 = arith.constant 0 : i32
    %c0_i32_0 = arith.constant 0 : i32
    %c0_i32_1 = arith.constant 0 : i32
    return %c0_i32, %c0_i32_0 : i32, i32
  }
  func.func @transform_3(%arg0: i32) -> (i32, i32, i32) {
    %c0_i32 = arith.constant 0 : i32
    %c0_i32_0 = arith.constant 0 : i32
    %c0_i32_1 = arith.constant 0 : i32
    %c0_i32_2 = arith.constant 0 : i32
    return %c0_i32, %c0_i32_0, %c0_i32_1 : i32, i32, i32
  }
  func.func @transform_4(%arg0: i32) -> (i32, i32) {
    %c0_i32 = arith.constant 0 : i32
    %c0_i32_0 = arith.constant 0 : i32
    %c0_i32_1 = arith.constant 0 : i32
    return %c0_i32, %c0_i32_0 : i32, i32
  }
  func.func @transform_5(%arg0: i32) -> (i32, i32, i32) {
    %c0_i32 = arith.constant 0 : i32
    %c0_i32_0 = arith.constant 0 : i32
    %c0_i32_1 = arith.constant 0 : i32
    return %arg0, %c0_i32, %c0_i32_0 : i32, i32, i32
  }
}

module attributes {stable_mosaic.version = 11 : i64} {
  func.func @_attn_map_kernel(%arg0: i32, %arg1: i32, %arg2: memref<1x4x256xf32, #tpu.memory_space<vmem>>, %arg3: memref<1x4x256xf32, #tpu.memory_space<vmem>>, %arg4: memref<1x256x256xf32, #tpu.memory_space<vmem>>) attributes {dimension_semantics = [#tpu.dimension_semantics<parallel>, #tpu.dimension_semantics<parallel>], iteration_bounds = array<i64: 2, 1>, scalar_prefetch = 0 : i64, scratch_operands = 0 : i64, tpu.core_type = #tpu.core_type<tc>, window_params = [{transform_indices = @transform_0, window_bounds = array<i64: 1, 4, 256>}, {transform_indices = @transform_1, window_bounds = array<i64: 1, 4, 256>}, {transform_indices = @transform_2, window_bounds = array<i64: 1, 256, 256>}]} {
    %c0 = arith.constant 0 : index
    %c0_0 = arith.constant 0 : index
    %c0_1 = arith.constant 0 : index
    %0 = vector.load %arg2[%c0, %c0_0, %c0_1] : memref<1x4x256xf32, #tpu.memory_space<vmem>>, vector<1x4x256xf32>
    %1 = vector.shape_cast %0 : vector<1x4x256xf32> to vector<4x256xf32>
    %2 = arith.truncf %1 : vector<4x256xf32> to vector<4x256xbf16>
    %c0_2 = arith.constant 0 : index
    %c0_3 = arith.constant 0 : index
    %c0_4 = arith.constant 0 : index
    %3 = vector.load %arg3[%c0_2, %c0_3, %c0_4] : memref<1x4x256xf32, #tpu.memory_space<vmem>>, vector<1x4x256xf32>
    %4 = vector.shape_cast %3 : vector<1x4x256xf32> to vector<4x256xf32>
    %5 = arith.truncf %4 : vector<4x256xf32> to vector<4x256xbf16>
    %cst = arith.constant dense<0.000000e+00> : vector<256x256xf32>
    %6 = tpu.matmul %2, %5, %cst {dimension_numbers = #tpu.dot_dimension_numbers<[0], [0], [1], [1], [0, 1, 1, 1], [], []>} : vector<4x256xbf16>, vector<4x256xbf16>, vector<256x256xf32> -> vector<256x256xf32>
    %cst_5 = arith.constant dense<0xFF800000> : vector<256xf32>
    %7 = vector.multi_reduction <maximumf>, %6, %cst_5 [1] : vector<256x256xf32> to vector<256xf32>
    %8 = vector.shape_cast %7 : vector<256xf32> to vector<256x1xf32>
    %9 = vector.broadcast %8 : vector<256x1xf32> to vector<256x256xf32>
    %10 = arith.subf %6, %9 : vector<256x256xf32>
    %11 = math.exp %10 : vector<256x256xf32>
    %cst_6 = arith.constant dense<0.000000e+00> : vector<256xf32>
    %12 = vector.multi_reduction <add>, %11, %cst_6 [1] : vector<256x256xf32> to vector<256xf32>
    %13 = vector.shape_cast %12 : vector<256xf32> to vector<256x1xf32>
    %14 = tpu.reciprocal %13 {approx = true} : vector<256x1xf32> -> vector<256x1xf32>
    %15 = vector.broadcast %14 : vector<256x1xf32> to vector<256x256xf32>
    %16 = arith.mulf %11, %15 : vector<256x256xf32>
    %c0_7 = arith.constant 0 : index
    %c0_8 = arith.constant 0 : index
    %c0_9 = arith.constant 0 : index
    %17 = vector.load %arg4[%c0_7, %c0_8, %c0_9] : memref<1x256x256xf32, #tpu.memory_space<vmem>>, vector<1x256x256xf32>
    %18 = vector.shape_cast %17 : vector<1x256x256xf32> to vector<256x256xf32>
    %19 = vector.shape_cast %16 : vector<256x256xf32> to vector<1x256x256xf32>
    tpu.vector_store %arg4[%c0_7, %c0_8, %c0_9], %19 {strides = array<i32>} : memref<1x256x256xf32, #tpu.memory_space<vmem>>, vector<1x256x256xf32>,
    return
  }
  func.func @transform_0(%arg0: i32, %arg1: i32) -> (i32, i32, i32) {
    %c0_i32 = arith.constant 0 : i32
    %c0_i32_0 = arith.constant 0 : i32
    return %arg0, %c0_i32, %arg1 : i32, i32, i32
  }
  func.func @transform_1(%arg0: i32, %arg1: i32) -> (i32, i32, i32) {
    %c0_i32 = arith.constant 0 : i32
    %c0_i32_0 = arith.constant 0 : i32
    %c0_i32_1 = arith.constant 0 : i32
    return %arg0, %c0_i32, %c0_i32_0 : i32, i32, i32
  }
  func.func @transform_2(%arg0: i32, %arg1: i32) -> (i32, i32, i32) {
    %c0_i32 = arith.constant 0 : i32
    %c0_i32_0 = arith.constant 0 : i32
    return %arg0, %arg1, %c0_i32 : i32, i32, i32
  }
}

</mosaic_0001>

<bundles_post_ra>
// kernel: self_attention_map.3
= control target key start
LH: loop header
LB: loop body
LE: loop exit
PB: predicated region body
PF: predicated region fallthrough
CT: control target
= control target key end

     0   :  { %7 = vsyncpa [#allocation3], 0  ;;  %s2281_s0 = inlined_call_operand.vmem [shape: f32[2,4,256], index: 0, kind: input, shape index: {}]   ;;  %s2282_s1 = inlined_call_operand.vmem [shape: f32[2,4,256], index: 1, kind: input, shape index: {}]   ;;  %s2283_s2 = inlined_call_operand.hbm [shape: f32[2,256,256], index: 2, kind: output, shape index: {}]  }
   0x1   :  { %9 = vsyncpa [#allocation3 + $0x1], 0  ;;  %s1527_s9 = smov 0   ;;  %s1529_s10 = smov 0  }
   0x2   :  { %s1531_s11 = smov 0   ;;  %s1533_s12 = smov 0  }
   0x3   :  { %s1535_s13 = smov 0   ;;  %s1537_s14 = smov 0  }
   0x4 LB: > { %s1139_s15 = sadd.s32 4294967295, %s1506_s14   ;;  %s1140_s16 = sadd.s32 4294967294, %s1506_s14   ;;  %s1506_s14 = sphi %s1537_s14, %s15_s14   ;;  %s1502_s13 = sphi %s1535_s13, %s2363_s13   ;;  %s1498_s12 = sphi %s1533_s12, %s2362_s12   ;;  %s1494_s11 = sphi %s1531_s11, %s2361_s11   ;;  %s1490_s10 = sphi %s1529_s10, %s2360_s10   ;;  %s1486_s9 = sphi %s1527_s9, %s2359_s9  }
   0x5   : > { %s27_s17 = sadd.s32 1, %s1502_s13  ;;  %s90_s18 = sadd.s32 1, %s1494_s11 }
   0x6   : > { %p29_p0 = scmp.ge.s32.totalorder %s27_s17, 2  ;;  %p100_p1 = scmp.ne.s32.totalorder %s1494_s11, %s1490_s10 }
   0x7   : > { %p101_p2 = scmp.eq.s32.totalorder %s1139_s15, 1  ;;  %p106_p3 = scmp.ne.s32.totalorder %s1490_s10, %s1486_s9 }
   0x8   : > { %s2365_s17 = smov (%p29_p0, %s27_s17), 0  ;;  %p107_p5 = scmp.eq.s32.totalorder %s1140_s16, 1 }
   0x9   : > { %p1567_p4 = por %p101_p2, %p100_p1  ;;  %s85_s20 = ssub.s32 %s1502_s13, %s2365_s17 }
   0xa   : > { %p1143_p6 = scmp.ge.s32.totalorder %s1506_s14, 1  ;;  %p88_p7 = scmp.eq.s32.totalorder %s85_s20, 0 }
   0xb   : > { %p1574_p8 = por %p107_p5, %p106_p3  ;;  %p146_p9 = scmp.lt.s32.totalorder %s1506_s14, 3 }
   0xc   : > { %s1580_s22 = scalar_select %p88_p7, %s1494_s11, %s90_s18  }
   0xd   : > { %p147_p10 = pnand %p1143_p6, %p146_p9 }
   0xf   : > { %150 = sbr.rel (%p147_p10) target bundleno = 799 (0x31f), region = 28 }
  0x16   : > { %p178_p11 = scmp.lt.s32.totalorder %s1498_s12, 1  ;;  %v1508_v0 = vmov 0   ;;  %vm287_vm0 = vcmask 1041408   ;;  %vm238_vm1 = vcmask 31744   ;;  %s174_s3 = sand.u32 1, %s1490_s10  }
  0x17   : > { %326 = vmatprep.mubr.bf16.mxu0 %v1508_v0  ;;  %406 = vmatprep.mubr.bf16.mxu1 %v1508_v0  ;;  %s1144_s4 = sshll.u32 %s174_s3, 9  ;;  %s1173_s6 = sshll.u32 %s1498_s12, 13 }
  0x18   : > { %s179_s23 = scalar_select %p178_p11, %s1498_s12, 1 }
  0x19   : > { %s2096_s5 = scalar_lea.vmem [#allocation2], %s1144_s4  ;;  %s2225_s16 = scalar_lea.hbm %s2283_s2, %s1173_s6 }
  0x1a   : > { %s1171_s24 = sshll.u32 %s179_s23, 3  ;;  %s1048_s7 = sshll.u32 %s2096_s5, 4  ;;  %s2227_s7 = int_to_ptr.vmem [resolvable:$true] %s1048_s7 }
  0x1b   : > { %s185_s27 = scalar_lea.vmem %s2281_s0, %s1171_s24  ;;  %s191_s30 = scalar_lea.vmem %s2282_s1, %s1171_s24 }
  0x1c   : > { %v194_v1 = vld [vmem:[%s185_s27] sm:$0xff]  ;;  %s2235_s12 = scalar_lea.sflag [#allocation3], %s174_s3  ;;  %s1428_s18 = scalar_lea.vmem %s2227_s7, 8192 }
  0x1d   : > { %v200_v2 = vld [vmem:[%s191_s30] sm:$0xff]  ;;  %v198_v3 = vpack.c.bf16 %v194_v1, %v194_v1  ;;  %v196_v8 = vcombine.high %v194_v1, %v194_v1  ;;  %p1429_p12 = scmp.ne.s32.totalorder %s2227_s7, %s1428_s18  ;;  %s1509_s20 = smov [#allocation2]  }
  0x1e   : > { %v202_v4 = vcombine.high %v200_v2, %v200_v2  ;;  %v204_v5 = vpack.c.bf16 %v200_v2, %v200_v2  ;;  %s1432_s23 = sshll.u32 %s1509_s20, 4  ;;  %s1433_s23 = int_to_ptr.vmem [resolvable:$false] %s1432_s23 }
  0x1f   : > { %206 = vxpose.xlu0.c.b16.start.end [1/1] (short) %v198_v3, 128  ;;  %v199_v9 = vpack.c.bf16 %v196_v8, %v196_v8  ;;  %p1430_p13 = pnand %p1429_p12, %p1567_p4  ;;  %s1434_s24 = scalar_lea.vmem %s1433_s23, 16384 }
  0x20   : > { %v205_v6 = vpack.c.bf16 %v202_v4, %v202_v4  ;;  %v289_v7 = vsel %vm287_vm0, %v204_v5, 0  ;;  %p1435_p1 = scmp.lt.s32.totalorder %s2227_s7, %s1433_s23  ;;  %p1436_p2 = scmp.lt.s32.totalorder %s1434_s24, %s1428_s18 }
  0x21   : > { %p1431_p0 = pneg %p1430_p13 }
  0x22   : > { %1149 = vmatprep.subr.msk.bf16.mxu0 %vm287_vm0, %v205_v6  ;;  %1174 = vmatprep.subr.msk.bf16.mxu1 %vm287_vm0, %v205_v6  ;;  %p1437_p3 = por %p1436_p2, %p1435_p1 }
  0x23   : > { %295 = vmatpush1.bf16.msra.mxu0 %v289_v7  ;;  %1175 = vmatpush1.bf16.msra.mxu1 %v289_v7 }
  0x24   : > { %p1438_p5 = pnand %p1437_p3, %p1431_p0 }
  0x3c   : > { %222 = vxpose.xlu0.c.b16.start.end [1/1] (short) %v199_v9, 128 }
  0x85   : > { %v214_v10 = vpop.trf.xlu0 }
  0x86   : > { %1150 = vmatmul.mubr.msk.bf16.vlgmr.msra.gmra.mrb[0].mxu0 %vm238_vm1, %v214_v10 }
  0x87   : > { %336 = vmatprep.mubr.bf16.mxu0 %v1508_v0 }
  0x89   : > { %v215_v11 = vpop.trf.xlu0 }
  0x8d   : > { %v216_v12 = vpop.trf.xlu0 }
  0x8e   : > { %1151 = vmatmul.mubr.msk.bf16.gmra.mrb[4].mxu0 %vm238_vm1, %v215_v11 }
  0x8f   : > { %346 = vmatprep.mubr.bf16.mxu0 %v1508_v0 }
  0x91   : > { %v217_v13 = vpop.trf.xlu0 }
  0x95   : > { %v218_v14 = vpop.trf.xlu0 }
  0x96   : > { %1152 = vmatmul.mubr.msk.bf16.gmra.mrb[8].mxu0 %vm238_vm1, %v216_v12 }
  0x97   : > { %356 = vmatprep.mubr.bf16.mxu0 %v1508_v0 }
  0x99   : > { %v219_v15 = vpop.trf.xlu0 }
  0x9d   : > { %v220_v16 = vpop.trf.xlu0 }
  0x9e   : > { %1153 = vmatmul.mubr.msk.bf16.gmra.mrb[12].mxu0 %vm238_vm1, %v217_v13 }
  0x9f   : > { %366 = vmatprep.mubr.bf16.mxu0 %v1508_v0 }
  0xa1   : > { %v221_v17 = vpop.trf.xlu0 }
  0xa5   : > { %v230_v18 = vpop.trf.xlu0 }
  0xa6   : > { %1154 = vmatmul.mubr.msk.bf16.gmra.mrb[16].mxu0 %vm238_vm1, %v218_v14  ;;  %1158 = vmatmul.mubr.msk.bf16.vlgmr.msra.gmra.mrb[0].mxu1 %vm238_vm1, %v230_v18 }
  0xa7   : > { %376 = vmatprep.mubr.bf16.mxu0 %v1508_v0  ;;  %416 = vmatprep.mubr.bf16.mxu1 %v1508_v0 }
  0xa9   : > { %v231_v19 = vpop.trf.xlu0 }
  0xad   : > { %v232_v20 = vpop.trf.xlu0 }
  0xae   : > { %1155 = vmatmul.mubr.msk.bf16.gmra.mrb[20].mxu0 %vm238_vm1, %v219_v15  ;;  %1159 = vmatmul.mubr.msk.bf16.gmra.mrb[4].mxu1 %vm238_vm1, %v231_v19 }
  0xaf   : > { %386 = vmatprep.mubr.bf16.mxu0 %v1508_v0  ;;  %426 = vmatprep.mubr.bf16.mxu1 %v1508_v0 }
  0xb1   : > { %v233_v21 = vpop.trf.xlu0 }
  0xb5   : > { %v234_v22 = vpop.trf.xlu0 }
  0xb6   : > { %1156 = vmatmul.mubr.msk.bf16.gmra.mrb[24].mxu0 %vm238_vm1, %v220_v16  ;;  %1160 = vmatmul.mubr.msk.bf16.gmra.mrb[8].mxu1 %vm238_vm1, %v232_v20 }
  0xb7   : > { %396 = vmatprep.mubr.bf16.mxu0 %v1508_v0  ;;  %436 = vmatprep.mubr.bf16.mxu1 %v1508_v0 }
  0xb9   : > { %v235_v23 = vpop.trf.xlu0 }
  0xbd   : > { %v236_v24 = vpop.trf.xlu0 }
  0xbe   : > { %1157 = vmatmul.mubr.msk.bf16.gmra.mrb[28].mxu0 %vm238_vm1, %v221_v17  ;;  %1161 = vmatmul.mubr.msk.bf16.gmra.mrb[12].mxu1 %vm238_vm1, %v233_v21 }
  0xbf   : > { %446 = vmatprep.mubr.bf16.mxu1 %v1508_v0 }
  0xc1   : > { %v237_v25 = vpop.trf.xlu0 }
  0xc6   : > { %1162 = vmatmul.mubr.msk.bf16.gmra.mrb[16].mxu1 %vm238_vm1, %v234_v22 }
  0xc7   : > { %456 = vmatprep.mubr.bf16.mxu1 %v1508_v0 }
  0xce   : > { %1163 = vmatmul.mubr.msk.bf16.gmra.mrb[20].mxu1 %vm238_vm1, %v235_v23 }
  0xcf   : > { %466 = vmatprep.mubr.bf16.mxu1 %v1508_v0 }
  0xd6   : > { %1164 = vmatmul.mubr.msk.bf16.gmra.mrb[24].mxu1 %vm238_vm1, %v236_v24 }
  0xd7   : > { %476 = vmatprep.mubr.bf16.mxu1 %v1508_v0 }
  0xde   : > { %1165 = vmatmul.mubr.msk.bf16.gmra.mrb[28].mxu1 %vm238_vm1, %v237_v25 }
 0x159   : > { %v1622_v26 = vpop.f32.mrb[0].mxu0 }
 0x15a   : > { %v1624_v27 = vpop.f32.mrb[1].mxu0 }
 0x15b   : > { %v1626_v28 = vpop.f32.mrb[2].mxu0  ;;  %v487_v29 = vmax.f32 %v1622_v26, %v1624_v27 }
 0x15c   : > { %v1630_v30 = vpop.f32.mrb[3].mxu0 }
 0x15d   : > { %488 = vmax.xlane.f32.xlu1 %v487_v29  ;;  %v490_v31 = vmax.f32 %v1626_v28, %v1630_v30 }
 0x161   : > { %491 = vmax.xlane.f32.xlu1 %v490_v31  ;;  %v1634_v32 = vpop.f32.mrb[4].mxu0 }
 0x162   : > { %v1636_v33 = vpop.f32.mrb[5].mxu0 }
 0x163   : > { %v1638_v34 = vpop.f32.mrb[6].mxu0  ;;  %v493_v35 = vmax.f32 %v1634_v32, %v1636_v33 }
 0x164   : > { %v1642_v36 = vpop.f32.mrb[7].mxu0 }
 0x165   : > { %v496_v37 = vmax.f32 %v1638_v34, %v1642_v36 }
 0x169   : > { %v1646_v38 = vpop.f32.mrb[8].mxu0 }
 0x16a   : > { %v1648_v39 = vpop.f32.mrb[9].mxu0 }
 0x16b   : > { %v1650_v40 = vpop.f32.mrb[10].mxu0  ;;  %v499_v41 = vmax.f32 %v1646_v38, %v1648_v39 }
 0x16c   : > { %v1654_v42 = vpop.f32.mrb[11].mxu0 }
 0x16d   : > { %v502_v43 = vmax.f32 %v1650_v40, %v1654_v42 }
 0x171   : > { %v1658_v44 = vpop.f32.mrb[12].mxu0 }
 0x172   : > { %v1660_v45 = vpop.f32.mrb[13].mxu0 }
 0x173   : > { %v1662_v46 = vpop.f32.mrb[14].mxu0  ;;  %v505_v47 = vmax.f32 %v1658_v44, %v1660_v45 }
 0x174   : > { %v1666_v48 = vpop.f32.mrb[15].mxu0 }
 0x179   : > { %v1670_v50 = vpop.f32.mrb[16].mxu0  ;;  %v1672_v51 = vpop.f32.mrb[0].mxu1 }
 0x17a   : > { %v1674_v52 = vpop.f32.mrb[17].mxu0  ;;  %v1676_v53 = vpop.f32.mrb[1].mxu1 }
 0x17b   : > { %v1678_v54 = vpop.f32.mrb[18].mxu0  ;;  %v1680_v55 = vpop.f32.mrb[2].mxu1  ;;  %v535_v56 = vmax.f32 %v1672_v51, %v1676_v53 }
 0x17c   : > { %v1686_v58 = vpop.f32.mrb[19].mxu0  ;;  %v1688_v59 = vpop.f32.mrb[3].mxu1 }
 0x17d   : > { %536 = vmax.xlane.f32.xlu1 %v535_v56  ;;  %v538_v60 = vmax.f32 %v1680_v55, %v1688_v59  ;;  %v514_v61 = vmax.f32 %v1678_v54, %v1686_v58 }
 0x181   : > { %v1694_v62 = vpop.f32.mrb[20].mxu0  ;;  %539 = vmax.xlane.f32.xlu1 %v538_v60  ;;  %v1696_v63 = vpop.f32.mrb[4].mxu1 }
 0x182   : > { %v1698_v0 = vpop.f32.mrb[21].mxu0  ;;  %v1700_v1 = vpop.f32.mrb[5].mxu1 }
 0x183   : > { %v1702_v2 = vpop.f32.mrb[22].mxu0  ;;  %v1704_v3 = vpop.f32.mrb[6].mxu1  ;;  %v541_v4 = vmax.f32 %v1696_v63, %v1700_v1 }
 0x184   : > { %v1710_v6 = vpop.f32.mrb[23].mxu0  ;;  %v1712_v7 = vpop.f32.mrb[7].mxu1 }
 0x185   : > { %494 = vmax.xlane.f32.xlu1 %v493_v35  ;;  %v544_v8 = vmax.f32 %v1704_v3, %v1712_v7 }
 0x189   : > { %v1718_v10 = vpop.f32.mrb[24].mxu0  ;;  %497 = vmax.xlane.f32.xlu1 %v496_v37  ;;  %v1720_v11 = vpop.f32.mrb[8].mxu1 }
 0x18a   : > { %2309 = vst [vmem:[#allocation5_spill] sm:$0xff] %v1718_v10  ;;  %v1722_v12 = vpop.f32.mrb[25].mxu0  ;;  %v1724_v13 = vpop.f32.mrb[9].mxu1 }
 0x18b   : > { %2310 = vst [vmem:[#allocation6_spill] sm:$0xff] %v1722_v12  ;;  %v1726_v14 = vpop.f32.mrb[26].mxu0  ;;  %v547_v15 = vmax.f32 %v1720_v11, %v1724_v13  ;;  %v1730_v16 = vpop.f32.mrb[10].mxu1  ;;  %v523_v17 = vmax.f32 %v1718_v10, %v1722_v12  ;;  %v2322_v12 = vmax.f32 %v1670_v50, %v1674_v52 }
 0x18c   : > { %2311 = vst [vmem:[#allocation7_spill] sm:$0xff] %v1726_v14  ;;  %v1734_v18 = vpop.f32.mrb[27].mxu0  ;;  %v1736_v19 = vpop.f32.mrb[11].mxu1 }
 0x18d   : > { %2312 = vst [vmem:[#allocation8_spill] sm:$0xff] %v1734_v18  ;;  %542 = vmax.xlane.f32.xlu1 %v541_v4  ;;  %548 = vmax.xlane.f32.xlu0 %v547_v15  ;;  %v550_v20 = vmax.f32 %v1730_v16, %v1736_v19  ;;  %v526_v21 = vmax.f32 %v1726_v14, %v1734_v18 }
 0x191   : > { %v1742_v22 = vpop.f32.mrb[28].mxu0  ;;  %545 = vmax.xlane.f32.xlu1 %v544_v8  ;;  %v1744_v23 = vpop.f32.mrb[12].mxu1 }
 0x192   : > { %2313 = vst [vmem:[#allocation9_spill] sm:$0xff] %v1742_v22  ;;  %v1746_v24 = vpop.f32.mrb[29].mxu0  ;;  %v1748_v25 = vpop.f32.mrb[13].mxu1 }
 0x193   : > { %2314 = vst [vmem:[#allocation10_spill] sm:$0xff] %v1746_v24  ;;  %v1750_v29 = vpop.f32.mrb[30].mxu0  ;;  %v553_v31 = vmax.f32 %v1744_v23, %v1748_v25  ;;  %v1754_v35 = vpop.f32.mrb[14].mxu1  ;;  %v529_v37 = vmax.f32 %v1742_v22, %v1746_v24 }
 0x194   : > { %2315 = vst [vmem:[#allocation11_spill] sm:$0xff] %v1750_v29  ;;  %v1758_v56 = vpop.f32.mrb[31].mxu0  ;;  %v1760_v60 = vpop.f32.mrb[15].mxu1 }
 0x195   : > { %2316 = vst [vmem:[#allocation12_spill] sm:$0xff] %v1758_v56  ;;  %v532_v4 = vmax.f32 %v1750_v29, %v1758_v56  ;;  %500 = vmax.xlane.f32.xlu1 %v499_v41  ;;  %554 = vmax.xlane.f32.xlu0 %v553_v31  ;;  %v556_v8 = vmax.f32 %v1754_v35, %v1760_v60 }
 0x199   : > { %503 = vmax.xlane.f32.xlu1 %v502_v43  ;;  %515 = vmax.xlane.f32.xlu0 %v514_v61  ;;  %v1772_v15 = vpop.f32.mrb[16].mxu1 }
 0x19a   : > { %v1774_v9 = vpop.f32.mrb[17].mxu1 }
 0x19b   : > { %v559_v5 = vmax.f32 %v1772_v15, %v1774_v9  ;;  %v1778_v57 = vpop.f32.mrb[18].mxu1 }
 0x19c   : > { %v1780_v49 = vpop.f32.mrb[19].mxu1 }
 0x19d   : > { %551 = vmax.xlane.f32.xlu1 %v550_v20  ;;  %560 = vmax.xlane.f32.xlu0 %v559_v5  ;;  %v562_v41 = vmax.f32 %v1778_v57, %v1780_v49  ;;  %v2319_v5 = vmax.f32 %v1662_v46, %v1666_v48 }
 0x1a1   : > { %506 = vmax.xlane.f32.xlu1 %v505_v47  ;;  %v1787_v43 = vpop.f32.mrb[20].mxu1 }
 0x1a2   : > { %v1789_v61 = vpop.f32.mrb[21].mxu1 }
 0x1a3   : > { %v565_v31 = vmax.f32 %v1787_v43, %v1789_v61  ;;  %v1793_v56 = vpop.f32.mrb[22].mxu1 }
 0x1a4   : > { %2317 = vst [vmem:[#allocation13_spill] sm:$0xff] %v1793_v56  ;;  %v1795_v29 = vpop.f32.mrb[23].mxu1 }
 0x1a5   : > { %2318 = vst [vmem:[#allocation14_spill] sm:$0xff] %v1795_v29  ;;  %509 = vmax.xlane.f32.xlu1 %v2319_v5  ;;  %566 = vmax.xlane.f32.xlu0 %v565_v31  ;;  %v568_v20 = vmax.f32 %v1793_v56, %v1795_v29  ;;  %v2326_v56 = vmax.f32 %v1694_v62, %v1698_v0 }
 0x1a9   : > { %557 = vmax.xlane.f32.xlu1 %v556_v8  ;;  %v1802_v47 = vpop.f32.mrb[24].mxu1 }
 0x1aa   : > { %v1804_v24 = vpop.f32.mrb[25].mxu1 }
 0x1ab   : > { %2320 = vst [vmem:[#allocation15_spill] sm:$0xff] %v1804_v24  ;;  %v571_v22 = vmax.f32 %v1802_v47, %v1804_v24  ;;  %v1808_v18 = vpop.f32.mrb[26].mxu1 }
 0x1ac   : > { %v1810_v14 = vpop.f32.mrb[27].mxu1 }
 0x1ad   : > { %2321 = vst [vmem:[#allocation16_spill] sm:$0xff] %v1810_v14  ;;  %512 = vmax.xlane.f32.xlu1 %v2322_v12  ;;  %572 = vmax.xlane.f32.xlu0 %v571_v22  ;;  %v574_v31 = vmax.f32 %v1808_v18, %v1810_v14  ;;  %v2327_v22 = vmax.f32 %v1702_v2, %v1710_v6 }
 0x1b1   : > { %563 = vmax.xlane.f32.xlu1 %v562_v41  ;;  %v1817_v8 = vpop.f32.mrb[28].mxu1 }
 0x1b2   : > { %2323 = vst [vmem:[#allocation17_spill] sm:$0xff] %v1817_v8  ;;  %v1819_v5 = vpop.f32.mrb[29].mxu1 }
 0x1b3   : > { %2324 = vst [vmem:[#allocation18_spill] sm:$0xff] %v1819_v5  ;;  %v577_v10 = vmax.f32 %v1817_v8, %v1819_v5  ;;  %v1823_v24 = vpop.f32.mrb[30].mxu1 }
 0x1b4   : > { %v1825_v29 = vpop.f32.mrb[31].mxu1 }
 0x1b5   : > { %2325 = vst [vmem:[#allocation19_spill] sm:$0xff] %v1825_v29  ;;  %518 = vmax.xlane.f32.xlu1 %v2326_v56  ;;  %578 = vmax.xlane.f32.xlu0 %v577_v10  ;;  %v580_v12 = vmax.f32 %v1823_v24, %v1825_v29 }
 0x1b9   : > { %521 = vmax.xlane.f32.xlu1 %v2327_v22 }
 0x1bd   : > { %569 = vmax.xlane.f32.xlu1 %v568_v20 }
 0x1c1   : > { %524 = vmax.xlane.f32.xlu1 %v523_v17 }
 0x1c5   : > { %527 = vmax.xlane.f32.xlu1 %v526_v21 }
 0x1c9   : > { %575 = vmax.xlane.f32.xlu1 %v574_v31 }
 0x1cd   : > { %530 = vmax.xlane.f32.xlu1 %v529_v37 }
 0x1d1   : > { %533 = vmax.xlane.f32.xlu1 %v532_v4 }
 0x1d5   : > { %581 = vmax.xlane.f32.xlu1 %v580_v12 }
 0x1ea   : > { %v489_v41 = vpop.xlane.xlu1 %488 }
 0x1eb   : > { %v583_v5 = vsub.f32 %v1622_v26, %v489_v41  ;;  %v584_v56 = vsub.f32 %v1624_v27, %v489_v41 }
 0x1ed   : > { %v647_v10 = vmul.f32 1.442695, %v583_v5  ;;  %v649_v8 = vmul.f32 1.442695, %v584_v56 }
 0x1ee   : > { %v492_v14 = vpop.xlane.xlu1 %491 }
 0x1ef   : > { %1236 = vpow2.f32 %v647_v10  ;;  %v585_v29 = vsub.f32 %v1626_v28, %v492_v14  ;;  %v586_v22 = vsub.f32 %v1630_v30, %v492_v14 }
 0x1f0   : > { %1238 = vpow2.f32 %v649_v8 }
 0x1f1   : > { %v651_v17 = vmul.f32 1.442695, %v585_v29  ;;  %v653_v21 = vmul.f32 1.442695, %v586_v22 }
 0x1f3   : > { %1240 = vpow2.f32 %v651_v17 }
 0x1f4   : > { %1242 = vpow2.f32 %v653_v21 }
 0x1f9   : > { %v1839_v37 = vpop.eup %1236 }
 0x1fa   : > { %v1841_v4 = vpop.eup %1238 }
 0x1fb   : > { %v775_v26 = vadd.f32 %v1841_v4, %v1839_v37 }
 0x1fd   : > { %v1845_v27 = vpop.eup %1240  ;;  %776 = vadd.xlane.f32.xlu0 %v775_v26 }
 0x1fe   : > { %v1847_v20 = vpop.eup %1242 }
 0x1ff   : > { %v778_v28 = vadd.f32 %v1847_v20, %v1845_v27 }
 0x201   : > { %779 = vadd.xlane.f32.xlu1 %v778_v28 }
 0x20a   : > { %v537_v30 = vpop.xlane.xlu1 %536 }
 0x20b   : > { %v615_v14 = vsub.f32 %v1672_v51, %v537_v30  ;;  %v616_v29 = vsub.f32 %v1676_v53, %v537_v30 }
 0x20d   : > { %v711_v31 = vmul.f32 1.442695, %v615_v14  ;;  %v713_v8 = vmul.f32 1.442695, %v616_v29 }
 0x20e   : > { %v540_v5 = vpop.xlane.xlu1 %539 }
 0x20f   : > { %1244 = vpow2.f32 %v711_v31  ;;  %v617_v12 = vsub.f32 %v1680_v55, %v540_v5  ;;  %v618_v41 = vsub.f32 %v1688_v59, %v540_v5 }
 0x210   : > { %1246 = vpow2.f32 %v713_v8 }
 0x211   : > { %v715_v56 = vmul.f32 1.442695, %v617_v12  ;;  %v717_v10 = vmul.f32 1.442695, %v618_v41 }
 0x212   : > { %v495_v22 = vpop.xlane.xlu1 %494 }
 0x213   : > { %1248 = vpow2.f32 %v715_v56  ;;  %v587_v17 = vsub.f32 %v1634_v32, %v495_v22  ;;  %v588_v21 = vsub.f32 %v1636_v33, %v495_v22 }
 0x214   : > { %1250 = vpow2.f32 %v717_v10 }
 0x215   : > { %v655_v51 = vmul.f32 1.442695, %v587_v17  ;;  %v657_v53 = vmul.f32 1.442695, %v588_v21 }
 0x216   : > { %v498_v26 = vpop.xlane.xlu1 %497 }
 0x217   : > { %1252 = vpow2.f32 %v655_v51  ;;  %v589_v28 = vsub.f32 %v1638_v34, %v498_v26  ;;  %v590_v55 = vsub.f32 %v1642_v36, %v498_v26 }
 0x218   : > { %1254 = vpow2.f32 %v657_v53 }
 0x219   : > { %v1859_v59 = vpop.eup %1244  ;;  %v659_v30 = vmul.f32 1.442695, %v589_v28  ;;  %v661_v14 = vmul.f32 1.442695, %v590_v55 }
 0x21a   : > { %v1861_v29 = vpop.eup %1246  ;;  %v543_v31 = vpop.xlane.xlu1 %542 }
 0x21b   : > { %1256 = vpow2.f32 %v659_v30  ;;  %v619_v32 = vsub.f32 %v1696_v63, %v543_v31  ;;  %v620_v33 = vsub.f32 %v1700_v1, %v543_v31  ;;  %v823_v8 = vadd.f32 %v1861_v29, %v1859_v59  ;;  %v549_v41 = vpop.xlane.xlu0 %548 }
 0x21c   : > { %1258 = vpow2.f32 %v661_v14  ;;  %v623_v17 = vsub.f32 %v1720_v11, %v549_v41  ;;  %v624_v26 = vsub.f32 %v1724_v13, %v549_v41 }
 0x21d   : > { %v1867_v34 = vpop.eup %1248  ;;  %v719_v36 = vmul.f32 1.442695, %v619_v32  ;;  %v721_v5 = vmul.f32 1.442695, %v620_v33  ;;  %824 = vadd.xlane.f32.xlu0 %v823_v8 }
 0x21e   : > { %v1869_v12 = vpop.eup %1250  ;;  %v546_v56 = vpop.xlane.xlu1 %545  ;;  %v727_v11 = vmul.f32 1.442695, %v623_v17  ;;  %v729_v33 = vmul.f32 1.442695, %v624_v26 }
 0x21f   : > { %1260 = vpow2.f32 %v719_v36  ;;  %v621_v10 = vsub.f32 %v1704_v3, %v546_v56  ;;  %v622_v63 = vsub.f32 %v1712_v7, %v546_v56  ;;  %v826_v1 = vadd.f32 %v1869_v12, %v1867_v34 }
 0x220   : > { %1262 = vpow2.f32 %v721_v5 }
 0x221   : > { %v1875_v22 = vpop.eup %1252  ;;  %v723_v21 = vmul.f32 1.442695, %v621_v10  ;;  %v725_v51 = vmul.f32 1.442695, %v622_v63  ;;  %827 = vadd.xlane.f32.xlu1 %v826_v1 }
 0x222   : > { %v1878_v53 = vpop.eup %1254  ;;  %v501_v28 = vpop.xlane.xlu1 %500 }
 0x223   : > { %1264 = vpow2.f32 %v723_v21  ;;  %v591_v3 = vsub.f32 %v1646_v38, %v501_v28  ;;  %v592_v7 = vsub.f32 %v1648_v39, %v501_v28  ;;  %v781_v55 = vadd.f32 %v1878_v53, %v1875_v22  ;;  %v555_v8 = vpop.xlane.xlu0 %554 }
 0x224   : > { %1266 = vpow2.f32 %v725_v51  ;;  %v627_v21 = vsub.f32 %v1744_v23, %v555_v8 }
 0x225   : > { %v1885_v30 = vpop.eup %1256  ;;  %v663_v14 = vmul.f32 1.442695, %v591_v3  ;;  %v665_v31 = vmul.f32 1.442695, %v592_v7  ;;  %782 = vadd.xlane.f32.xlu0 %v781_v55  ;;  %v628_v7 = vsub.f32 %v1748_v25, %v555_v8 }
 0x226   : > { %v1887_v32 = vpop.eup %1258  ;;  %v504_v13 = vpop.xlane.xlu1 %503  ;;  %v735_v23 = vmul.f32 1.442695, %v627_v21 }
 0x227   : > { %1268 = vpow2.f32 %v663_v14  ;;  %v593_v38 = vsub.f32 %v1650_v40, %v504_v13  ;;  %v594_v39 = vsub.f32 %v1654_v42, %v504_v13  ;;  %v784_v36 = vadd.f32 %v1887_v32, %v1885_v30  ;;  %v516_v51 = vpop.xlane.xlu0 %515 }
 0x228   : > { %1270 = vpow2.f32 %v665_v31  ;;  %v737_v25 = vmul.f32 1.442695, %v628_v7  ;;  %v601_v8 = vsub.f32 %v1678_v54, %v516_v51  ;;  %v602_v54 = vsub.f32 %v1686_v58, %v516_v51 }
 0x229   : > { %v1893_v5 = vpop.eup %1260  ;;  %1272 = vpow2.f32 %v727_v11  ;;  %v667_v41 = vmul.f32 1.442695, %v593_v38  ;;  %v669_v56 = vmul.f32 1.442695, %v594_v39  ;;  %785 = vadd.xlane.f32.xlu1 %v784_v36 }
 0x22a   : > { %v1895_v10 = vpop.eup %1262  ;;  %1274 = vpow2.f32 %v729_v33  ;;  %v552_v63 = vpop.xlane.xlu1 %551  ;;  %v683_v21 = vmul.f32 1.442695, %v601_v8 }
 0x22b   : > { %1276 = vpow2.f32 %v667_v41  ;;  %v625_v1 = vsub.f32 %v1730_v16, %v552_v63  ;;  %v626_v40 = vsub.f32 %v1736_v19, %v552_v63  ;;  %v829_v42 = vadd.f32 %v1895_v10, %v1893_v5 }
 0x22c   : > { %1278 = vpow2.f32 %v669_v56 }
 0x22d   : > { %v1901_v17 = vpop.eup %1264  ;;  %v731_v26 = vmul.f32 1.442695, %v625_v1  ;;  %v733_v28 = vmul.f32 1.442695, %v626_v40  ;;  %830 = vadd.xlane.f32.xlu0 %v829_v42 }
 0x22e   : > { %v1904_v3 = vpop.eup %1266  ;;  %v507_v55 = vpop.xlane.xlu1 %506 }
 0x22f   : > { %1280 = vpow2.f32 %v731_v26  ;;  %v595_v16 = vsub.f32 %v1658_v44, %v507_v55  ;;  %v596_v19 = vsub.f32 %v1660_v45, %v507_v55  ;;  %v832_v11 = vadd.f32 %v1904_v3, %v1901_v17  ;;  %v561_v44 = vpop.xlane.xlu0 %560 }
 0x230   : > { %1282 = vpow2.f32 %v733_v28  ;;  %v685_v55 = vmul.f32 1.442695, %v602_v54 }
 0x231   : > { %v1911_v14 = vpop.eup %1268  ;;  %v671_v31 = vmul.f32 1.442695, %v595_v16  ;;  %v673_v33 = vmul.f32 1.442695, %v596_v19  ;;  %833 = vadd.xlane.f32.xlu1 %v832_v11  ;;  %v632_v16 = vsub.f32 %v1774_v9, %v561_v44 }
 0x232   : > { %v1913_v13 = vpop.eup %1270  ;;  %v510_v38 = vpop.xlane.xlu1 %509 }
 0x233   : > { %v1916_v39 = vpop.eup %1272  ;;  %1284 = vpow2.f32 %v671_v31  ;;  %v597_v45 = vsub.f32 %v1662_v46, %v510_v38  ;;  %v598_v36 = vsub.f32 %v1666_v48, %v510_v38  ;;  %v787_v56 = vadd.f32 %v1913_v13, %v1911_v14 }
 0x234   : > { %v1920_v41 = vpop.eup %1274  ;;  %1286 = vpow2.f32 %v673_v33  ;;  %v631_v46 = vsub.f32 %v1772_v15, %v561_v44  ;;  %v745_v8 = vmul.f32 1.442695, %v632_v16 }
 0x235   : > { %v1924_v63 = vpop.eup %1276  ;;  %1288 = vpow2.f32 %v735_v23  ;;  %v675_v1 = vmul.f32 1.442695, %v597_v45  ;;  %v677_v40 = vmul.f32 1.442695, %v598_v36  ;;  %788 = vadd.xlane.f32.xlu0 %v787_v56  ;;  %v835_v58 = vadd.f32 %v1920_v41, %v1916_v39  ;;  %v567_v23 = vpop.xlane.xlu0 %566 }
 0x236   : > { %v1927_v42 = vpop.eup %1278  ;;  %1290 = vpow2.f32 %v737_v25  ;;  %v558_v48 = vpop.xlane.xlu1 %557  ;;  %v635_v36 = vsub.f32 %v1787_v43, %v567_v23  ;;  %v636_v43 = vsub.f32 %v1789_v61, %v567_v23 }
 0x237   : > { %1292 = vpow2.f32 %v675_v1  ;;  %v629_v26 = vsub.f32 %v1754_v35, %v558_v48  ;;  %v630_v28 = vsub.f32 %v1760_v60, %v558_v48  ;;  %v790_v7 = vadd.f32 %v1927_v42, %v1924_v63 }
 0x238   : > { %1294 = vpow2.f32 %v677_v40  ;;  %v743_v35 = vmul.f32 1.442695, %v631_v46 }
 0x239   : > { %v1936_v51 = vpop.eup %1280  ;;  %v739_v15 = vmul.f32 1.442695, %v629_v26  ;;  %v741_v19 = vmul.f32 1.442695, %v630_v28  ;;  %791 = vadd.xlane.f32.xlu1 %v790_v7  ;;  %1296 = vpow2.f32 %v683_v21  ;;  %836 = vadd.xlane.f32.xlu0 %v835_v58  ;;  %v751_v28 = vmul.f32 1.442695, %v635_v36 }
 0x23a   : > { %v1939_v11 = vpop.eup %1282  ;;  %v513_v60 = vpop.xlane.xlu1 %512 }
 0x23b   : > { %1298 = vpow2.f32 %v739_v15  ;;  %v599_v31 = vsub.f32 %v1670_v50, %v513_v60  ;;  %v600_v33 = vsub.f32 %v1674_v52, %v513_v60  ;;  %v838_v25 = vadd.f32 %v1939_v11, %v1936_v51  ;;  %v573_v23 = vpop.xlane.xlu0 %572 }
 0x23c   : > { %1300 = vpow2.f32 %v741_v19  ;;  %v753_v15 = vmul.f32 1.442695, %v636_v43  ;;  %v2329_v43 = vld [vmem:[#allocation14_spill] sm:$0xff] }
 0x23d   : > { %v1945_v9 = vpop.eup %1284  ;;  %1302 = vpow2.f32 %v685_v55  ;;  %v679_v38 = vmul.f32 1.442695, %v599_v31  ;;  %v681_v44 = vmul.f32 1.442695, %v600_v33  ;;  %839 = vadd.xlane.f32.xlu1 %v838_v25 }
 0x23e   : > { %v1947_v45 = vpop.eup %1286  ;;  %1304 = vpow2.f32 %v743_v35  ;;  %v564_v56 = vpop.xlane.xlu1 %563 }
 0x23f   : > { %v1950_v50 = vpop.eup %1288  ;;  %1306 = vpow2.f32 %v679_v38  ;;  %v633_v52 = vsub.f32 %v1778_v57, %v564_v56  ;;  %v634_v54 = vsub.f32 %v1780_v49, %v564_v56  ;;  %v793_v1 = vadd.f32 %v1947_v45, %v1945_v9 }
 0x240   : > { %v1956_v40 = vpop.eup %1290  ;;  %1308 = vpow2.f32 %v681_v44 }
 0x241   : > { %v1958_v21 = vpop.eup %1292  ;;  %1310 = vpow2.f32 %v745_v8  ;;  %v747_v46 = vmul.f32 1.442695, %v633_v52  ;;  %v749_v48 = vmul.f32 1.442695, %v634_v54  ;;  %794 = vadd.xlane.f32.xlu0 %v793_v1  ;;  %v841_v58 = vadd.f32 %v1956_v40, %v1950_v50 }
 0x242   : > { %v1961_v26 = vpop.eup %1294  ;;  %v519_v57 = vpop.xlane.xlu1 %518  ;;  %v639_v52 = vsub.f32 %v1802_v47, %v573_v23 }
 0x243   : > { %1312 = vpow2.f32 %v747_v46  ;;  %v603_v49 = vsub.f32 %v1694_v62, %v519_v57  ;;  %v604_v7 = vsub.f32 %v1698_v0, %v519_v57  ;;  %v1967_v55 = vpop.eup %1296  ;;  %v796_v61 = vadd.f32 %v1961_v26, %v1958_v21 }
 0x244   : > { %1314 = vpow2.f32 %v749_v48 }
 0x245   : > { %v1971_v16 = vpop.eup %1298  ;;  %v687_v19 = vmul.f32 1.442695, %v603_v49  ;;  %v689_v35 = vmul.f32 1.442695, %v604_v7  ;;  %842 = vadd.xlane.f32.xlu0 %v841_v58  ;;  %1316 = vpow2.f32 %v751_v28  ;;  %797 = vadd.xlane.f32.xlu1 %v796_v61  ;;  %v2330_v49 = vld [vmem:[#allocation15_spill] sm:$0xff] }
 0x246   : > { %v1973_v60 = vpop.eup %1300  ;;  %v522_v62 = vpop.xlane.xlu1 %521  ;;  %v640_v47 = vsub.f32 %v2330_v49, %v573_v23  ;;  %v2336_v49 = vld [vmem:[#allocation8_spill] sm:$0xff] }
 0x247   : > { %v1975_v0 = vpop.eup %1302  ;;  %1318 = vpow2.f32 %v687_v19  ;;  %v605_v31 = vsub.f32 %v1702_v2, %v522_v62  ;;  %v606_v33 = vsub.f32 %v1710_v6, %v522_v62  ;;  %v844_v25 = vadd.f32 %v1973_v60, %v1971_v16  ;;  %v2328_v6 = vld [vmem:[#allocation13_spill] sm:$0xff] }
 0x248   : > { %v1981_v8 = vpop.eup %1304  ;;  %1320 = vpow2.f32 %v689_v35  ;;  %v802_v28 = vadd.f32 %v1975_v0, %v1967_v55  ;;  %v2331_v62 = vld [vmem:[#allocation5_spill] sm:$0xff] }
 0x249   : > { %v1983_v38 = vpop.eup %1306  ;;  %1322 = vpow2.f32 %v753_v15  ;;  %v691_v44 = vmul.f32 1.442695, %v605_v31  ;;  %v693_v36 = vmul.f32 1.442695, %v606_v33  ;;  %845 = vadd.xlane.f32.xlu1 %v844_v25  ;;  %v759_v15 = vmul.f32 1.442695, %v639_v52 }
 0x24a   : > { %v1985_v56 = vpop.eup %1308  ;;  %v570_v54 = vpop.xlane.xlu1 %569  ;;  %v2332_v33 = vld [vmem:[#allocation6_spill] sm:$0xff] }
 0x24b   : > { %v1988_v2 = vpop.eup %1310  ;;  %1324 = vpow2.f32 %v691_v44  ;;  %v637_v1 = vsub.f32 %v2328_v6, %v570_v54  ;;  %v638_v46 = vsub.f32 %v2329_v43, %v570_v54  ;;  %v799_v48 = vadd.f32 %v1985_v56, %v1983_v38 }
 0x24c   : > { %1326 = vpow2.f32 %v693_v36  ;;  %v847_v35 = vadd.f32 %v1988_v2, %v1981_v8  ;;  %v761_v54 = vmul.f32 1.442695, %v640_v47 }
 0x24d   : > { %v1996_v57 = vpop.eup %1312  ;;  %v755_v7 = vmul.f32 1.442695, %v637_v1  ;;  %v757_v58 = vmul.f32 1.442695, %v638_v46  ;;  %800 = vadd.xlane.f32.xlu0 %v799_v48  ;;  %803 = vadd.xlane.f32.xlu1 %v802_v28  ;;  %v2335_v48 = vld [vmem:[#allocation7_spill] sm:$0xff] }
 0x24e   : > { %v1999_v61 = vpop.eup %1314  ;;  %v525_v19 = vpop.xlane.xlu1 %524 }
 0x24f   : > { %1328 = vpow2.f32 %v755_v7  ;;  %v607_v31 = vsub.f32 %v2331_v62, %v525_v19  ;;  %v608_v25 = vsub.f32 %v2332_v33, %v525_v19  ;;  %v850_v44 = vadd.f32 %v1999_v61, %v1996_v57  ;;  %v2007_v23 = vpop.eup %1316  ;;  %v579_v62 = vpop.xlane.xlu0 %578 }
 0x250   : > { %2333 = vst [vmem:[#allocation13_spill] sm:$0xff] %v2007_v23  ;;  %1330 = vpow2.f32 %v757_v58 }
 0x251   : > { %v2009_v36 = vpop.eup %1318  ;;  %v695_v52 = vmul.f32 1.442695, %v607_v31  ;;  %v697_v6 = vmul.f32 1.442695, %v608_v25  ;;  %848 = vadd.xlane.f32.xlu0 %v847_v35  ;;  %1332 = vpow2.f32 %v759_v15  ;;  %851 = vadd.xlane.f32.xlu1 %v850_v44  ;;  %v2338_v44 = vld [vmem:[#allocation16_spill] sm:$0xff] }
 0x252   : > { %v2011_v1 = vpop.eup %1320  ;;  %v528_v43 = vpop.xlane.xlu1 %527 }
 0x253   : > { %v2013_v46 = vpop.eup %1322  ;;  %1334 = vpow2.f32 %v695_v52  ;;  %v609_v28 = vsub.f32 %v2335_v48, %v528_v43  ;;  %v610_v7 = vsub.f32 %v2336_v49, %v528_v43  ;;  %v805_v58 = vadd.f32 %v2011_v1, %v2009_v36  ;;  %v2340_v43 = vld [vmem:[#allocation17_spill] sm:$0xff] }
 0x254   : > { %2334 = vst [vmem:[#allocation14_spill] sm:$0xff] %v2013_v46  ;;  %1336 = vpow2.f32 %v697_v6  ;;  %v853_v33 = vadd.f32 %v2013_v46, %v2007_v23  ;;  %v643_v48 = vsub.f32 %v2340_v43, %v579_v62 }
 0x255   : > { %v2019_v47 = vpop.eup %1324  ;;  %1338 = vpow2.f32 %v761_v54  ;;  %v699_v19 = vmul.f32 1.442695, %v609_v28  ;;  %v701_v35 = vmul.f32 1.442695, %v610_v7  ;;  %806 = vadd.xlane.f32.xlu0 %v805_v58  ;;  %v2342_v58 = vld [vmem:[#allocation18_spill] sm:$0xff] }
 0x256   : > { %v2021_v15 = vpop.eup %1326  ;;  %v576_v31 = vpop.xlane.xlu1 %575 }
 0x257   : > { %2337 = vst [vmem:[#allocation15_spill] sm:$0xff] %v2021_v15  ;;  %1340 = vpow2.f32 %v699_v19  ;;  %v641_v25 = vsub.f32 %v1808_v18, %v576_v31  ;;  %v642_v52 = vsub.f32 %v2338_v44, %v576_v31  ;;  %v808_v6 = vadd.f32 %v2021_v15, %v2019_v47  ;;  %v2343_v18 = vld [vmem:[#allocation9_spill] sm:$0xff]  ;;  %v2344_v44 = vld [vmem:[#allocation10_spill] sm:$0xff] }
 0x258   : > { %1342 = vpow2.f32 %v701_v35  ;;  %v644_v19 = vsub.f32 %v2342_v58, %v579_v62 }
 0x259   : > { %v2029_v54 = vpop.eup %1328  ;;  %v763_v28 = vmul.f32 1.442695, %v641_v25  ;;  %v765_v49 = vmul.f32 1.442695, %v642_v52  ;;  %809 = vadd.xlane.f32.xlu1 %v808_v6  ;;  %854 = vadd.xlane.f32.xlu0 %v853_v33  ;;  %v767_v52 = vmul.f32 1.442695, %v643_v48 }
 0x25a   : > { %2339 = vst [vmem:[#allocation5_spill] sm:$0xff] %v2029_v54  ;;  %v2032_v7 = vpop.eup %1330  ;;  %v531_v46 = vpop.xlane.xlu1 %530  ;;  %v769_v62 = vmul.f32 1.442695, %v644_v19 }
 0x25b   : > { %2341 = vst [vmem:[#allocation6_spill] sm:$0xff] %v2032_v7  ;;  %1344 = vpow2.f32 %v763_v28  ;;  %v611_v31 = vsub.f32 %v2343_v18, %v531_v46  ;;  %v612_v23 = vsub.f32 %v2344_v44, %v531_v46  ;;  %v856_v35 = vadd.f32 %v2032_v7, %v2029_v54  ;;  %v2039_v15 = vpop.eup %1332  ;;  %v2345_v46 = vld [vmem:[#allocation11_spill] sm:$0xff]  ;;  %v2346_v44 = vld [vmem:[#allocation12_spill] sm:$0xff] }
 0x25c   : > { %1346 = vpow2.f32 %v765_v49 }
 0x25d   : > { %v2041_v25 = vpop.eup %1334  ;;  %v703_v33 = vmul.f32 1.442695, %v611_v31  ;;  %v705_v6 = vmul.f32 1.442695, %v612_v23  ;;  %857 = vadd.xlane.f32.xlu1 %v856_v35 }
 0x25e   : > { %v2043_v43 = vpop.eup %1336  ;;  %v534_v28 = vpop.xlane.xlu1 %533 }
 0x25f   : > { %v2045_v58 = vpop.eup %1338  ;;  %1348 = vpow2.f32 %v703_v33  ;;  %v613_v18 = vsub.f32 %v2345_v46, %v534_v28  ;;  %v614_v7 = vsub.f32 %v2346_v44, %v534_v28  ;;  %v811_v49 = vadd.f32 %v2043_v43, %v2041_v25  ;;  %v2347_v28 = vld [vmem:[#allocation19_spill] sm:$0xff] }
 0x260   : > { %1350 = vpow2.f32 %v705_v6  ;;  %v859_v35 = vadd.f32 %v2045_v58, %v2039_v15 }
 0x261   : > { %v2051_v54 = vpop.eup %1340  ;;  %1352 = vpow2.f32 %v767_v52  ;;  %v707_v23 = vmul.f32 1.442695, %v613_v18  ;;  %v709_v48 = vmul.f32 1.442695, %v614_v7  ;;  %812 = vadd.xlane.f32.xlu0 %v811_v49 }
 0x262   : > { %v2053_v31 = vpop.eup %1342  ;;  %1354 = vpow2.f32 %v769_v62  ;;  %v582_v19 = vpop.xlane.xlu1 %581 }
 0x263   : > { %1356 = vpow2.f32 %v707_v23  ;;  %v645_v33 = vsub.f32 %v1823_v24, %v582_v19  ;;  %v646_v46 = vsub.f32 %v2347_v28, %v582_v19  ;;  %v814_v6 = vadd.f32 %v2053_v31, %v2051_v54 }
 0x264   : > { %1358 = vpow2.f32 %v709_v48 }
 0x265   : > { %v2061_v52 = vpop.eup %1344  ;;  %v771_v7 = vmul.f32 1.442695, %v645_v33  ;;  %v773_v18 = vmul.f32 1.442695, %v646_v46  ;;  %815 = vadd.xlane.f32.xlu1 %v814_v6  ;;  %860 = vadd.xlane.f32.xlu0 %v859_v35 }
 0x266   : > { %v2063_v62 = vpop.eup %1346 }
 0x267   : > { %1360 = vpow2.f32 %v771_v7  ;;  %v862_v44 = vadd.f32 %v2063_v62, %v2061_v52 }
 0x268   : > { %1362 = vpow2.f32 %v773_v18 }
 0x269   : > { %v2067_v24 = vpop.eup %1348  ;;  %863 = vadd.xlane.f32.xlu1 %v862_v44 }
 0x26a   : > { %v2069_v49 = vpop.eup %1350 }
 0x26b   : > { %v2071_v23 = vpop.eup %1352  ;;  %v817_v48 = vadd.f32 %v2069_v49, %v2067_v24 }
 0x26c   : > { %2348 = vst [vmem:[#allocation7_spill] sm:$0xff] %v2071_v23  ;;  %v2075_v19 = vpop.eup %1354 }
 0x26d   : > { %2349 = vst [vmem:[#allocation8_spill] sm:$0xff] %v2075_v19  ;;  %v2077_v35 = vpop.eup %1356  ;;  %818 = vadd.xlane.f32.xlu0 %v817_v48  ;;  %v865_v46 = vadd.f32 %v2075_v19, %v2071_v23 }
 0x26e   : > { %v2079_v33 = vpop.eup %1358 }
 0x26f   : > { %2350 = vst [vmem:[#allocation16_spill] sm:$0xff] %v2079_v33  ;;  %v820_v28 = vadd.f32 %v2079_v33, %v2077_v35 }
 0x271   : > { %v2085_v6 = vpop.eup %1360  ;;  %821 = vadd.xlane.f32.xlu1 %v820_v28  ;;  %866 = vadd.xlane.f32.xlu0 %v865_v46 }
 0x272   : > { %v2087_v7 = vpop.eup %1362 }
 0x273   : > { %v868_v18 = vadd.f32 %v2087_v7, %v2085_v6 }
 0x275   : > { %869 = vadd.xlane.f32.xlu1 %v868_v18 }
 0x28a   : > { %v777_v44 = vpop.xlane.xlu0 %776 }
 0x28b   : > { %1364 = vrcp.f32 %v777_v44 }
 0x28e   : > { %v780_v48 = vpop.xlane.xlu1 %779 }
 0x28f   : > { %1366 = vrcp.f32 %v780_v48 }
 0x295   : > { %v1365_v33 = vpop.eup %1364 }
 0x296   : > { %v903_v19 = vmul.f32 %v1365_v33, %v1839_v37  ;;  %v904_v23 = vmul.f32 %v1365_v33, %v1841_v4 }
 0x298   : > { %967 = vst [vmem:[%s2096_s5] sm:$0xff] %v903_v19  ;;  %968 = vst [vmem:[%s2096_s5 + $0x8] sm:$0xff] %v904_v23 }
 0x299   : > { %v1367_v28 = vpop.eup %1366 }
 0x29a   : > { %v905_v46 = vmul.f32 %v1367_v28, %v1845_v27  ;;  %v906_v18 = vmul.f32 %v1367_v28, %v1847_v20 }
 0x29c   : > { %969 = vst [vmem:[%s2096_s5 + $0x10] sm:$0xff] %v905_v46  ;;  %970 = vst [vmem:[%s2096_s5 + $0x18] sm:$0xff] %v906_v18 }
 0x2aa   : > { %v825_v37 = vpop.xlane.xlu0 %824 }
 0x2ab   : > { %1368 = vrcp.f32 %v825_v37 }
 0x2ae   : > { %v828_v4 = vpop.xlane.xlu1 %827 }
 0x2af   : > { %1370 = vrcp.f32 %v828_v4 }
 0x2b2   : > { %v783_v33 = vpop.xlane.xlu0 %782 }
 0x2b3   : > { %1372 = vrcp.f32 %v783_v33 }
 0x2b5   : > { %v1369_v44 = vpop.eup %1368 }
 0x2b6   : > { %v935_v23 = vmul.f32 %v1369_v44, %v1859_v59  ;;  %v936_v19 = vmul.f32 %v1369_v44, %v1861_v29  ;;  %v786_v27 = vpop.xlane.xlu1 %785 }
 0x2b7   : > { %1374 = vrcp.f32 %v786_v27 }
 0x2b8   : > { %999 = vst [vmem:[%s2096_s5 + $0x100] sm:$0xff] %v935_v23  ;;  %1000 = vst [vmem:[%s2096_s5 + $0x108] sm:$0xff] %v936_v19 }
 0x2b9   : > { %v1371_v20 = vpop.eup %1370 }
 0x2ba   : > { %v937_v48 = vmul.f32 %v1371_v20, %v1867_v34  ;;  %v938_v28 = vmul.f32 %v1371_v20, %v1869_v12  ;;  %v831_v46 = vpop.xlane.xlu0 %830 }
 0x2bb   : > { %1376 = vrcp.f32 %v831_v46 }
 0x2bc   : > { %1001 = vst [vmem:[%s2096_s5 + $0x110] sm:$0xff] %v937_v48  ;;  %1002 = vst [vmem:[%s2096_s5 + $0x118] sm:$0xff] %v938_v28 }
 0x2bd   : > { %v1373_v59 = vpop.eup %1372 }
 0x2be   : > { %v834_v18 = vpop.xlane.xlu1 %833  ;;  %v907_v29 = vmul.f32 %v1373_v59, %v1875_v22  ;;  %v908_v37 = vmul.f32 %v1373_v59, %v1878_v53 }
 0x2bf   : > { %1378 = vrcp.f32 %v834_v18 }
 0x2c0   : > { %971 = vst [vmem:[%s2096_s5 + $0x20] sm:$0xff] %v907_v29  ;;  %972 = vst [vmem:[%s2096_s5 + $0x28] sm:$0xff] %v908_v37 }
 0x2c1   : > { %v1375_v4 = vpop.eup %1374 }
 0x2c2   : > { %v909_v34 = vmul.f32 %v1375_v4, %v1885_v30  ;;  %v910_v12 = vmul.f32 %v1375_v4, %v1887_v32  ;;  %v789_v33 = vpop.xlane.xlu0 %788 }
 0x2c3   : > { %1380 = vrcp.f32 %v789_v33 }
 0x2c4   : > { %973 = vst [vmem:[%s2096_s5 + $0x30] sm:$0xff] %v909_v34  ;;  %974 = vst [vmem:[%s2096_s5 + $0x38] sm:$0xff] %v910_v12 }
 0x2c5   : > { %v1377_v44 = vpop.eup %1376 }
 0x2c6   : > { %v792_v22 = vpop.xlane.xlu1 %791  ;;  %v939_v53 = vmul.f32 %v1377_v44, %v1893_v5  ;;  %v940_v23 = vmul.f32 %v1377_v44, %v1895_v10  ;;  %v837_v19 = vpop.xlane.xlu0 %836 }
 0x2c7   : > { %1382 = vrcp.f32 %v792_v22 }
 0x2c8   : > { %1384 = vrcp.f32 %v837_v19  ;;  %1003 = vst [vmem:[%s2096_s5 + $0x120] sm:$0xff] %v939_v53  ;;  %1004 = vst [vmem:[%s2096_s5 + $0x128] sm:$0xff] %v940_v23 }
 0x2c9   : > { %v1379_v27 = vpop.eup %1378 }
 0x2ca   : > { %v941_v30 = vmul.f32 %v1379_v27, %v1901_v17  ;;  %v942_v32 = vmul.f32 %v1379_v27, %v1904_v3  ;;  %v840_v20 = vpop.xlane.xlu1 %839 }
 0x2cb   : > { %1386 = vrcp.f32 %v840_v20 }
 0x2cc   : > { %1005 = vst [vmem:[%s2096_s5 + $0x130] sm:$0xff] %v941_v30  ;;  %1006 = vst [vmem:[%s2096_s5 + $0x138] sm:$0xff] %v942_v32 }
 0x2cd   : > { %v1381_v48 = vpop.eup %1380 }
 0x2ce   : > { %v795_v5 = vpop.xlane.xlu0 %794  ;;  %v911_v10 = vmul.f32 %v1381_v48, %v1911_v14  ;;  %v912_v28 = vmul.f32 %v1381_v48, %v1913_v13 }
 0x2cf   : > { %1388 = vrcp.f32 %v795_v5 }
 0x2d0   : > { %975 = vst [vmem:[%s2096_s5 + $0x40] sm:$0xff] %v911_v10  ;;  %976 = vst [vmem:[%s2096_s5 + $0x48] sm:$0xff] %v912_v28 }
 0x2d1   : > { %v1383_v46 = vpop.eup %1382 }
 0x2d2   : > { %v1385_v17 = vpop.eup %1384  ;;  %v913_v3 = vmul.f32 %v1383_v46, %v1924_v63  ;;  %v914_v59 = vmul.f32 %v1383_v46, %v1927_v42  ;;  %v843_v18 = vpop.xlane.xlu0 %842 }
 0x2d3   : > { %v943_v29 = vmul.f32 %v1385_v17, %v1916_v39  ;;  %v944_v14 = vmul.f32 %v1385_v17, %v1920_v41  ;;  %v798_v37 = vpop.xlane.xlu1 %797  ;;  %1390 = vrcp.f32 %v843_v18 }
 0x2d4   : > { %977 = vst [vmem:[%s2096_s5 + $0x50] sm:$0xff] %v913_v3  ;;  %978 = vst [vmem:[%s2096_s5 + $0x58] sm:$0xff] %v914_v59  ;;  %1392 = vrcp.f32 %v798_v37  ;;  %v2351_v59 = vld [vmem:[#allocation15_spill] sm:$0xff] }
 0x2d5   : > { %1007 = vst [vmem:[%s2096_s5 + $0x140] sm:$0xff] %v943_v29  ;;  %1008 = vst [vmem:[%s2096_s5 + $0x148] sm:$0xff] %v944_v14  ;;  %v1387_v13 = vpop.eup %1386 }
 0x2d6   : > { %v945_v63 = vmul.f32 %v1387_v13, %v1936_v51  ;;  %v946_v42 = vmul.f32 %v1387_v13, %v1939_v11  ;;  %v2353_v13 = vld [vmem:[#allocation14_spill] sm:$0xff] }
 0x2d7   : > { %v846_v4 = vpop.xlane.xlu1 %845 }
 0x2d8   : > { %1394 = vrcp.f32 %v846_v4  ;;  %1009 = vst [vmem:[%s2096_s5 + $0x150] sm:$0xff] %v945_v63  ;;  %1010 = vst [vmem:[%s2096_s5 + $0x158] sm:$0xff] %v946_v42  ;;  %v2355_v4 = vld [vmem:[#allocation6_spill] sm:$0xff] }
 0x2d9   : > { %v1389_v39 = vpop.eup %1388 }
 0x2da   : > { %v915_v41 = vmul.f32 %v1389_v39, %v1945_v9  ;;  %v916_v34 = vmul.f32 %v1389_v39, %v1947_v45  ;;  %v801_v12 = vpop.xlane.xlu0 %800 }
 0x2db   : > { %v804_v33 = vpop.xlane.xlu1 %803  ;;  %1396 = vrcp.f32 %v801_v12 }
 0x2dc   : > { %979 = vst [vmem:[%s2096_s5 + $0x60] sm:$0xff] %v915_v41  ;;  %980 = vst [vmem:[%s2096_s5 + $0x68] sm:$0xff] %v916_v34  ;;  %1398 = vrcp.f32 %v804_v33 }
 0x2dd   : > { %v1391_v51 = vpop.eup %1390 }
 0x2de   : > { %v1393_v11 = vpop.eup %1392  ;;  %v947_v44 = vmul.f32 %v1391_v51, %v1950_v50  ;;  %v948_v22 = vmul.f32 %v1391_v51, %v1956_v40  ;;  %v849_v53 = vpop.xlane.xlu0 %848 }
 0x2df   : > { %v917_v9 = vmul.f32 %v1393_v11, %v1958_v21  ;;  %v918_v45 = vmul.f32 %v1393_v11, %v1961_v26  ;;  %v852_v23 = vpop.xlane.xlu1 %851  ;;  %1400 = vrcp.f32 %v849_v53 }
 0x2e0   : > { %1011 = vst [vmem:[%s2096_s5 + $0x160] sm:$0xff] %v947_v44  ;;  %1012 = vst [vmem:[%s2096_s5 + $0x168] sm:$0xff] %v948_v22  ;;  %1402 = vrcp.f32 %v852_v23 }
 0x2e1   : > { %981 = vst [vmem:[%s2096_s5 + $0x70] sm:$0xff] %v917_v9  ;;  %982 = vst [vmem:[%s2096_s5 + $0x78] sm:$0xff] %v918_v45 }
 0x2e2   : > { %v1395_v19 = vpop.eup %1394  ;;  %v807_v27 = vpop.xlane.xlu0 %806 }
 0x2e3   : > { %v949_v50 = vmul.f32 %v1395_v19, %v1971_v16  ;;  %v950_v40 = vmul.f32 %v1395_v19, %v1973_v60  ;;  %1404 = vrcp.f32 %v807_v27 }
 0x2e5   : > { %v1397_v21 = vpop.eup %1396  ;;  %1013 = vst [vmem:[%s2096_s5 + $0x170] sm:$0xff] %v949_v50  ;;  %1014 = vst [vmem:[%s2096_s5 + $0x178] sm:$0xff] %v950_v40  ;;  %v2356_v40 = vld [vmem:[#allocation16_spill] sm:$0xff] }
 0x2e6   : > { %v1399_v26 = vpop.eup %1398  ;;  %v919_v30 = vmul.f32 %v1397_v21, %v1983_v38  ;;  %v920_v32 = vmul.f32 %v1397_v21, %v1985_v56  ;;  %v810_v20 = vpop.xlane.xlu1 %809 }
 0x2e7   : > { %v855_v48 = vpop.xlane.xlu0 %854  ;;  %v921_v5 = vmul.f32 %v1399_v26, %v1967_v55  ;;  %v922_v16 = vmul.f32 %v1399_v26, %v1975_v0  ;;  %1406 = vrcp.f32 %v810_v20  ;;  %v2357_v26 = vld [vmem:[#allocation7_spill] sm:$0xff] }
 0x2e8   : > { %983 = vst [vmem:[%s2096_s5 + $0x80] sm:$0xff] %v919_v30  ;;  %984 = vst [vmem:[%s2096_s5 + $0x88] sm:$0xff] %v920_v32  ;;  %1408 = vrcp.f32 %v855_v48  ;;  %v2358_v32 = vld [vmem:[#allocation8_spill] sm:$0xff] }
 0x2e9   : > { %v1401_v60 = vpop.eup %1400  ;;  %985 = vst [vmem:[%s2096_s5 + $0x90] sm:$0xff] %v921_v5  ;;  %986 = vst [vmem:[%s2096_s5 + $0x98] sm:$0xff] %v922_v16 }
 0x2ea   : > { %v1403_v38 = vpop.eup %1402  ;;  %v951_v56 = vmul.f32 %v1401_v60, %v1981_v8  ;;  %v952_v55 = vmul.f32 %v1401_v60, %v1988_v2  ;;  %v858_v10 = vpop.xlane.xlu1 %857 }
 0x2eb   : > { %v953_v0 = vmul.f32 %v1403_v38, %v1996_v57  ;;  %v954_v28 = vmul.f32 %v1403_v38, %v1999_v61  ;;  %1410 = vrcp.f32 %v858_v10 }
 0x2ec   : > { %1015 = vst [vmem:[%s2096_s5 + $0x180] sm:$0xff] %v951_v56  ;;  %1016 = vst [vmem:[%s2096_s5 + $0x188] sm:$0xff] %v952_v55 }
 0x2ed   : > { %v1405_v46 = vpop.eup %1404  ;;  %1017 = vst [vmem:[%s2096_s5 + $0x190] sm:$0xff] %v953_v0  ;;  %1018 = vst [vmem:[%s2096_s5 + $0x198] sm:$0xff] %v954_v28 }
 0x2ee   : > { %v923_v17 = vmul.f32 %v1405_v46, %v2009_v36  ;;  %v924_v8 = vmul.f32 %v1405_v46, %v2011_v1  ;;  %v813_v3 = vpop.xlane.xlu0 %812  ;;  %v2352_v36 = vld [vmem:[#allocation13_spill] sm:$0xff] }
 0x2ef   : > { %1412 = vrcp.f32 %v813_v3 }
 0x2f0   : > { %987 = vst [vmem:[%s2096_s5 + $0xa0] sm:$0xff] %v923_v17  ;;  %988 = vst [vmem:[%s2096_s5 + $0xa8] sm:$0xff] %v924_v8 }
 0x2f1   : > { %v1407_v2 = vpop.eup %1406 }
 0x2f2   : > { %v1409_v57 = vpop.eup %1408  ;;  %v925_v61 = vmul.f32 %v1407_v2, %v2019_v47  ;;  %v926_v18 = vmul.f32 %v1407_v2, %v2351_v59  ;;  %v816_v29 = vpop.xlane.xlu1 %815  ;;  %v2354_v47 = vld [vmem:[#allocation5_spill] sm:$0xff] }
 0x2f3   : > { %v861_v14 = vpop.xlane.xlu0 %860  ;;  %v955_v37 = vmul.f32 %v1409_v57, %v2352_v36  ;;  %v956_v1 = vmul.f32 %v1409_v57, %v2353_v13  ;;  %1414 = vrcp.f32 %v816_v29 }
 0x2f4   : > { %989 = vst [vmem:[%s2096_s5 + $0xb0] sm:$0xff] %v925_v61  ;;  %990 = vst [vmem:[%s2096_s5 + $0xb8] sm:$0xff] %v926_v18  ;;  %1416 = vrcp.f32 %v861_v14 }
 0x2f5   : > { %v1411_v63 = vpop.eup %1410  ;;  %1019 = vst [vmem:[%s2096_s5 + $0x1a0] sm:$0xff] %v955_v37  ;;  %1020 = vst [vmem:[%s2096_s5 + $0x1a8] sm:$0xff] %v956_v1 }
 0x2f6   : > { %v957_v42 = vmul.f32 %v1411_v63, %v2354_v47  ;;  %v958_v39 = vmul.f32 %v1411_v63, %v2355_v4  ;;  %v864_v41 = vpop.xlane.xlu1 %863 }
 0x2f7   : > { %1418 = vrcp.f32 %v864_v41 }
 0x2f8   : > { %1021 = vst [vmem:[%s2096_s5 + $0x1b0] sm:$0xff] %v957_v42  ;;  %1022 = vst [vmem:[%s2096_s5 + $0x1b8] sm:$0xff] %v958_v39 }
 0x2f9   : > { %v1413_v34 = vpop.eup %1412 }
 0x2fa   : > { %v927_v12 = vmul.f32 %v1413_v34, %v2041_v25  ;;  %v928_v33 = vmul.f32 %v1413_v34, %v2043_v43  ;;  %v819_v51 = vpop.xlane.xlu0 %818 }
 0x2fb   : > { %1420 = vrcp.f32 %v819_v51 }
 0x2fc   : > { %991 = vst [vmem:[%s2096_s5 + $0xc0] sm:$0xff] %v927_v12  ;;  %992 = vst [vmem:[%s2096_s5 + $0xc8] sm:$0xff] %v928_v33 }
 0x2fd   : > { %v1415_v11 = vpop.eup %1414 }
 0x2fe   : > { %v1417_v44 = vpop.eup %1416  ;;  %v929_v22 = vmul.f32 %v1415_v11, %v2051_v54  ;;  %v930_v53 = vmul.f32 %v1415_v11, %v2053_v31  ;;  %v822_v9 = vpop.xlane.xlu1 %821 }
 0x2ff   : > { %v867_v45 = vpop.xlane.xlu0 %866  ;;  %v959_v25 = vmul.f32 %v1417_v44, %v2039_v15  ;;  %v960_v43 = vmul.f32 %v1417_v44, %v2045_v58  ;;  %1422 = vrcp.f32 %v822_v9 }
 0x300   : > { %993 = vst [vmem:[%s2096_s5 + $0xd0] sm:$0xff] %v929_v22  ;;  %994 = vst [vmem:[%s2096_s5 + $0xd8] sm:$0xff] %v930_v53  ;;  %1424 = vrcp.f32 %v867_v45 }
 0x301   : > { %v1419_v23 = vpop.eup %1418  ;;  %1023 = vst [vmem:[%s2096_s5 + $0x1c0] sm:$0xff] %v959_v25  ;;  %1024 = vst [vmem:[%s2096_s5 + $0x1c8] sm:$0xff] %v960_v43 }
 0x302   : > { %v961_v54 = vmul.f32 %v1419_v23, %v2061_v52  ;;  %v962_v31 = vmul.f32 %v1419_v23, %v2063_v62  ;;  %v870_v19 = vpop.xlane.xlu1 %869 }
 0x303   : > { %1426 = vrcp.f32 %v870_v19 }
 0x304   : > { %1025 = vst [vmem:[%s2096_s5 + $0x1d0] sm:$0xff] %v961_v54  ;;  %1026 = vst [vmem:[%s2096_s5 + $0x1d8] sm:$0xff] %v962_v31 }
 0x305   : > { %v1421_v15 = vpop.eup %1420 }
 0x306   : > { %v931_v58 = vmul.f32 %v1421_v15, %v2067_v24  ;;  %v932_v27 = vmul.f32 %v1421_v15, %v2069_v49 }
 0x308   : > { %995 = vst [vmem:[%s2096_s5 + $0xe0] sm:$0xff] %v931_v58  ;;  %996 = vst [vmem:[%s2096_s5 + $0xe8] sm:$0xff] %v932_v27 }
 0x309   : > { %v1423_v50 = vpop.eup %1422 }
 0x30a   : > { %v1425_v52 = vpop.eup %1424  ;;  %v933_v62 = vmul.f32 %v1423_v50, %v2077_v35  ;;  %v934_v21 = vmul.f32 %v1423_v50, %v2356_v40 }
 0x30b   : > { %v963_v30 = vmul.f32 %v1425_v52, %v2357_v26  ;;  %v964_v24 = vmul.f32 %v1425_v52, %v2358_v32 }
 0x30c   : > { %997 = vst [vmem:[%s2096_s5 + $0xf0] sm:$0xff] %v933_v62  ;;  %998 = vst [vmem:[%s2096_s5 + $0xf8] sm:$0xff] %v934_v21 }
 0x30d   : > { %v1427_v49 = vpop.eup %1426  ;;  %1027 = vst [vmem:[%s2096_s5 + $0x1e0] sm:$0xff] %v963_v30  ;;  %1028 = vst [vmem:[%s2096_s5 + $0x1e8] sm:$0xff] %v964_v24 }
 0x30e   : > { %v965_v35 = vmul.f32 %v1427_v49, %v2085_v6  ;;  %v966_v20 = vmul.f32 %v1427_v49, %v2087_v7 }
 0x310   : > { %1029 = vst [vmem:[%s2096_s5 + $0x1f0] sm:$0xff] %v965_v35  ;;  %1030 = vst [vmem:[%s2096_s5 + $0x1f8] sm:$0xff] %v966_v20 }
 0x311   : > { %1441 = shalt.err (!%p1438_p5)
}
 0x312   : > { %s1442_s25 = scalar_lea.hbm %s2225_s16, 8192  ;;  %s1446_s28 = scalar_lea.hbm %s2283_s2, 16384 }
 0x313   : > { %p1443_p6 = scmp.ne.s32.totalorder %s2225_s16, %s1442_s25  ;;  %p1447_p10 = scmp.lt.u32.totalorder %s2225_s16, %s2283_s2 }
 0x314   : > { %p1448_p11 = scmp.lt.u32.totalorder %s1446_s28, %s1442_s25  ;;  %p1450_p13 = scmp.lt.u32.totalorder %s1442_s25, %s2225_s16 }
 0x315   : > { %p1444_p7 = pnand %p1443_p6, %p1567_p4 }
 0x316   : > { %p1449_p12 = por %p1448_p11, %p1447_p10 }
 0x317   : > { %p1445_p9 = pneg %p1444_p7 }
 0x318   : > { %p1451_p0 = por %p1450_p13, %p1449_p12 }
 0x31a   : > { %p1452_p1 = pnand %p1451_p0, %p1445_p9 }
 0x31c   : > { %1455 = shalt.err (!%p1452_p1)
}
 0x31d   : > { %s1510_s3 = smov 256   ;;  %s1511_s4 = smov 16  }
 0x31e   : > { %1176 = dma.vmem_to_hbm [thread:$0]  (%p1567_p4), %s2227_s7, 8192, %s2225_s16, %s2235_s12, %s1510_s3, %s1510_s3, %s1511_s4  }
 0x31f PF: > { %p1182_p2 = scmp.ge.s32.totalorder %s1506_s14, 2  ;;  %s1063_s5 = sand.u32 1, %s1486_s9  }
 0x320   : > { %s1064_s6 = scalar_lea.sflag [#allocation3], %s1063_s5 }
 0x321   : > { %p1179_p3 = pnand %p1182_p2, %p1574_p8 }
 0x323   : > { %1481 = dma.done.wait (!%p1179_p3), %s1064_s6, 8192  }
 0x324   : > { %1483 = vsyncadd (!%p1179_p3), %s1064_s6, 4294959104  ;;  %s15_s14 = sadd.s32 1, %s1506_s14   ;;  %s2359_s9 = smov %s1490_s10 }
 0x325   : > { %p12_p5 = scmp.ge.s32.totalorder %s15_s14, 4   ;;  %s2360_s10 = smov %s1494_s11 }
 0x326   : > { %s2361_s11 = smov %s1580_s22  ;;  %s2362_s12 = smov %s1502_s13 }
 0x327   : > { %s2363_s13 = smov %s2365_s17  ;;  %14 = sbr.rel (!%p12_p5) target bundleno = 4 (0x4), region = 66 }
 0x32e   :  { %1069 = vsyncpa [#allocation3], 1 }
 0x32f   :  { %1071 = vsyncpa [#allocation3 + $0x1], 1 }

// kernel: self_attention_map.2
= control target key start
LH: loop header
LB: loop body
LE: loop exit
PB: predicated region body
PF: predicated region fallthrough
CT: control target
= control target key end

     0   :  { %s3370_s18 = smov 0   ;;  %s3971_s0 = inlined_call_operand.vmem [shape: f32[2,64,290], index: 0, kind: input, shape index: {}]   ;;  %s3972_s1 = inlined_call_operand.vmem [shape: f32[9,8,64], index: 1, kind: input, shape index: {}]   ;;  %s3973_s2 = inlined_call_operand.vmem [shape: f32[8,1], index: 2, kind: input, shape index: {}]   ;;  %s3974_s3 = inlined_call_operand.vmem [shape: f32[9,8,8], index: 3, kind: input, shape index: {}]   ;;  %s3975_s4 = inlined_call_operand.vmem [shape: f32[8,1], index: 4, kind: input, shape index: {}]   ;;  %s3976_s5 = inlined_call_operand.vmem [shape: f32[2,8,256], index: 5, kind: output, shape index: {}]  }
   0x1 LB: > { %s2596_s19 = sadd.s32 4294967295, %s3327_s18   ;;  %p2600_p0 = scmp.ge.s32.totalorder %s3327_s18, 1  ;;  %s3327_s18 = sphi %s3370_s18, %s15_s18  }
   0x2   : > { %p187_p1 = scmp.lt.s32.totalorder %s3327_s18, 3 }
   0x4   : > { %p188_p2 = pnand %p2600_p0, %p187_p1 }
   0x5   : > { %p215_p3 = scmp.lt.s32.totalorder (!%p188_p2), %s2596_s19, 1  ;;  %s3329_s24 = smov (!%p188_p2), 127   ;;  %v3330_v16 = vmov (!%p188_p2), 0.0   ;;  %v272_v35 = vld [vmem:[%s3972_s1] sm:$0xff] (!%p188_p2)  ;;  %vm273_vm0 = vcmask (!%p188_p2), 523264   ;;  %vm454_vm1 = vcmask (!%p188_p2), 1039360  }
   0x6   : > { %191 = sbr.rel (%p188_p2) target bundleno = 1071 (0x42f), region = 40  ;;  %1710 = vst [vmem:[#allocation2] sm:$0xff] (!%p188_p2), %v3330_v16  ;;  %341 = vmatprep.mubr.f32.mxu0 (!%p188_p2), %v3330_v16  ;;  %554 = vmatprep.mubr.f32.mxu1 (!%p188_p2), %v3330_v16  ;;  %s3331_s25 = smov (!%p188_p2), 126   ;;  %vm613_vm2 = vcmask (!%p188_p2), 1031168   ;;  %vm778_vm3 = vcmask (!%p188_p2), 916480   ;;  %vm1098_vm4 = vcmask (!%p188_p2), 900096  }
   0x7   : > { %s3332_s28 = smov (!%p188_p2), 112   ;;  %s3333_s29 = smov (!%p188_p2), 110   ;;  %vm939_vm5 = vcmask (!%p188_p2), 908288   ;;  %vm1259_vm6 = vcmask (!%p188_p2), 785408   ;;  %vm1420_vm7 = vcmask (!%p188_p2), 777216   ;;  %vm3977_vm8 = vcmask (!%p188_p2), 769024  }
   0x8   : > { %s3334_s30 = smov (!%p188_p2), 111   ;;  %s3335_s6 = smov (!%p188_p2), 96   ;;  %vm1712_vm13 = vcmask (!%p188_p2), 277504  }
   0x9   : > { %s3336_s7 = smov (!%p188_p2), 95   ;;  %s3337_s8 = smov (!%p188_p2), 94  }
   0xa   : > { %s3339_s12 = smov (!%p188_p2), 17  }
   0xd   : > { %s3989_s19 = smov (!%p215_p3, %s2596_s19), 1 }
   0xe   : > { %s2815_s20 = smul.u32 192, %s3989_s19  ;;  %s2642_s10 = sshll.u32 %s3989_s19, 4 }
   0xf   : > { %s224_s13 = scalar_lea.vmem %s3976_s5, %s2642_s10 }
  0x10   : > { %s3384_s23 = scalar_lea.vmem %s3971_s0, %s2815_s20 }
  0x11   : > { %v357_v0 = vld [vmem:[%s3384_s23 + $0x8] sm:$0xff]  ;;  %v358_v1 = vld [vmem:[%s3384_s23 + $0x10] sm:$0xff]  ;;  %v356_v2 = vld [vmem:[%s3384_s23] sm:$0xff] }
  0x12   : > { %v3389_v3 = vpack.i.bf16 %v358_v1, %v357_v0  ;;  %v359_v4 = vld [vmem:[%s3384_s23 + $0x18] sm:$0xff]  ;;  %v360_v5 = vld [vmem:[%s3384_s23 + $0x20] sm:$0xff]  ;;  %v361_v6 = vld [vmem:[%s3384_s23 + $0x28] sm:$0xff] }
  0x13   : > { %v3394_v7 = vpack.i.bf16 %v359_v4, %v356_v2  ;;  %v363_v8 = vld [vmem:[%s3384_s23 + $0x38] sm:$0xff]  ;;  %v366_v9 = vld [vmem:[%s3384_s23 + $0x50] sm:$0xff]  ;;  %v2643_v10 = vpack.c.bf16 %v360_v5, %v357_v0  ;;  %v2645_v11 = vpack.c.bf16 %v359_v4, %v356_v2  ;;  %v3400_v12 = vpack.i.bf16 %v361_v6, %v360_v5  ;;  %v365_v15 = vld [vmem:[%s3384_s23 + $0x48] sm:$0xff] }
  0x14   : > { %2836 = vrot.lane.b32.xlu0 %v3389_v3, %s3329_s24  ;;  %v2647_v13 = vpack.c.bf16 %v366_v9, %v363_v8  ;;  %v362_v14 = vld [vmem:[%s3384_s23 + $0x30] sm:$0xff]  ;;  %v369_v17 = vld [vmem:[%s3384_s23 + $0x68] sm:$0xff]  ;;  %v372_v18 = vld [vmem:[%s3384_s23 + $0x80] sm:$0xff] }
  0x15   : > { %2846 = vrot.lane.b32.xlu1 %v3394_v7, %s3329_s24  ;;  %2644 = vmatprep.subr.bf16.mxu0 %v2643_v10  ;;  %v2649_v19 = vpack.c.bf16 %v365_v15, %v362_v14  ;;  %v2651_v20 = vpack.c.bf16 %v372_v18, %v369_v17  ;;  %v364_v21 = vld [vmem:[%s3384_s23 + $0x40] sm:$0xff]  ;;  %v371_v23 = vld [vmem:[%s3384_s23 + $0x78] sm:$0xff]  ;;  %v378_v26 = vld [vmem:[%s3384_s23 + $0xb0] sm:$0xff]  ;;  %v3433_v34 = vpack.i.bf16 %v365_v15, %v362_v14 }
  0x16   : > { %2646 = vmatpush1.bf16.msra.mxu0 %v2645_v11  ;;  %v368_v22 = vld [vmem:[%s3384_s23 + $0x60] sm:$0xff]  ;;  %v367_v24 = vld [vmem:[%s3384_s23 + $0x58] sm:$0xff]  ;;  %v3423_v29 = vpack.i.bf16 %v364_v21, %v363_v8  ;;  %v374_v31 = vld [vmem:[%s3384_s23 + $0x90] sm:$0xff] }
  0x17   : > { %2648 = vmatprep.subr.bf16.mxu0 %v2647_v13  ;;  %v375_v25 = vld [vmem:[%s3384_s23 + $0x98] sm:$0xff]  ;;  %v2653_v27 = vpack.c.bf16 %v371_v23, %v368_v22  ;;  %v3427_v30 = vpack.i.bf16 %v367_v24, %v366_v9  ;;  %v377_v32 = vld [vmem:[%s3384_s23 + $0xa8] sm:$0xff]  ;;  %v370_v36 = vld [vmem:[%s3384_s23 + $0x70] sm:$0xff]  ;;  %v3458_v40 = vpack.i.bf16 %v371_v23, %v368_v22 }
  0x18   : > { %2841 = vrot.lane.b32.xlu0 %v3400_v12, %s3329_s24  ;;  %v2655_v28 = vpack.c.bf16 %v378_v26, %v375_v25  ;;  %v2657_v33 = vpack.c.bf16 %v377_v32, %v374_v31  ;;  %v373_v37 = vld [vmem:[%s3384_s23 + $0x88] sm:$0xff]  ;;  %v3450_v38 = vpack.i.bf16 %v370_v36, %v369_v17  ;;  %v376_v41 = vld [vmem:[%s3384_s23 + $0xa0] sm:$0xff]  ;;  %v379_v42 = vld [vmem:[%s3384_s23 + $0xb8] sm:$0xff]  ;;  %v3478_v45 = vpack.i.bf16 %v377_v32, %v374_v31 }
  0x19   : > { %2851 = vrot.lane.b32.xlu1 %v3389_v3, %s3331_s25  ;;  %v3454_v39 = vpack.i.bf16 %v373_v37, %v372_v18  ;;  %v3470_v43 = vpack.i.bf16 %v376_v41, %v375_v25  ;;  %v3474_v44 = vpack.i.bf16 %v379_v42, %v378_v26 }
  0x1a   : > { %2650 = vmatpush1.bf16.msra.mxu0 %v2649_v19 }
  0x1b   : > { %2652 = vmatprep.subr.bf16.mxu0 %v2651_v20 }
  0x1c   : > { %2856 = vrot.lane.b32.xlu0 %v3400_v12, %s3331_s25 }
  0x1d   : > { %2861 = vrot.lane.b32.xlu1 %v3394_v7, %s3331_s25 }
  0x1e   : > { %2654 = vmatpush1.bf16.msra.mxu0 %v2653_v27 }
  0x1f   : > { %2656 = vmatprep.subr.bf16.mxu0 %v2655_v28 }
  0x20   : > { %2866 = vrot.lane.b32.xlu0 %v3423_v29, %s3329_s24 }
  0x21   : > { %2871 = vrot.lane.b32.xlu1 %v3427_v30, %s3329_s24 }
  0x22   : > { %2658 = vmatpush1.bf16.msra.mxu0 %v2657_v33 }
  0x24   : > { %2876 = vrot.lane.b32.xlu0 %v3433_v34, %s3329_s24 }
  0x25   : > { %2881 = vrot.lane.b32.xlu1 %v3423_v29, %s3331_s25  ;;  %2604 = vmatmul.mubr.msk.f32.vlgmr.msra.gmra.mrb[0].mxu0 %vm273_vm0, %v272_v35 }
  0x26   : > { %713 = vmatprep.mubr.f32.mxu0 %v3330_v16 }
  0x28   : > { %2886 = vrot.lane.b32.xlu0 %v3427_v30, %s3331_s25 }
  0x29   : > { %2891 = vrot.lane.b32.xlu1 %v3433_v34, %s3331_s25 }
  0x2c   : > { %2896 = vrot.lane.b32.xlu0 %v3450_v38, %s3329_s24 }
  0x2d   : > { %2901 = vrot.lane.b32.xlu1 %v3454_v39, %s3329_s24 }
  0x30   : > { %2906 = vrot.lane.b32.xlu0 %v3458_v40, %s3329_s24 }
  0x31   : > { %2911 = vrot.lane.b32.xlu1 %v3450_v38, %s3331_s25 }
  0x34   : > { %2916 = vrot.lane.b32.xlu0 %v3454_v39, %s3331_s25 }
  0x35   : > { %2921 = vrot.lane.b32.xlu1 %v3458_v40, %s3331_s25 }
  0x38   : > { %2926 = vrot.lane.b32.xlu0 %v3470_v43, %s3329_s24 }
  0x39   : > { %2931 = vrot.lane.b32.xlu1 %v3474_v44, %s3329_s24 }
  0x3c   : > { %2936 = vrot.lane.b32.xlu0 %v3478_v45, %s3329_s24 }
  0x3d   : > { %2941 = vrot.lane.b32.xlu1 %v3470_v43, %s3331_s25 }
  0x40   : > { %2946 = vrot.lane.b32.xlu0 %v3474_v44, %s3331_s25 }
  0x41   : > { %2951 = vrot.lane.b32.xlu1 %v3478_v45, %s3331_s25 }
  0x44   : > { %2956 = vrot.lane.b32.xlu0 %v3389_v3, %s3332_s28 }
  0x45   : > { %2961 = vrot.lane.b32.xlu1 %v3400_v12, %s3332_s28 }
  0x48   : > { %2966 = vrot.lane.b32.xlu0 %v3394_v7, %s3332_s28 }
  0x49   : > { %2971 = vrot.lane.b32.xlu1 %v3389_v3, %s3333_s29 }
  0x4c   : > { %2976 = vrot.lane.b32.xlu0 %v3400_v12, %s3333_s29 }
  0x4d   : > { %2981 = vrot.lane.b32.xlu1 %v3394_v7, %s3333_s29 }
  0x50   : > { %2986 = vrot.lane.b32.xlu0 %v3423_v29, %s3332_s28 }
  0x51   : > { %2991 = vrot.lane.b32.xlu1 %v3427_v30, %s3332_s28 }
  0x54   : > { %2996 = vrot.lane.b32.xlu0 %v3433_v34, %s3332_s28 }
  0x55   : > { %3001 = vrot.lane.b32.xlu1 %v3423_v29, %s3333_s29 }
  0x58   : > { %3006 = vrot.lane.b32.xlu0 %v3427_v30, %s3333_s29 }
  0x59   : > { %3011 = vrot.lane.b32.xlu1 %v3433_v34, %s3333_s29 }
  0x5c   : > { %3016 = vrot.lane.b32.xlu0 %v3450_v38, %s3332_s28 }
  0x5d   : > { %3021 = vrot.lane.b32.xlu1 %v3454_v39, %s3332_s28 }
  0x60   : > { %3026 = vrot.lane.b32.xlu0 %v3458_v40, %s3332_s28 }
  0x61   : > { %3031 = vrot.lane.b32.xlu1 %v3450_v38, %s3333_s29 }
  0x64   : > { %3036 = vrot.lane.b32.xlu0 %v3454_v39, %s3333_s29 }
  0x65   : > { %3041 = vrot.lane.b32.xlu1 %v3458_v40, %s3333_s29 }
  0x68   : > { %3046 = vrot.lane.b32.xlu0 %v3470_v43, %s3332_s28 }
  0x69   : > { %3051 = vrot.lane.b32.xlu1 %v3474_v44, %s3332_s28 }
  0x6c   : > { %3056 = vrot.lane.b32.xlu0 %v3478_v45, %s3332_s28 }
  0x6d   : > { %3061 = vrot.lane.b32.xlu1 %v3470_v43, %s3333_s29 }
  0x70   : > { %3066 = vrot.lane.b32.xlu0 %v3474_v44, %s3333_s29 }
  0x71   : > { %3071 = vrot.lane.b32.xlu1 %v3478_v45, %s3333_s29 }
  0x74   : > { %3076 = vrot.lane.b32.xlu0 %v3389_v3, %s3334_s30 }
  0x75   : > { %3081 = vrot.lane.b32.xlu1 %v3400_v12, %s3334_s30 }
  0x78   : > { %3086 = vrot.lane.b32.xlu0 %v3394_v7, %s3334_s30 }
  0x79   : > { %3091 = vrot.lane.b32.xlu1 %v3389_v3, %s3335_s6 }
  0x7c   : > { %3096 = vrot.lane.b32.xlu0 %v3400_v12, %s3335_s6 }
  0x7d   : > { %3101 = vrot.lane.b32.xlu1 %v3394_v7, %s3335_s6 }
  0x80   : > { %3106 = vrot.lane.b32.xlu0 %v3423_v29, %s3334_s30 }
  0x81   : > { %3111 = vrot.lane.b32.xlu1 %v3427_v30, %s3334_s30 }
  0x84   : > { %3116 = vrot.lane.b32.xlu0 %v3433_v34, %s3334_s30 }
  0x85   : > { %3121 = vrot.lane.b32.xlu1 %v3423_v29, %s3335_s6 }
  0x86   : > { %v2837_v46 = vpop.permute.xlu0 %2836 }
  0x87   : > { %v2847_v47 = vpop.permute.xlu1 %2846  ;;  %v2839_v48 = vunpack.i.h.bf16 %v2837_v46  ;;  %v2838_v49 = vunpack.i.l.bf16 %v2837_v46 }
  0x88   : > { %v2848_v50 = vunpack.i.l.bf16 %v2847_v47  ;;  %3126 = vrot.lane.b32.xlu0 %v3427_v30, %s3335_s6  ;;  %v2849_v52 = vunpack.i.h.bf16 %v2847_v47 }
  0x89   : > { %3131 = vrot.lane.b32.xlu1 %v3433_v34, %s3335_s6  ;;  %v456_v56 = vsel %vm454_vm1, %v2838_v49, %v2839_v48 }
  0x8a   : > { %v2842_v51 = vpop.permute.xlu0 %2841  ;;  %v455_v57 = vsel %vm454_vm1, %v2848_v50, %v2838_v49 }
  0x8b   : > { %v2844_v53 = vunpack.i.h.bf16 %v2842_v51  ;;  %v2843_v54 = vunpack.i.l.bf16 %v2842_v51  ;;  %v2852_v55 = vpop.permute.xlu1 %2851 }
  0x8c   : > { %3136 = vrot.lane.b32.xlu0 %v3450_v38, %s3334_s30  ;;  %v2854_v58 = vunpack.i.h.bf16 %v2852_v55  ;;  %v2853_v59 = vunpack.i.l.bf16 %v2852_v55 }
  0x8d   : > { %3141 = vrot.lane.b32.xlu1 %v3454_v39, %s3334_s30  ;;  %v458_v60 = vsel %vm454_vm1, %v2843_v54, %v2844_v53  ;;  %v457_v61 = vsel %vm454_vm1, %v2849_v52, %v2843_v54 }
  0x8e   : > { %v2857_v62 = vpop.permute.xlu0 %2856  ;;  %v2659_v63 = vpack.c.bf16 %v458_v60, %v456_v56  ;;  %v2661_v0 = vpack.c.bf16 %v457_v61, %v455_v57  ;;  %v615_v8 = vsel %vm613_vm2, %v2853_v59, %v2854_v58 }
  0x8f   : > { %v2859_v1 = vunpack.i.h.bf16 %v2857_v62  ;;  %v2858_v2 = vunpack.i.l.bf16 %v2857_v62  ;;  %v2862_v4 = vpop.permute.xlu1 %2861 }
  0x90   : > { %v2864_v5 = vunpack.i.h.bf16 %v2862_v4  ;;  %v2863_v6 = vunpack.i.l.bf16 %v2862_v4  ;;  %2660 = vmatprep.subr.bf16.mxu1 %v2659_v63  ;;  %3146 = vrot.lane.b32.xlu0 %v3458_v40, %s3334_s30 }
  0x91   : > { %3151 = vrot.lane.b32.xlu1 %v3450_v38, %s3335_s6  ;;  %2662 = vmatpush1.bf16.msra.mxu1 %v2661_v0  ;;  %v617_v9 = vsel %vm613_vm2, %v2858_v2, %v2859_v1 }
  0x92   : > { %v616_v10 = vsel %vm613_vm2, %v2864_v5, %v2858_v2  ;;  %v614_v11 = vsel %vm613_vm2, %v2863_v6, %v2853_v59  ;;  %v2867_v13 = vpop.permute.xlu0 %2866  ;;  %v2675_v14 = vpack.c.bf16 %v617_v9, %v615_v8 }
  0x93   : > { %v2869_v15 = vunpack.i.h.bf16 %v2867_v13  ;;  %v2868_v17 = vunpack.i.l.bf16 %v2867_v13  ;;  %v2872_v18 = vpop.permute.xlu1 %2871  ;;  %v2677_v19 = vpack.c.bf16 %v616_v10, %v614_v11 }
  0x94   : > { %v2874_v20 = vunpack.i.h.bf16 %v2872_v18  ;;  %v2873_v21 = vunpack.i.l.bf16 %v2872_v18  ;;  %3156 = vrot.lane.b32.xlu0 %v3454_v39, %s3335_s6  ;;  %2676 = vmatprep.subr.bf16.mxu0 %v2675_v14 }
  0x95   : > { %3161 = vrot.lane.b32.xlu1 %v3458_v40, %s3335_s6  ;;  %2678 = vmatpush1.bf16.msra.mxu0 %v2677_v19  ;;  %v460_v22 = vsel %vm454_vm1, %v2868_v17, %v2869_v15 }
  0x96   : > { %v2877_v23 = vpop.permute.xlu0 %2876  ;;  %v462_v24 = vsel %vm454_vm1, %v2873_v21, %v2874_v20 }
  0x97   : > { %v2879_v25 = vunpack.i.h.bf16 %v2877_v23  ;;  %v2878_v26 = vunpack.i.l.bf16 %v2877_v23  ;;  %v2882_v27 = vpop.permute.xlu1 %2881  ;;  %v2663_v28 = vpack.c.bf16 %v462_v24, %v460_v22 }
  0x98   : > { %3166 = vrot.lane.b32.xlu0 %v3470_v43, %s3334_s30  ;;  %v2884_v31 = vunpack.i.h.bf16 %v2882_v27  ;;  %v2883_v32 = vunpack.i.l.bf16 %v2882_v27 }
  0x99   : > { %3171 = vrot.lane.b32.xlu1 %v3474_v44, %s3334_s30  ;;  %2664 = vmatprep.subr.bf16.mxu1 %v2663_v28  ;;  %v459_v33 = vsel %vm454_vm1, %v2878_v26, %v2868_v17  ;;  %v461_v35 = vsel %vm454_vm1, %v2879_v25, %v2873_v21 }
  0x9a   : > { %v2887_v36 = vpop.permute.xlu0 %2886  ;;  %v2665_v37 = vpack.c.bf16 %v461_v35, %v459_v33  ;;  %v619_v49 = vsel %vm613_vm2, %v2883_v32, %v2884_v31 }
  0x9b   : > { %v2889_v41 = vunpack.i.h.bf16 %v2887_v36  ;;  %v2888_v42 = vunpack.i.l.bf16 %v2887_v36  ;;  %v2892_v46 = vpop.permute.xlu1 %2891 }
  0x9c   : > { %v2894_v47 = vunpack.i.h.bf16 %v2892_v46  ;;  %v2893_v48 = vunpack.i.l.bf16 %v2892_v46  ;;  %3176 = vrot.lane.b32.xlu0 %v3478_v45, %s3334_s30  ;;  %2666 = vmatpush1.bf16.msra.mxu1 %v2665_v37 }
  0x9d   : > { %3181 = vrot.lane.b32.xlu1 %v3470_v43, %s3335_s6  ;;  %v621_v50 = vsel %vm613_vm2, %v2888_v42, %v2889_v41 }
  0x9e   : > { %v620_v51 = vsel %vm613_vm2, %v2894_v47, %v2888_v42  ;;  %v618_v52 = vsel %vm613_vm2, %v2893_v48, %v2883_v32  ;;  %v2897_v53 = vpop.permute.xlu0 %2896  ;;  %v2679_v54 = vpack.c.bf16 %v621_v50, %v619_v49 }
  0x9f   : > { %v2899_v55 = vunpack.i.h.bf16 %v2897_v53  ;;  %v2898_v56 = vunpack.i.l.bf16 %v2897_v53  ;;  %v2902_v57 = vpop.permute.xlu1 %2901  ;;  %v2681_v58 = vpack.c.bf16 %v620_v51, %v618_v52 }
  0xa0   : > { %v2904_v59 = vunpack.i.h.bf16 %v2902_v57  ;;  %v2903_v60 = vunpack.i.l.bf16 %v2902_v57  ;;  %3186 = vrot.lane.b32.xlu0 %v3474_v44, %s3335_s6  ;;  %2680 = vmatprep.subr.bf16.mxu0 %v2679_v54 }
  0xa1   : > { %3191 = vrot.lane.b32.xlu1 %v3478_v45, %s3335_s6  ;;  %2682 = vmatpush1.bf16.msra.mxu0 %v2681_v58  ;;  %v464_v61 = vsel %vm454_vm1, %v2898_v56, %v2899_v55  ;;  %v2605_v55 = vld [vmem:[%s3972_s1 + $0x8] sm:$0xff] }
  0xa2   : > { %v2907_v62 = vpop.permute.xlu0 %2906  ;;  %v466_v63 = vsel %vm454_vm1, %v2903_v60, %v2904_v59 }
  0xa3   : > { %v2909_v0 = vunpack.i.h.bf16 %v2907_v62  ;;  %v2908_v1 = vunpack.i.l.bf16 %v2907_v62  ;;  %v2912_v2 = vpop.permute.xlu1 %2911  ;;  %v2667_v4 = vpack.c.bf16 %v466_v63, %v464_v61 }
  0xa4   : > { %3196 = vrot.lane.b32.xlu0 %v3389_v3, %s3336_s7  ;;  %v2914_v5 = vunpack.i.h.bf16 %v2912_v2  ;;  %v2913_v6 = vunpack.i.l.bf16 %v2912_v2 }
  0xa5   : > { %3201 = vrot.lane.b32.xlu1 %v3400_v12, %s3336_s7  ;;  %2668 = vmatprep.subr.bf16.mxu1 %v2667_v4  ;;  %v463_v8 = vsel %vm454_vm1, %v2908_v1, %v2898_v56  ;;  %v465_v9 = vsel %vm454_vm1, %v2909_v0, %v2903_v60 }
  0xa6   : > { %v2917_v10 = vpop.permute.xlu0 %2916  ;;  %v2669_v11 = vpack.c.bf16 %v465_v9, %v463_v8  ;;  %v623_v19 = vsel %vm613_vm2, %v2913_v6, %v2914_v5  ;;  %v2607_v5 = vld [vmem:[%s3972_s1 + $0x10] sm:$0xff] }
  0xa7   : > { %v2919_v13 = vunpack.i.h.bf16 %v2917_v10  ;;  %v2918_v14 = vunpack.i.l.bf16 %v2917_v10  ;;  %v2922_v15 = vpop.permute.xlu1 %2921 }
  0xa8   : > { %v2924_v17 = vunpack.i.h.bf16 %v2922_v15  ;;  %v2923_v18 = vunpack.i.l.bf16 %v2922_v15  ;;  %3206 = vrot.lane.b32.xlu0 %v3394_v7, %s3336_s7  ;;  %2670 = vmatpush1.bf16.msra.mxu1 %v2669_v11 }
  0xa9   : > { %3211 = vrot.lane.b32.xlu1 %v3389_v3, %s3337_s8  ;;  %v625_v20 = vsel %vm613_vm2, %v2918_v14, %v2919_v13 }
  0xaa   : > { %v624_v21 = vsel %vm613_vm2, %v2924_v17, %v2918_v14  ;;  %v622_v22 = vsel %vm613_vm2, %v2923_v18, %v2913_v6  ;;  %v2927_v23 = vpop.permute.xlu0 %2926  ;;  %v2683_v24 = vpack.c.bf16 %v625_v20, %v623_v19 }
  0xab   : > { %v2929_v25 = vunpack.i.h.bf16 %v2927_v23  ;;  %v2928_v26 = vunpack.i.l.bf16 %v2927_v23  ;;  %v2932_v27 = vpop.permute.xlu1 %2931  ;;  %v2685_v28 = vpack.c.bf16 %v624_v21, %v622_v22 }
  0xac   : > { %v2934_v31 = vunpack.i.h.bf16 %v2932_v27  ;;  %v2933_v32 = vunpack.i.l.bf16 %v2932_v27  ;;  %3216 = vrot.lane.b32.xlu0 %v3400_v12, %s3337_s8  ;;  %2684 = vmatprep.subr.bf16.mxu0 %v2683_v24 }
  0xad   : > { %3221 = vrot.lane.b32.xlu1 %v3394_v7, %s3337_s8  ;;  %2686 = vmatpush1.bf16.msra.mxu0 %v2685_v28  ;;  %v468_v3 = vsel %vm454_vm1, %v2928_v26, %v2929_v25 }
  0xae   : > { %v2937_v33 = vpop.permute.xlu0 %2936  ;;  %v470_v35 = vsel %vm454_vm1, %v2933_v32, %v2934_v31 }
  0xaf   : > { %v2939_v36 = vunpack.i.h.bf16 %v2937_v33  ;;  %v2938_v37 = vunpack.i.l.bf16 %v2937_v33  ;;  %v2942_v41 = vpop.permute.xlu1 %2941  ;;  %v2671_v42 = vpack.c.bf16 %v470_v35, %v468_v3 }
  0xb0   : > { %3226 = vrot.lane.b32.xlu0 %v3423_v29, %s3336_s7  ;;  %v2944_v46 = vunpack.i.h.bf16 %v2942_v41  ;;  %v2943_v47 = vunpack.i.l.bf16 %v2942_v41 }
  0xb1   : > { %3231 = vrot.lane.b32.xlu1 %v3427_v30, %s3336_s7  ;;  %2672 = vmatprep.subr.bf16.mxu1 %v2671_v42  ;;  %v467_v7 = vsel %vm454_vm1, %v2938_v37, %v2928_v26  ;;  %v469_v12 = vsel %vm454_vm1, %v2939_v36, %v2933_v32 }
  0xb2   : > { %v2947_v48 = vpop.permute.xlu0 %2946  ;;  %v2673_v49 = vpack.c.bf16 %v469_v12, %v467_v7  ;;  %v627_v56 = vsel %vm613_vm2, %v2943_v47, %v2944_v46 }
  0xb3   : > { %v2949_v50 = vunpack.i.h.bf16 %v2947_v48  ;;  %v2948_v51 = vunpack.i.l.bf16 %v2947_v48  ;;  %v2952_v52 = vpop.permute.xlu1 %2951 }
  0xb4   : > { %v2954_v53 = vunpack.i.h.bf16 %v2952_v52  ;;  %v2953_v54 = vunpack.i.l.bf16 %v2952_v52  ;;  %3236 = vrot.lane.b32.xlu0 %v3433_v34, %s3336_s7  ;;  %2674 = vmatpush1.bf16.msra.mxu1 %v2673_v49 }
  0xb5   : > { %3241 = vrot.lane.b32.xlu1 %v3423_v29, %s3337_s8  ;;  %v629_v57 = vsel %vm613_vm2, %v2948_v51, %v2949_v50 }
  0xb6   : > { %v628_v58 = vsel %vm613_vm2, %v2954_v53, %v2948_v51  ;;  %v626_v59 = vsel %vm613_vm2, %v2953_v54, %v2943_v47  ;;  %v2957_v60 = vpop.permute.xlu0 %2956  ;;  %v2687_v61 = vpack.c.bf16 %v629_v57, %v627_v56 }
  0xb7   : > { %v2959_v62 = vunpack.i.h.bf16 %v2957_v60  ;;  %v2958_v63 = vunpack.i.l.bf16 %v2957_v60  ;;  %v2962_v0 = vpop.permute.xlu1 %2961  ;;  %v2689_v1 = vpack.c.bf16 %v628_v58, %v626_v59  ;;  %2606 = vmatmul.mubr.msk.f32.vlgmr.msra.gmra.mrb[0].mxu1 %vm273_vm0, %v2605_v55  ;;  %v3338_v59 = vmov 0  }
  0xb8   : > { %v2964_v2 = vunpack.i.h.bf16 %v2962_v0  ;;  %v2963_v4 = vunpack.i.l.bf16 %v2962_v0  ;;  %3246 = vrot.lane.b32.xlu0 %v3427_v30, %s3337_s8  ;;  %2688 = vmatprep.subr.bf16.mxu0 %v2687_v61 }
  0xb9   : > { %3251 = vrot.lane.b32.xlu1 %v3433_v34, %s3337_s8  ;;  %2690 = vmatpush1.bf16.msra.mxu0 %v2689_v1  ;;  %v780_v29 = vsel %vm778_vm3, %v2958_v63, %v2959_v62 }
  0xba   : > { %v2967_v6 = vpop.permute.xlu0 %2966  ;;  %v782_v8 = vsel %vm778_vm3, %v2963_v4, %v2964_v2  ;;  %878 = vmatprep.mubr.f32.mxu1 %v3330_v16  ;;  %3315 = vset.pattern.permute.xlu0 %v3338_v59 }
  0xbb   : > { %v2969_v9 = vunpack.i.h.bf16 %v2967_v6  ;;  %v2968_v10 = vunpack.i.l.bf16 %v2967_v6  ;;  %v2972_v11 = vpop.permute.xlu1 %2971  ;;  %v2691_v30 = vpack.c.bf16 %v782_v8, %v780_v29  ;;  %v1690_v6 = vld [vmem:[%s3973_s2] sm:$0xff] }
  0xbc   : > { %3256 = vrot.lane.b32.xlu0 %v3450_v38, %s3336_s7  ;;  %2608 = vmatmul.mubr.msk.f32.vlgmr.msra.gmra.mrb[2].mxu0 %vm273_vm0, %v2607_v5  ;;  %v2974_v14 = vunpack.i.h.bf16 %v2972_v11  ;;  %v2973_v15 = vunpack.i.l.bf16 %v2972_v11 }
  0xbd   : > { %v779_v34 = vsel %vm778_vm3, %v2968_v10, %v2958_v63  ;;  %v781_v13 = vsel %vm778_vm3, %v2969_v9, %v2963_v4  ;;  %3261 = vrot.lane.b32.xlu1 %v3454_v39, %s3336_s7  ;;  %2692 = vmatprep.subr.bf16.mxu1 %v2691_v30 }
  0xbe   : > { %v2693_v17 = vpack.c.bf16 %v781_v13, %v779_v34  ;;  %v2977_v18 = vpop.permute.xlu0 %2976  ;;  %1198 = vmatprep.mubr.f32.mxu0 %v3330_v16  ;;  %v1100_v24 = vsel %vm1098_vm4, %v2973_v15, %v2974_v14 }
  0xbf   : > { %v2979_v19 = vunpack.i.h.bf16 %v2977_v18  ;;  %v2978_v20 = vunpack.i.l.bf16 %v2977_v18  ;;  %v2982_v21 = vpop.permute.xlu1 %2981 }
  0xc0   : > { %v2984_v22 = vunpack.i.h.bf16 %v2982_v21  ;;  %v2983_v23 = vunpack.i.l.bf16 %v2982_v21  ;;  %3266 = vrot.lane.b32.xlu0 %v3458_v40, %s3336_s7  ;;  %2694 = vmatpush1.bf16.msra.mxu1 %v2693_v17 }
  0xc1   : > { %3271 = vrot.lane.b32.xlu1 %v3450_v38, %s3337_s8  ;;  %v1102_v25 = vsel %vm1098_vm4, %v2978_v20, %v2979_v19 }
  0xc2   : > { %v1101_v26 = vsel %vm1098_vm4, %v2984_v22, %v2978_v20  ;;  %v1099_v27 = vsel %vm1098_vm4, %v2983_v23, %v2973_v15  ;;  %v2987_v28 = vpop.permute.xlu0 %2986  ;;  %v2723_v31 = vpack.c.bf16 %v1102_v25, %v1100_v24 }
  0xc3   : > { %v2725_v32 = vpack.c.bf16 %v1101_v26, %v1099_v27  ;;  %v2989_v3 = vunpack.i.h.bf16 %v2987_v28  ;;  %v2988_v33 = vunpack.i.l.bf16 %v2987_v28  ;;  %v2992_v35 = vpop.permute.xlu1 %2991 }
  0xc4   : > { %v2994_v36 = vunpack.i.h.bf16 %v2992_v35  ;;  %v2993_v37 = vunpack.i.l.bf16 %v2992_v35  ;;  %3276 = vrot.lane.b32.xlu0 %v3454_v39, %s3337_s8  ;;  %2724 = vmatprep.subr.bf16.mxu0 %v2723_v31 }
  0xc5   : > { %3281 = vrot.lane.b32.xlu1 %v3458_v40, %s3337_s8  ;;  %2726 = vmatpush1.bf16.msra.mxu0 %v2725_v32  ;;  %v784_v38 = vsel %vm778_vm3, %v2988_v33, %v2989_v3 }
  0xc6   : > { %v2997_v41 = vpop.permute.xlu0 %2996  ;;  %v786_v42 = vsel %vm778_vm3, %v2993_v37, %v2994_v36 }
  0xc7   : > { %v2999_v46 = vunpack.i.h.bf16 %v2997_v41  ;;  %v2998_v47 = vunpack.i.l.bf16 %v2997_v41  ;;  %v3002_v7 = vpop.permute.xlu1 %3001  ;;  %v2695_v12 = vpack.c.bf16 %v786_v42, %v784_v38 }
  0xc8   : > { %3286 = vrot.lane.b32.xlu0 %v3470_v43, %s3336_s7  ;;  %v3004_v49 = vunpack.i.h.bf16 %v3002_v7  ;;  %v3003_v50 = vunpack.i.l.bf16 %v3002_v7 }
  0xc9   : > { %v783_v48 = vsel %vm778_vm3, %v2998_v47, %v2988_v33  ;;  %v785_v39 = vsel %vm778_vm3, %v2999_v46, %v2993_v37  ;;  %3291 = vrot.lane.b32.xlu1 %v3474_v44, %s3336_s7  ;;  %2696 = vmatprep.subr.bf16.mxu1 %v2695_v12 }
  0xca   : > { %v2697_v40 = vpack.c.bf16 %v785_v39, %v783_v48  ;;  %v3007_v51 = vpop.permute.xlu0 %3006  ;;  %v1104_v57 = vsel %vm1098_vm4, %v3003_v50, %v3004_v49 }
  0xcb   : > { %v3009_v52 = vunpack.i.h.bf16 %v3007_v51  ;;  %v3008_v53 = vunpack.i.l.bf16 %v3007_v51  ;;  %v3012_v54 = vpop.permute.xlu1 %3011 }
  0xcc   : > { %v3014_v55 = vunpack.i.h.bf16 %v3012_v54  ;;  %v3013_v56 = vunpack.i.l.bf16 %v3012_v54  ;;  %3296 = vrot.lane.b32.xlu0 %v3478_v45, %s3336_s7  ;;  %2698 = vmatpush1.bf16.msra.mxu1 %v2697_v40 }
  0xcd   : > { %3301 = vrot.lane.b32.xlu1 %v3470_v43, %s3337_s8  ;;  %v1106_v58 = vsel %vm1098_vm4, %v3008_v53, %v3009_v52 }
  0xce   : > { %v1105_v60 = vsel %vm1098_vm4, %v3014_v55, %v3008_v53  ;;  %v1103_v61 = vsel %vm1098_vm4, %v3013_v56, %v3003_v50  ;;  %v3017_v62 = vpop.permute.xlu0 %3016  ;;  %v2727_v63 = vpack.c.bf16 %v1106_v58, %v1104_v57  ;;  %v2609_v56 = vld [vmem:[%s3972_s1 + $0x18] sm:$0xff] }
  0xcf   : > { %v2729_v0 = vpack.c.bf16 %v1105_v60, %v1103_v61  ;;  %v3019_v1 = vunpack.i.h.bf16 %v3017_v62  ;;  %v3018_v2 = vunpack.i.l.bf16 %v3017_v62  ;;  %v3022_v4 = vpop.permute.xlu1 %3021 }
  0xd0   : > { %v3024_v29 = vunpack.i.h.bf16 %v3022_v4  ;;  %v3023_v5 = vunpack.i.l.bf16 %v3022_v4  ;;  %3306 = vrot.lane.b32.xlu0 %v3474_v44, %s3337_s8  ;;  %2728 = vmatprep.subr.bf16.mxu0 %v2727_v63 }
  0xd1   : > { %3311 = vrot.lane.b32.xlu1 %v3478_v45, %s3337_s8  ;;  %2730 = vmatpush1.bf16.msra.mxu0 %v2729_v0  ;;  %v788_v43 = vsel %vm778_vm3, %v3018_v2, %v3019_v1 }
  0xd2   : > { %v3027_v8 = vpop.permute.xlu0 %3026  ;;  %v790_v9 = vsel %vm778_vm3, %v3023_v5, %v3024_v29 }
  0xd3   : > { %v3029_v10 = vunpack.i.h.bf16 %v3027_v8  ;;  %v3028_v11 = vunpack.i.l.bf16 %v3027_v8  ;;  %v3032_v30 = vpop.permute.xlu1 %3031  ;;  %v2699_v34 = vpack.c.bf16 %v790_v9, %v788_v43  ;;  %v2613_v43 = vld [vmem:[%s3972_s1 + $0x28] sm:$0xff] }
  0xd4   : > { %1693 = vperm.xlu0 %3315, %v1690_v6   ;;  %v3034_v45 = vunpack.i.h.bf16 %v3032_v30  ;;  %v3033_v14 = vunpack.i.l.bf16 %v3032_v30 }
  0xd5   : > { %v787_v44 = vsel %vm778_vm3, %v3028_v11, %v3018_v2  ;;  %v789_v13 = vsel %vm778_vm3, %v3029_v10, %v3023_v5  ;;  %2700 = vmatprep.subr.bf16.mxu1 %v2699_v34 }
  0xd6   : > { %v2701_v15 = vpack.c.bf16 %v789_v13, %v787_v44  ;;  %v3037_v17 = vpop.permute.xlu0 %3036  ;;  %v1108_v23 = vsel %vm1098_vm4, %v3033_v14, %v3034_v45 }
  0xd7   : > { %v3039_v18 = vunpack.i.h.bf16 %v3037_v17  ;;  %v3038_v19 = vunpack.i.l.bf16 %v3037_v17  ;;  %v3042_v20 = vpop.permute.xlu1 %3041 }
  0xd8   : > { %v3044_v21 = vunpack.i.h.bf16 %v3042_v20  ;;  %v3043_v22 = vunpack.i.l.bf16 %v3042_v20  ;;  %2702 = vmatpush1.bf16.msra.mxu1 %v2701_v15 }
  0xd9   : > { %v1110_v24 = vsel %vm1098_vm4, %v3038_v19, %v3039_v18 }
  0xda   : > { %v1109_v25 = vsel %vm1098_vm4, %v3044_v21, %v3038_v19  ;;  %v1107_v26 = vsel %vm1098_vm4, %v3043_v22, %v3033_v14  ;;  %v3047_v27 = vpop.permute.xlu0 %3046  ;;  %v2731_v28 = vpack.c.bf16 %v1110_v24, %v1108_v23 }
  0xdb   : > { %v2733_v31 = vpack.c.bf16 %v1109_v25, %v1107_v26  ;;  %v3049_v32 = vunpack.i.h.bf16 %v3047_v27  ;;  %v3048_v3 = vunpack.i.l.bf16 %v3047_v27  ;;  %v3052_v33 = vpop.permute.xlu1 %3051 }
  0xdc   : > { %v3054_v35 = vunpack.i.h.bf16 %v3052_v33  ;;  %v3053_v36 = vunpack.i.l.bf16 %v3052_v33  ;;  %2732 = vmatprep.subr.bf16.mxu0 %v2731_v28 }
  0xdd   : > { %2734 = vmatpush1.bf16.msra.mxu0 %v2733_v31  ;;  %v792_v37 = vsel %vm778_vm3, %v3048_v3, %v3049_v32 }
  0xde   : > { %v3057_v38 = vpop.permute.xlu0 %3056  ;;  %v794_v41 = vsel %vm778_vm3, %v3053_v36, %v3054_v35 }
  0xdf   : > { %v3059_v42 = vunpack.i.h.bf16 %v3057_v38  ;;  %v3058_v46 = vunpack.i.l.bf16 %v3057_v38  ;;  %v3062_v47 = vpop.permute.xlu1 %3061  ;;  %v2703_v7 = vpack.c.bf16 %v794_v41, %v792_v37 }
  0xe0   : > { %v3064_v39 = vunpack.i.h.bf16 %v3062_v47  ;;  %v3063_v49 = vunpack.i.l.bf16 %v3062_v47 }
  0xe1   : > { %v791_v12 = vsel %vm778_vm3, %v3058_v46, %v3048_v3  ;;  %v793_v48 = vsel %vm778_vm3, %v3059_v42, %v3053_v36  ;;  %2704 = vmatprep.subr.bf16.mxu1 %v2703_v7 }
  0xe2   : > { %v2705_v50 = vpack.c.bf16 %v793_v48, %v791_v12  ;;  %v3067_v40 = vpop.permute.xlu0 %3066  ;;  %v1112_v57 = vsel %vm1098_vm4, %v3063_v49, %v3064_v39 }
  0xe3   : > { %v3069_v51 = vunpack.i.h.bf16 %v3067_v40  ;;  %v3068_v52 = vunpack.i.l.bf16 %v3067_v40  ;;  %v3072_v53 = vpop.permute.xlu1 %3071 }
  0xe4   : > { %v3074_v54 = vunpack.i.h.bf16 %v3072_v53  ;;  %v3073_v55 = vunpack.i.l.bf16 %v3072_v53  ;;  %2706 = vmatpush1.bf16.msra.mxu1 %v2705_v50 }
  0xe5   : > { %v1114_v58 = vsel %vm1098_vm4, %v3068_v52, %v3069_v51 }
  0xe6   : > { %v1113_v59 = vsel %vm1098_vm4, %v3074_v54, %v3068_v52  ;;  %v1111_v60 = vsel %vm1098_vm4, %v3073_v55, %v3063_v49  ;;  %v3077_v61 = vpop.permute.xlu0 %3076  ;;  %v2735_v62 = vpack.c.bf16 %v1114_v58, %v1112_v57 }
  0xe7   : > { %v2737_v63 = vpack.c.bf16 %v1113_v59, %v1111_v60  ;;  %v3079_v0 = vunpack.i.h.bf16 %v3077_v61  ;;  %v3078_v1 = vunpack.i.l.bf16 %v3077_v61  ;;  %v3082_v2 = vpop.permute.xlu1 %3081  ;;  %2610 = vmatmul.mubr.msk.f32.vlgmr.msra.gmra.mrb[2].mxu1 %vm273_vm0, %v2609_v56 }
  0xe8   : > { %v3084_v4 = vunpack.i.h.bf16 %v3082_v2  ;;  %v3083_v29 = vunpack.i.l.bf16 %v3082_v2  ;;  %2736 = vmatprep.subr.bf16.mxu0 %v2735_v62  ;;  %1039 = vmatprep.mubr.f32.mxu1 %v3330_v16 }
  0xe9   : > { %2738 = vmatpush1.bf16.msra.mxu0 %v2737_v63  ;;  %v941_v5 = vsel %vm939_vm5, %v3078_v1, %v3079_v0 }
  0xea   : > { %v3087_v6 = vpop.permute.xlu0 %3086  ;;  %v943_v8 = vsel %vm939_vm5, %v3083_v29, %v3084_v4 }
  0xeb   : > { %v3089_v9 = vunpack.i.h.bf16 %v3087_v6  ;;  %v3088_v10 = vunpack.i.l.bf16 %v3087_v6  ;;  %v3092_v11 = vpop.permute.xlu1 %3091  ;;  %v2707_v30 = vpack.c.bf16 %v943_v8, %v941_v5 }
  0xec   : > { %2614 = vmatmul.mubr.msk.f32.vlgmr.msra.gmra.mrb[4].mxu0 %vm273_vm0, %v2613_v43  ;;  %v3094_v13 = vunpack.i.h.bf16 %v3092_v11  ;;  %v3093_v45 = vunpack.i.l.bf16 %v3092_v11 }
  0xed   : > { %v940_v34 = vsel %vm939_vm5, %v3088_v10, %v3078_v1  ;;  %v942_v44 = vsel %vm939_vm5, %v3089_v9, %v3083_v29  ;;  %2708 = vmatprep.subr.bf16.mxu1 %v2707_v30  ;;  %1359 = vmatprep.mubr.f32.mxu0 %v3330_v16 }
  0xee   : > { %v2709_v14 = vpack.c.bf16 %v942_v44, %v940_v34  ;;  %v3097_v15 = vpop.permute.xlu0 %3096  ;;  %v1261_v22 = vsel %vm1259_vm6, %v3093_v45, %v3094_v13 }
  0xef   : > { %v3099_v17 = vunpack.i.h.bf16 %v3097_v15  ;;  %v3098_v18 = vunpack.i.l.bf16 %v3097_v15  ;;  %v3102_v19 = vpop.permute.xlu1 %3101 }
  0xf0   : > { %v3104_v20 = vunpack.i.h.bf16 %v3102_v19  ;;  %v3103_v21 = vunpack.i.l.bf16 %v3102_v19  ;;  %2710 = vmatpush1.bf16.msra.mxu1 %v2709_v14 }
  0xf1   : > { %v1263_v23 = vsel %vm1259_vm6, %v3098_v18, %v3099_v17 }
  0xf2   : > { %v1262_v24 = vsel %vm1259_vm6, %v3104_v20, %v3098_v18  ;;  %v1260_v25 = vsel %vm1259_vm6, %v3103_v21, %v3093_v45  ;;  %v3107_v26 = vpop.permute.xlu0 %3106  ;;  %v2739_v27 = vpack.c.bf16 %v1263_v23, %v1261_v22 }
  0xf3   : > { %v2741_v16 = vpack.c.bf16 %v1262_v24, %v1260_v25  ;;  %v3109_v28 = vunpack.i.h.bf16 %v3107_v26  ;;  %v3108_v31 = vunpack.i.l.bf16 %v3107_v26  ;;  %v3112_v32 = vpop.permute.xlu1 %3111 }
  0xf4   : > { %v3114_v3 = vunpack.i.h.bf16 %v3112_v32  ;;  %v3113_v33 = vunpack.i.l.bf16 %v3112_v32  ;;  %2740 = vmatprep.subr.bf16.mxu0 %v2739_v27 }
  0xf5   : > { %2742 = vmatpush1.bf16.msra.mxu0 %v2741_v16  ;;  %v945_v35 = vsel %vm939_vm5, %v3108_v31, %v3109_v28 }
  0xf6   : > { %v3117_v36 = vpop.permute.xlu0 %3116  ;;  %v947_v37 = vsel %vm939_vm5, %v3113_v33, %v3114_v3 }
  0xf7   : > { %v3119_v38 = vunpack.i.h.bf16 %v3117_v36  ;;  %v3118_v41 = vunpack.i.l.bf16 %v3117_v36  ;;  %v3122_v42 = vpop.permute.xlu1 %3121  ;;  %v2711_v46 = vpack.c.bf16 %v947_v37, %v945_v35 }
  0xf8   : > { %v3731_v47 = vpop.f32.mrb[0].mxu0  ;;  %v3124_v48 = vunpack.i.h.bf16 %v3122_v42  ;;  %v3123_v39 = vunpack.i.l.bf16 %v3122_v42 }
  0xf9   : > { %v944_v7 = vsel %vm939_vm5, %v3118_v41, %v3108_v31  ;;  %v946_v12 = vsel %vm939_vm5, %v3119_v38, %v3113_v33  ;;  %2712 = vmatprep.subr.bf16.mxu1 %v2711_v46  ;;  %v3735_v49 = vpop.f32.mrb[1].mxu0 }
  0xfa   : > { %v2713_v50 = vpack.c.bf16 %v946_v12, %v944_v7  ;;  %v3127_v40 = vpop.permute.xlu0 %3126  ;;  %v1265_v56 = vsel %vm1259_vm6, %v3123_v39, %v3124_v48 }
  0xfb   : > { %v3129_v51 = vunpack.i.h.bf16 %v3127_v40  ;;  %v3128_v52 = vunpack.i.l.bf16 %v3127_v40  ;;  %v3132_v53 = vpop.permute.xlu1 %3131 }
  0xfc   : > { %v3134_v54 = vunpack.i.h.bf16 %v3132_v53  ;;  %v3133_v55 = vunpack.i.l.bf16 %v3132_v53  ;;  %2714 = vmatpush1.bf16.msra.mxu1 %v2713_v50 }
  0xfd   : > { %v1267_v57 = vsel %vm1259_vm6, %v3128_v52, %v3129_v51 }
  0xfe   : > { %v1266_v58 = vsel %vm1259_vm6, %v3134_v54, %v3128_v52  ;;  %v1264_v59 = vsel %vm1259_vm6, %v3133_v55, %v3123_v39  ;;  %v3137_v60 = vpop.permute.xlu0 %3136  ;;  %v2743_v61 = vpack.c.bf16 %v1267_v57, %v1265_v56  ;;  %v2611_v54 = vld [vmem:[%s3972_s1 + $0x20] sm:$0xff] }
  0xff   : > { %v2745_v62 = vpack.c.bf16 %v1266_v58, %v1264_v59  ;;  %v3139_v63 = vunpack.i.h.bf16 %v3137_v60  ;;  %v3138_v0 = vunpack.i.l.bf16 %v3137_v60  ;;  %v3142_v1 = vpop.permute.xlu1 %3141 }
 0x100   : > { %v3144_v2 = vunpack.i.h.bf16 %v3142_v1  ;;  %v3143_v4 = vunpack.i.l.bf16 %v3142_v1  ;;  %2744 = vmatprep.subr.bf16.mxu0 %v2743_v61 }
 0x101   : > { %2746 = vmatpush1.bf16.msra.mxu0 %v2745_v62  ;;  %v949_v29 = vsel %vm939_vm5, %v3138_v0, %v3139_v63 }
 0x102   : > { %v3147_v5 = vpop.permute.xlu0 %3146  ;;  %v951_v43 = vsel %vm939_vm5, %v3143_v4, %v3144_v2 }
 0x103   : > { %v3149_v6 = vunpack.i.h.bf16 %v3147_v5  ;;  %v3148_v8 = vunpack.i.l.bf16 %v3147_v5  ;;  %v3152_v9 = vpop.permute.xlu1 %3151  ;;  %v2715_v10 = vpack.c.bf16 %v951_v43, %v949_v29  ;;  %v2615_v29 = vld [vmem:[%s3972_s1 + $0x30] sm:$0xff] }
 0x104   : > { %v3154_v34 = vunpack.i.h.bf16 %v3152_v9  ;;  %v3153_v44 = vunpack.i.l.bf16 %v3152_v9 }
 0x105   : > { %v948_v11 = vsel %vm939_vm5, %v3148_v8, %v3138_v0  ;;  %v950_v30 = vsel %vm939_vm5, %v3149_v6, %v3143_v4  ;;  %2716 = vmatprep.subr.bf16.mxu1 %v2715_v10  ;;  %v3761_v4 = vld [vmem:[#allocation2] sm:$0xff] }
 0x106   : > { %v2717_v13 = vpack.c.bf16 %v950_v30, %v948_v11  ;;  %v3157_v45 = vpop.permute.xlu0 %3156  ;;  %v1269_v20 = vsel %vm1259_vm6, %v3153_v44, %v3154_v34  ;;  %1713 = vst.msk [vmem:[#allocation2 + $0x10] sm:$0xff] %vm1712_vm13, %v3761_v4  ;;  %vm1732_vm13 = vcmask 64512  }
 0x107   : > { %v3159_v14 = vunpack.i.h.bf16 %v3157_v45  ;;  %v3158_v15 = vunpack.i.l.bf16 %v3157_v45  ;;  %v3162_v17 = vpop.permute.xlu1 %3161 }
 0x108   : > { %v3164_v18 = vunpack.i.h.bf16 %v3162_v17  ;;  %v3163_v19 = vunpack.i.l.bf16 %v3162_v17  ;;  %2718 = vmatpush1.bf16.msra.mxu1 %v2717_v13 }
 0x109   : > { %v1271_v21 = vsel %vm1259_vm6, %v3158_v15, %v3159_v14 }
 0x10a   : > { %v1270_v22 = vsel %vm1259_vm6, %v3164_v18, %v3158_v15  ;;  %v1268_v23 = vsel %vm1259_vm6, %v3163_v19, %v3153_v44  ;;  %v3167_v24 = vpop.permute.xlu0 %3166  ;;  %v2747_v25 = vpack.c.bf16 %v1271_v21, %v1269_v20 }
 0x10b   : > { %v2749_v26 = vpack.c.bf16 %v1270_v22, %v1268_v23  ;;  %v3169_v27 = vunpack.i.h.bf16 %v3167_v24  ;;  %v3168_v16 = vunpack.i.l.bf16 %v3167_v24  ;;  %v3172_v28 = vpop.permute.xlu1 %3171 }
 0x10c   : > { %v3174_v31 = vunpack.i.h.bf16 %v3172_v28  ;;  %v3173_v32 = vunpack.i.l.bf16 %v3172_v28  ;;  %2748 = vmatprep.subr.bf16.mxu0 %v2747_v25 }
 0x10d   : > { %2750 = vmatpush1.bf16.msra.mxu0 %v2749_v26  ;;  %v953_v3 = vsel %vm939_vm5, %v3168_v16, %v3169_v27 }
 0x10e   : > { %v3177_v33 = vpop.permute.xlu0 %3176  ;;  %v955_v35 = vsel %vm939_vm5, %v3173_v32, %v3174_v31 }
 0x10f   : > { %v3179_v36 = vunpack.i.h.bf16 %v3177_v33  ;;  %v3178_v37 = vunpack.i.l.bf16 %v3177_v33  ;;  %v3182_v38 = vpop.permute.xlu1 %3181  ;;  %v2719_v41 = vpack.c.bf16 %v955_v35, %v953_v3 }
 0x110   : > { %v3184_v7 = vunpack.i.h.bf16 %v3182_v38  ;;  %v3183_v12 = vunpack.i.l.bf16 %v3182_v38 }
 0x111   : > { %v952_v42 = vsel %vm939_vm5, %v3178_v37, %v3168_v16  ;;  %v954_v46 = vsel %vm939_vm5, %v3179_v36, %v3173_v32  ;;  %2720 = vmatprep.subr.bf16.mxu1 %v2719_v41 }
 0x112   : > { %v2721_v48 = vpack.c.bf16 %v954_v46, %v952_v42  ;;  %v3187_v39 = vpop.permute.xlu0 %3186  ;;  %v1273_v55 = vsel %vm1259_vm6, %v3183_v12, %v3184_v7 }
 0x113   : > { %v3189_v50 = vunpack.i.h.bf16 %v3187_v39  ;;  %v3188_v40 = vunpack.i.l.bf16 %v3187_v39  ;;  %v3192_v51 = vpop.permute.xlu1 %3191 }
 0x114   : > { %v3194_v52 = vunpack.i.h.bf16 %v3192_v51  ;;  %v3193_v53 = vunpack.i.l.bf16 %v3192_v51  ;;  %2722 = vmatpush1.bf16.msra.mxu1 %v2721_v48 }
 0x115   : > { %v1275_v56 = vsel %vm1259_vm6, %v3188_v40, %v3189_v50 }
 0x116   : > { %v1274_v57 = vsel %vm1259_vm6, %v3194_v52, %v3188_v40  ;;  %v1272_v58 = vsel %vm1259_vm6, %v3193_v53, %v3183_v12  ;;  %v3197_v59 = vpop.permute.xlu0 %3196  ;;  %v2751_v60 = vpack.c.bf16 %v1275_v56, %v1273_v55 }
 0x117   : > { %v2753_v61 = vpack.c.bf16 %v1274_v57, %v1272_v58  ;;  %v3199_v62 = vunpack.i.h.bf16 %v3197_v59  ;;  %v3198_v63 = vunpack.i.l.bf16 %v3197_v59  ;;  %v3202_v0 = vpop.permute.xlu1 %3201  ;;  %2612 = vmatmul.mubr.msk.f32.vlgmr.msra.gmra.mrb[0].mxu1 %vm273_vm0, %v2611_v54 }
 0x118   : > { %v3204_v1 = vunpack.i.h.bf16 %v3202_v0  ;;  %v3203_v2 = vunpack.i.l.bf16 %v3202_v0  ;;  %2752 = vmatprep.subr.bf16.mxu0 %v2751_v60  ;;  %1520 = vmatprep.mubr.f32.mxu1 %v3761_v4 }
 0x119   : > { %2754 = vmatpush1.bf16.msra.mxu0 %v2753_v61  ;;  %v1422_v5 = vsel %vm1420_vm7, %v3198_v63, %v3199_v62 }
 0x11a   : > { %v3207_v43 = vpop.permute.xlu0 %3206  ;;  %v1424_v6 = vsel %vm1420_vm7, %v3203_v2, %v3204_v1 }
 0x11b   : > { %v3209_v8 = vunpack.i.h.bf16 %v3207_v43  ;;  %v3208_v9 = vunpack.i.l.bf16 %v3207_v43  ;;  %v3212_v10 = vpop.permute.xlu1 %3211  ;;  %v2755_v11 = vpack.c.bf16 %v1424_v6, %v1422_v5 }
 0x11c   : > { %2616 = vmatmul.mubr.msk.f32.vlgmr.msra.gmra.mrb[6].mxu0 %vm273_vm0, %v2615_v29  ;;  %v3214_v44 = vunpack.i.h.bf16 %v3212_v10  ;;  %v3213_v13 = vunpack.i.l.bf16 %v3212_v10 }
 0x11d   : > { %v1421_v30 = vsel %vm1420_vm7, %v3208_v9, %v3198_v63  ;;  %v1423_v34 = vsel %vm1420_vm7, %v3209_v8, %v3203_v2  ;;  %2756 = vmatprep.subr.bf16.mxu1 %v2755_v11  ;;  %1679 = vmatprep.mubr.f32.mxu0 %v3761_v4 }
 0x11e   : > { %v2757_v45 = vpack.c.bf16 %v1423_v34, %v1421_v30  ;;  %v3217_v14 = vpop.permute.xlu0 %3216  ;;  %v1581_v21 = vsel %vm3977_vm8, %v3213_v13, %v3214_v44 }
 0x11f   : > { %v3219_v15 = vunpack.i.h.bf16 %v3217_v14  ;;  %v3218_v17 = vunpack.i.l.bf16 %v3217_v14  ;;  %v3222_v18 = vpop.permute.xlu1 %3221 }
 0x120   : > { %v3224_v19 = vunpack.i.h.bf16 %v3222_v18  ;;  %v3223_v20 = vunpack.i.l.bf16 %v3222_v18  ;;  %2758 = vmatpush1.bf16.msra.mxu1 %v2757_v45 }
 0x121   : > { %v1583_v22 = vsel %vm3977_vm8, %v3218_v17, %v3219_v15 }
 0x122   : > { %v1582_v23 = vsel %vm3977_vm8, %v3224_v19, %v3218_v17  ;;  %v1580_v24 = vsel %vm3977_vm8, %v3223_v20, %v3213_v13  ;;  %v3227_v25 = vpop.permute.xlu0 %3226  ;;  %v2771_v26 = vpack.c.bf16 %v1583_v22, %v1581_v21 }
 0x123   : > { %v2773_v27 = vpack.c.bf16 %v1582_v23, %v1580_v24  ;;  %v3229_v16 = vunpack.i.h.bf16 %v3227_v25  ;;  %v3228_v28 = vunpack.i.l.bf16 %v3227_v25  ;;  %v3232_v31 = vpop.permute.xlu1 %3231 }
 0x124   : > { %v3234_v32 = vunpack.i.h.bf16 %v3232_v31  ;;  %v3233_v3 = vunpack.i.l.bf16 %v3232_v31  ;;  %2772 = vmatprep.subr.bf16.mxu0 %v2771_v26 }
 0x125   : > { %2774 = vmatpush1.bf16.msra.mxu0 %v2773_v27  ;;  %v1426_v33 = vsel %vm1420_vm7, %v3228_v28, %v3229_v16 }
 0x126   : > { %v3237_v35 = vpop.permute.xlu0 %3236  ;;  %v1428_v36 = vsel %vm1420_vm7, %v3233_v3, %v3234_v32 }
 0x127   : > { %v3239_v37 = vunpack.i.h.bf16 %v3237_v35  ;;  %v3238_v38 = vunpack.i.l.bf16 %v3237_v35  ;;  %v3242_v41 = vpop.permute.xlu1 %3241  ;;  %v2759_v42 = vpack.c.bf16 %v1428_v36, %v1426_v33 }
 0x128   : > { %v3244_v12 = vunpack.i.h.bf16 %v3242_v41  ;;  %v3243_v48 = vunpack.i.l.bf16 %v3242_v41 }
 0x129   : > { %v1425_v46 = vsel %vm1420_vm7, %v3238_v38, %v3228_v28  ;;  %v1427_v7 = vsel %vm1420_vm7, %v3239_v37, %v3233_v3  ;;  %2760 = vmatprep.subr.bf16.mxu1 %v2759_v42 }
 0x12a   : > { %v2761_v39 = vpack.c.bf16 %v1427_v7, %v1425_v46  ;;  %v3247_v50 = vpop.permute.xlu0 %3246  ;;  %v1585_v55 = vsel %vm3977_vm8, %v3243_v48, %v3244_v12 }
 0x12b   : > { %v3249_v40 = vunpack.i.h.bf16 %v3247_v50  ;;  %v3248_v51 = vunpack.i.l.bf16 %v3247_v50  ;;  %v3252_v52 = vpop.permute.xlu1 %3251 }
 0x12c   : > { %v3254_v53 = vunpack.i.h.bf16 %v3252_v52  ;;  %v3253_v54 = vunpack.i.l.bf16 %v3252_v52  ;;  %2762 = vmatpush1.bf16.msra.mxu1 %v2761_v39 }
 0x12d   : > { %v1587_v56 = vsel %vm3977_vm8, %v3248_v51, %v3249_v40 }
 0x12e   : > { %v1586_v57 = vsel %vm3977_vm8, %v3254_v53, %v3248_v51  ;;  %v1584_v58 = vsel %vm3977_vm8, %v3253_v54, %v3243_v48  ;;  %v3257_v59 = vpop.permute.xlu0 %3256  ;;  %v2775_v60 = vpack.c.bf16 %v1587_v56, %v1585_v55  ;;  %v2617_v54 = vld [vmem:[%s3972_s1 + $0x38] sm:$0xff] }
 0x12f   : > { %v2777_v61 = vpack.c.bf16 %v1586_v57, %v1584_v58  ;;  %v3259_v62 = vunpack.i.h.bf16 %v3257_v59  ;;  %v3258_v63 = vunpack.i.l.bf16 %v3257_v59  ;;  %v3262_v0 = vpop.permute.xlu1 %3261 }
 0x130   : > { %v3264_v1 = vunpack.i.h.bf16 %v3262_v0  ;;  %v3263_v2 = vunpack.i.l.bf16 %v3262_v0  ;;  %2776 = vmatprep.subr.bf16.mxu0 %v2775_v60 }
 0x131   : > { %2778 = vmatpush1.bf16.msra.mxu0 %v2777_v61  ;;  %v1430_v29 = vsel %vm1420_vm7, %v3258_v63, %v3259_v62  ;;  %v2619_v61 = vld [vmem:[%s3972_s1 + $0x40] sm:$0xff]  ;;  %v225_v62 = vlaneseq }
 0x132   : > { %v3267_v5 = vpop.permute.xlu0 %3266  ;;  %v1432_v43 = vsel %vm1420_vm7, %v3263_v2, %v3264_v1 }
 0x133   : > { %v3269_v6 = vunpack.i.h.bf16 %v3267_v5  ;;  %v3268_v8 = vunpack.i.l.bf16 %v3267_v5  ;;  %v3272_v9 = vpop.permute.xlu1 %3271  ;;  %v2763_v10 = vpack.c.bf16 %v1432_v43, %v1430_v29 }
 0x134   : > { %v3274_v34 = vunpack.i.h.bf16 %v3272_v9  ;;  %v3273_v44 = vunpack.i.l.bf16 %v3272_v9 }
 0x135   : > { %v1429_v11 = vsel %vm1420_vm7, %v3268_v8, %v3258_v63  ;;  %v1431_v30 = vsel %vm1420_vm7, %v3269_v6, %v3263_v2  ;;  %2764 = vmatprep.subr.bf16.mxu1 %v2763_v10  ;;  %v226_v63 = vand.u32 127, %v225_v62 }
 0x136   : > { %v2765_v13 = vpack.c.bf16 %v1431_v30, %v1429_v11  ;;  %v3277_v45 = vpop.permute.xlu0 %3276  ;;  %v1589_v20 = vsel %vm3977_vm8, %v3273_v44, %v3274_v34 }
 0x137   : > { %v3279_v14 = vunpack.i.h.bf16 %v3277_v45  ;;  %v3278_v15 = vunpack.i.l.bf16 %v3277_v45  ;;  %v3282_v17 = vpop.permute.xlu1 %3281  ;;  %v227_v0 = vadd.s32 128, %v226_v63  ;;  %v232_v1 = vand.u32 15, %v226_v63  ;;  %v2531_v63 = vld [vmem:[%s3975_s4] sm:$0xff] }
 0x138   : > { %v3284_v18 = vunpack.i.h.bf16 %v3282_v17  ;;  %v3283_v19 = vunpack.i.l.bf16 %v3282_v17  ;;  %2766 = vmatpush1.bf16.msra.mxu1 %v2765_v13 }
 0x139   : > { %v1591_v21 = vsel %vm3977_vm8, %v3278_v15, %v3279_v14  ;;  %v239_v2 = vand.u32 15, %v227_v0  ;;  %vm3811_vm9 = vcmp.ne.s32.totalorder %v232_v1, 0  ;;  %vm3819_vm11 = vcmp.ne.s32.totalorder %v232_v1, 15 }
 0x13a   : > { %v1590_v22 = vsel %vm3977_vm8, %v3284_v18, %v3278_v15  ;;  %v1588_v23 = vsel %vm3977_vm8, %v3283_v19, %v3273_v44  ;;  %v3287_v24 = vpop.permute.xlu0 %3286  ;;  %v2779_v25 = vpack.c.bf16 %v1591_v21, %v1589_v20  ;;  %v352_v6 = vsel %vm3811_vm9, %v3731_v47, 0.0 }
 0x13b   : > { %v2781_v26 = vpack.c.bf16 %v1590_v22, %v1588_v23  ;;  %v3289_v27 = vunpack.i.h.bf16 %v3287_v24  ;;  %v3288_v16 = vunpack.i.l.bf16 %v3287_v24  ;;  %v3292_v28 = vpop.permute.xlu1 %3291  ;;  %vm3815_vm10 = vcmp.ne.s32.totalorder %v239_v2, 0 }
 0x13c   : > { %v3294_v31 = vunpack.i.h.bf16 %v3292_v28  ;;  %v3293_v32 = vunpack.i.l.bf16 %v3292_v28  ;;  %2780 = vmatprep.subr.bf16.mxu0 %v2779_v25  ;;  %vm3826_vm12 = vcmp.ne.s32.totalorder %v239_v2, 15  ;;  %v353_v9 = vsel %vm3815_vm10, %v3735_v49, 0.0 }
 0x13d   : > { %2782 = vmatpush1.bf16.msra.mxu0 %v2781_v26  ;;  %v1434_v3 = vsel %vm1420_vm7, %v3288_v16, %v3289_v27 }
 0x13e   : > { %v3297_v33 = vpop.permute.xlu0 %3296  ;;  %v1436_v35 = vsel %vm1420_vm7, %v3293_v32, %v3294_v31 }
 0x13f   : > { %v3299_v36 = vunpack.i.h.bf16 %v3297_v33  ;;  %v3298_v37 = vunpack.i.l.bf16 %v3297_v33  ;;  %v3302_v38 = vpop.permute.xlu1 %3301  ;;  %v2767_v41 = vpack.c.bf16 %v1436_v35, %v1434_v3 }
 0x140   : > { %v3304_v7 = vunpack.i.h.bf16 %v3302_v38  ;;  %v3303_v12 = vunpack.i.l.bf16 %v3302_v38 }
 0x141   : > { %v1433_v42 = vsel %vm1420_vm7, %v3298_v37, %v3288_v16  ;;  %v1435_v46 = vsel %vm1420_vm7, %v3299_v36, %v3293_v32  ;;  %2768 = vmatprep.subr.bf16.mxu1 %v2767_v41 }
 0x142   : > { %v2769_v48 = vpack.c.bf16 %v1435_v46, %v1433_v42  ;;  %v3307_v39 = vpop.permute.xlu0 %3306  ;;  %v1593_v55 = vsel %vm3977_vm8, %v3303_v12, %v3304_v7 }
 0x143   : > { %v3309_v50 = vunpack.i.h.bf16 %v3307_v39  ;;  %v3308_v40 = vunpack.i.l.bf16 %v3307_v39  ;;  %v3312_v51 = vpop.permute.xlu1 %3311 }
 0x144   : > { %v3314_v52 = vunpack.i.h.bf16 %v3312_v51  ;;  %v3313_v53 = vunpack.i.l.bf16 %v3312_v51  ;;  %2770 = vmatpush1.bf16.msra.mxu1 %v2769_v48 }
 0x145   : > { %v1595_v56 = vsel %vm3977_vm8, %v3308_v40, %v3309_v50 }
 0x146   : > { %v1594_v57 = vsel %vm3977_vm8, %v3314_v52, %v3308_v40  ;;  %v1592_v58 = vsel %vm3977_vm8, %v3313_v53, %v3303_v12  ;;  %v2783_v59 = vpack.c.bf16 %v1595_v56, %v1593_v55  ;;  %vm1720_vm8 = vcmask 138240  }
 0x147   : > { %v2785_v60 = vpack.c.bf16 %v1594_v57, %v1592_v58  ;;  %2618 = vmatmul.mubr.msk.f32.vlgmr.msra.gmra.mrb[0].mxu1 %vm273_vm0, %v2617_v54 }
 0x148   : > { %2784 = vmatprep.subr.bf16.mxu0 %v2783_v59  ;;  %1800 = vmatprep.mubr.f32.mxu1 %v3761_v4 }
 0x149   : > { %2786 = vmatpush1.bf16.msra.mxu0 %v2785_v60 }
 0x14c   : > { %2620 = vmatmul.mubr.msk.f32.vlgmr.msra.gmra.mrb[8].mxu0 %vm273_vm0, %v2619_v61  ;;  %vm1725_vm0 = vcmask 1047688   ;;  %v1731_v61 = vld [vmem:[%s3974_s3] sm:$0xff] }
 0x14d   : > { %2252 = vmatprep.mubr.f32.mxu0 %v3761_v4 }
 0x153   : > { %v1694_v38 = vpop.permute.xlu0 %1693 }
 0x18f   : > { %v715_v10 = vpop.f32.mrb[2].mxu0 }
 0x190   : > { %v724_v11 = vsel %vm3819_vm11, %v715_v10, 0.0  ;;  %v717_v30 = vpop.f32.mrb[3].mxu0 }
 0x191   : > { %v2787_v34 = vadd.f32 %v724_v11, %v352_v6  ;;  %v725_v44 = vsel %vm3826_vm12, %v717_v30, 0.0 }
 0x192   : > { %v2792_v13 = vadd.f32 %v725_v44, %v353_v9 }
 0x1ba   : > { %v880_v45 = vpop.f32.mrb[2].mxu1 }
 0x1bb   : > { %v885_v47 = vsel %vm3811_vm9, %v880_v45, 0.0  ;;  %v882_v14 = vpop.f32.mrb[3].mxu1 }
 0x1bc   : > { %v2788_v15 = vadd.f32 %v2787_v34, %v885_v47  ;;  %v886_v17 = vsel %vm3815_vm10, %v882_v14, 0.0 }
 0x1bd   : > { %v2793_v49 = vadd.f32 %v2792_v13, %v886_v17 }
 0x1bf   : > { %v1200_v18 = vpop.f32.mrb[4].mxu0 }
 0x1c0   : > { %v1205_v19 = vsel %vm3819_vm11, %v1200_v18, 0.0  ;;  %v1202_v20 = vpop.f32.mrb[5].mxu0 }
 0x1c1   : > { %v2789_v21 = vadd.f32 %v2788_v15, %v1205_v19  ;;  %v1206_v22 = vsel %vm3826_vm12, %v1202_v20, 0.0  ;;  %v2624_v15 = vld [vmem:[%s3974_s3 + $0x8] sm:$0xff]  ;;  %v2626_v20 = vld [vmem:[%s3974_s3 + $0x10] sm:$0xff] }
 0x1c2   : > { %v2794_v23 = vadd.f32 %v2793_v49, %v1206_v22 }
 0x1ef   : > { %v1361_v24 = vpop.f32.mrb[6].mxu0 }
 0x1f0   : > { %v1366_v25 = vsel %vm3811_vm9, %v1361_v24, 0.0  ;;  %v1363_v26 = vpop.f32.mrb[7].mxu0 }
 0x1f1   : > { %v2790_v27 = vadd.f32 %v2789_v21, %v1366_v25  ;;  %v1367_v16 = vsel %vm3815_vm10, %v1363_v26, 0.0  ;;  %v2628_v25 = vld [vmem:[%s3974_s3 + $0x18] sm:$0xff] }
 0x1f2   : > { %v2795_v28 = vadd.f32 %v2794_v23, %v1367_v16 }
 0x21a   : > { %v1522_v31 = vpop.f32.mrb[0].mxu1 }
 0x21b   : > { %v2791_v32 = vadd.f32 %v2790_v27, %v1522_v31  ;;  %v1524_v3 = vpop.f32.mrb[1].mxu1  ;;  %v2630_v31 = vld [vmem:[%s3974_s3 + $0x20] sm:$0xff] }
 0x21c   : > { %v2796_v33 = vadd.f32 %v2795_v28, %v1524_v3 }
 0x21f   : > { %v1681_v35 = vpop.f32.mrb[8].mxu0 }
 0x220   : > { %v1686_v36 = vsel %vm3819_vm11, %v1681_v35, 0.0  ;;  %v1683_v37 = vpop.f32.mrb[9].mxu0 }
 0x221   : > { %v1688_v41 = vadd.f32 %v2791_v32, %v1686_v36  ;;  %v1687_v42 = vsel %vm3826_vm12, %v1683_v37, 0.0  ;;  %v2632_v36 = vld [vmem:[%s3974_s3 + $0x28] sm:$0xff] }
 0x222   : > { %v1689_v46 = vadd.f32 %v2796_v33, %v1687_v42 }
 0x223   : > { %v1696_v7 = vadd.f32 %v1694_v38, %v1688_v41 }
 0x224   : > { %v1697_v12 = vadd.f32 %v1694_v38, %v1689_v46 }
 0x225   : > { %v1700_v48 = vmin.f32 %v1696_v7, 0.0  ;;  %vm1698_vm14 = vcmp.gt.f32.partialorder %v1696_v7, 0.0 }
 0x226   : > { %v1701_v39 = vmin.f32 %v1697_v12, 0.0  ;;  %vm1699_vm15 = vcmp.gt.f32.partialorder %v1697_v12, 0.0 }
 0x227   : > { %v1702_v50 = vmul.f32 1.442695, %v1700_v48  ;;  %v2636_v48 = vld [vmem:[%s3974_s3 + $0x38] sm:$0xff] }
 0x228   : > { %v1704_v40 = vmul.f32 1.442695, %v1701_v39 }
 0x229   : > { %3316 = vpow2.f32 %v1702_v50 }
 0x22a   : > { %3318 = vpow2.f32 %v1704_v40 }
 0x233   : > { %v3317_v51 = vpop.eup %3316 }
 0x234   : > { %v3319_v52 = vpop.eup %3318  ;;  %v2621_v53 = vadd.f32 -1.0, %v3317_v51 }
 0x235   : > { %v2622_v55 = vadd.f32 -1.0, %v3319_v52  ;;  %v2638_v52 = vld [vmem:[%s3974_s3 + $0x40] sm:$0xff] }
 0x236   : > { %v1708_v54 = vsel %vm1698_vm14, %v1696_v7, %v2621_v53 }
 0x237   : > { %1716 = vrot.lane.b32.xlu1 %v1708_v54, %s3339_s12  ;;  %v1709_v56 = vsel %vm1699_vm15, %v1697_v12, %v2622_v55  ;;  %v2634_v12 = vld [vmem:[%s3974_s3 + $0x30] sm:$0xff] }
 0x23b   : > { %1718 = vrot.lane.b32.xlu1 %v1709_v56, %s3339_s12 }
 0x2a9   : > { %v1717_v57 = vpop.permute.xlu1 %1716 }
 0x2aa   : > { %1726 = vst.msk [vmem:[#allocation2] sm:$0xff] %vm1725_vm0, %v1717_v57 }
 0x2ad   : > { %v1719_v58 = vpop.permute.xlu1 %1718 }
 0x2ae   : > { %v1721_v59 = vsel %vm1720_vm8, %v1717_v57, %v1719_v58  ;;  %1728 = vst.msk [vmem:[#allocation2 + $0x10] sm:$0xff] %vm1720_vm8, %v1719_v58 }
 0x2af   : > { %1736 = vmatprep.subr.mxu1 %v1721_v59 }
 0x2b1   : > { %v1811_v60 = vld [vmem:[#allocation2] sm:$0xff] }
 0x2b2   : > { %1819 = vrot.lane.b32.xlu0 %v1811_v60, %s3329_s24  ;;  %1907 = vrot.lane.b32.xlu1 %v1811_v60, %s3331_s25 }
 0x2b3   : > { %1737 = vmatpush1.msra.mxu1 %v1811_v60 }
 0x2b4   : > { %2623 = vmatmul.mubr.msk.f32.vlgmr.msra.gmra.mrb[4].mxu1 %vm1732_vm13, %v1731_v61 }
 0x2b5   : > { %v1813_v62 = vld [vmem:[#allocation2 + $0x10] sm:$0xff]  ;;  %1896 = vmatprep.mubr.f32.mxu1 %v3761_v4 }
 0x2b6   : > { %1997 = vrot.lane.b32.xlu0 %v1811_v60, %s3332_s28  ;;  %2087 = vrot.lane.b32.xlu1 %v1811_v60, %s3334_s30 }
 0x2ba   : > { %2175 = vrot.lane.b32.xlu0 %v1811_v60, %s3333_s29  ;;  %1823 = vrot.lane.b32.xlu1 %v1813_v62, %s3329_s24 }
 0x2be   : > { %1911 = vrot.lane.b32.xlu0 %v1813_v62, %s3331_s25  ;;  %2001 = vrot.lane.b32.xlu1 %v1813_v62, %s3332_s28 }
 0x2c2   : > { %2091 = vrot.lane.b32.xlu0 %v1813_v62, %s3334_s30  ;;  %2179 = vrot.lane.b32.xlu1 %v1813_v62, %s3333_s29 }
 0x2c6   : > { %2265 = vrot.lane.b32.xlu1 %v1811_v60, %s3335_s6  ;;  %1821 = vrot.lane.b32.xlu0 %v1721_v59, %s3329_s24 }
 0x2ca   : > { %1909 = vrot.lane.b32.xlu1 %v1721_v59, %s3331_s25  ;;  %2269 = vrot.lane.b32.xlu0 %v1813_v62, %s3335_s6 }
 0x2ce   : > { %2359 = vrot.lane.b32.xlu1 %v1813_v62, %s3336_s7  ;;  %1999 = vrot.lane.b32.xlu0 %v1721_v59, %s3332_s28 }
 0x2d2   : > { %2089 = vrot.lane.b32.xlu1 %v1721_v59, %s3334_s30  ;;  %2355 = vrot.lane.b32.xlu0 %v1811_v60, %s3336_s7 }
 0x2d6   : > { %2267 = vrot.lane.b32.xlu1 %v1721_v59, %s3335_s6  ;;  %2177 = vrot.lane.b32.xlu0 %v1721_v59, %s3333_s29 }
 0x2da   : > { %2445 = vrot.lane.b32.xlu1 %v1721_v59, %s3337_s8  ;;  %2357 = vrot.lane.b32.xlu0 %v1721_v59, %s3336_s7 }
 0x2de   : > { %2443 = vrot.lane.b32.xlu1 %v1811_v60, %s3337_s8  ;;  %2447 = vrot.lane.b32.xlu0 %v1813_v62, %s3337_s8 }
 0x2e2   : > { %2534 = vperm.xlu0 %3315, %v2531_v63  }
 0x324   : > { %v1820_v0 = vpop.permute.xlu0 %1819  ;;  %v1908_v1 = vpop.permute.xlu1 %1907 }
 0x328   : > { %v1998_v2 = vpop.permute.xlu0 %1997  ;;  %v2088_v6 = vpop.permute.xlu1 %2087 }
 0x32c   : > { %v2176_v9 = vpop.permute.xlu0 %2175  ;;  %v1824_v10 = vpop.permute.xlu1 %1823 }
 0x330   : > { %v1912_v11 = vpop.permute.xlu0 %1911  ;;  %v2002_v30 = vpop.permute.xlu1 %2001 }
 0x334   : > { %v2092_v34 = vpop.permute.xlu0 %2091  ;;  %v2180_v44 = vpop.permute.xlu1 %2179 }
 0x338   : > { %v1822_v13 = vpop.permute.xlu0 %1821  ;;  %v2266_v45 = vpop.permute.xlu1 %2265 }
 0x339   : > { %v1825_v47 = vsel %vm454_vm1, %v1820_v0, %v1822_v13  ;;  %v1826_v14 = vsel %vm454_vm1, %v1822_v13, %v1824_v10  ;;  %vm3986_vm1 = vcmask 769024  }
 0x33a   : > { %1832 = vmatprep.subr.mxu1 %v1826_v14 }
 0x33b   : > { %1833 = vmatpush1.msra.mxu1 %v1825_v47 }
 0x33c   : > { %v2270_v17 = vpop.permute.xlu0 %2269  ;;  %2625 = vmatmul.mubr.msk.f32.vlgmr.msra.gmra.mrb[6].mxu1 %vm1732_vm13, %v2624_v15  ;;  %v1910_v49 = vpop.permute.xlu1 %1909 }
 0x33d   : > { %v1913_v18 = vsel %vm613_vm2, %v1908_v1, %v1910_v49  ;;  %v1914_v19 = vsel %vm613_vm2, %v1910_v49, %v1912_v11  ;;  %1984 = vmatprep.mubr.f32.mxu1 %v3761_v4  ;;  %vm3987_vm2 = vmmov %vm3986_vm1 }
 0x33e   : > { %1920 = vmatprep.subr.mxu1 %v1914_v19 }
 0x33f   : > { %1921 = vmatpush1.msra.mxu1 %v1913_v18 }
 0x340   : > { %v2000_v21 = vpop.permute.xlu0 %1999  ;;  %2627 = vmatmul.mubr.msk.f32.vlgmr.msra.gmra.mrb[8].mxu1 %vm1732_vm13, %v2626_v20  ;;  %v2360_v22 = vpop.permute.xlu1 %2359 }
 0x341   : > { %v2003_v23 = vsel %vm778_vm3, %v1998_v2, %v2000_v21  ;;  %v2004_v24 = vsel %vm778_vm3, %v2000_v21, %v2002_v30  ;;  %2074 = vmatprep.mubr.f32.mxu1 %v3761_v4 }
 0x342   : > { %2010 = vmatprep.subr.mxu1 %v2004_v24 }
 0x343   : > { %2011 = vmatpush1.msra.mxu1 %v2003_v23 }
 0x344   : > { %v2356_v26 = vpop.permute.xlu0 %2355  ;;  %2629 = vmatmul.mubr.msk.f32.vlgmr.msra.gmra.mrb[10].mxu1 %vm1732_vm13, %v2628_v25  ;;  %v2090_v27 = vpop.permute.xlu1 %2089 }
 0x345   : > { %v2093_v16 = vsel %vm939_vm5, %v2088_v6, %v2090_v27  ;;  %v2094_v28 = vsel %vm939_vm5, %v2090_v27, %v2092_v34  ;;  %2164 = vmatprep.mubr.f32.mxu1 %v3761_v4 }
 0x346   : > { %2100 = vmatprep.subr.mxu1 %v2094_v28 }
 0x347   : > { %2101 = vmatpush1.msra.mxu1 %v2093_v16 }
 0x348   : > { %v2178_v32 = vpop.permute.xlu0 %2177  ;;  %2631 = vmatmul.mubr.msk.f32.vlgmr.msra.gmra.mrb[6].mxu1 %vm1732_vm13, %v2630_v31  ;;  %v2268_v3 = vpop.permute.xlu1 %2267 }
 0x349   : > { %v2181_v33 = vsel %vm1098_vm4, %v2176_v9, %v2178_v32  ;;  %v2182_v35 = vsel %vm1098_vm4, %v2178_v32, %v2180_v44  ;;  %2432 = vmatprep.mubr.f32.mxu1 %v3761_v4  ;;  %v2272_v37 = vsel %vm1259_vm6, %v2268_v3, %v2270_v17  ;;  %v2271_v38 = vsel %vm1259_vm6, %v2266_v45, %v2268_v3 }
 0x34a   : > { %2188 = vmatprep.subr.mxu0 %v2182_v35 }
 0x34b   : > { %2189 = vmatpush1.msra.mxu0 %v2181_v33 }
 0x34c   : > { %v2358_v41 = vpop.permute.xlu0 %2357  ;;  %2633 = vmatmul.mubr.msk.f32.vlgmr.msra.gmra.mrb[10].mxu0 %vm1732_vm13, %v2632_v36  ;;  %2278 = vmatprep.subr.mxu0 %v2272_v37  ;;  %v2446_v42 = vpop.permute.xlu1 %2445 }
 0x34d   : > { %v2361_v46 = vsel %vm1420_vm7, %v2356_v26, %v2358_v41  ;;  %2279 = vmatpush1.msra.mxu0 %v2271_v38  ;;  %v2362_v7 = vsel %vm1420_vm7, %v2358_v41, %v2360_v22  ;;  %2342 = vmatprep.mubr.f32.mxu0 %v3761_v4 }
 0x34e   : > { %2368 = vmatprep.subr.mxu1 %v2362_v7 }
 0x34f   : > { %2369 = vmatpush1.msra.mxu1 %v2361_v46 }
 0x350   : > { %v2448_v39 = vpop.permute.xlu0 %2447  ;;  %2635 = vmatmul.mubr.msk.f32.vlgmr.msra.gmra.mrb[12].mxu0 %vm1732_vm13, %v2634_v12  ;;  %2637 = vmatmul.mubr.msk.f32.vlgmr.msra.gmra.mrb[6].mxu1 %vm1732_vm13, %v2636_v48  ;;  %v2444_v50 = vpop.permute.xlu1 %2443 }
 0x351   : > { %v2449_v40 = vsel %vm3986_vm1, %v2444_v50, %v2446_v42  ;;  %v2450_v51 = vsel %vm3987_vm2, %v2446_v42, %v2448_v39  ;;  %2520 = vmatprep.mubr.f32.mxu0 %v3761_v4 }
 0x352   : > { %2456 = vmatprep.subr.mxu0 %v2450_v51 }
 0x353   : > { %2457 = vmatpush1.msra.mxu0 %v2449_v40 }
 0x354   : > { %2639 = vmatmul.mubr.msk.f32.vlgmr.msra.gmra.mrb[14].mxu0 %vm1732_vm13, %v2638_v52 }
 0x361   : > { %v2535_v25 = vpop.permute.xlu0 %2534 }
 0x387   : > { %v1802_v53 = vpop.f32.mrb[4].mxu1 }
 0x388   : > { %v1804_v54 = vpop.f32.mrb[5].mxu1  ;;  %v1807_v56 = vsel %vm3811_vm9, %v1802_v53, 0.0 }
 0x389   : > { %v1808_v4 = vsel %vm3815_vm10, %v1804_v54, 0.0 }
 0x413   : > { %v1986_v55 = vpop.f32.mrb[8].mxu1 }
 0x414   : > { %v1991_v57 = vsel %vm3819_vm11, %v1986_v55, 0.0  ;;  %v1988_v58 = vpop.f32.mrb[9].mxu1 }
 0x415   : > { %v2797_v59 = vadd.f32 %v1991_v57, %v1807_v56  ;;  %v1992_v60 = vsel %vm3826_vm12, %v1988_v58, 0.0 }
 0x416   : > { %v2802_v61 = vadd.f32 %v1992_v60, %v1808_v4 }
 0x417   : > { %v2076_v62 = vpop.f32.mrb[10].mxu1 }
 0x418   : > { %v2081_v63 = vsel %vm3811_vm9, %v2076_v62, 0.0  ;;  %v2078_v0 = vpop.f32.mrb[11].mxu1 }
 0x419   : > { %v2798_v1 = vadd.f32 %v2797_v59, %v2081_v63  ;;  %v2082_v2 = vsel %vm3815_vm10, %v2078_v0, 0.0 }
 0x41a   : > { %v2803_v6 = vadd.f32 %v2802_v61, %v2082_v2 }
 0x41f   : > { %v2254_v9 = vpop.f32.mrb[10].mxu0 }
 0x420   : > { %v2259_v10 = vsel %vm3819_vm11, %v2254_v9, 0.0  ;;  %v2256_v11 = vpop.f32.mrb[11].mxu0 }
 0x421   : > { %v2799_v30 = vadd.f32 %v2798_v1, %v2259_v10  ;;  %v2260_v34 = vsel %vm3826_vm12, %v2256_v11, 0.0 }
 0x422   : > { %v2804_v44 = vadd.f32 %v2803_v6, %v2260_v34 }
 0x423   : > { %v2344_v13 = vpop.f32.mrb[12].mxu0  ;;  %v2434_v45 = vpop.f32.mrb[6].mxu1 }
 0x424   : > { %v2349_v47 = vsel %vm3811_vm9, %v2344_v13, 0.0  ;;  %v2346_v14 = vpop.f32.mrb[13].mxu0  ;;  %v2436_v15 = vpop.f32.mrb[7].mxu1 }
 0x425   : > { %v2800_v17 = vadd.f32 %v2799_v30, %v2349_v47  ;;  %v2350_v49 = vsel %vm3815_vm10, %v2346_v14, 0.0 }
 0x426   : > { %v2805_v18 = vadd.f32 %v2804_v44, %v2350_v49 }
 0x427   : > { %v2801_v19 = vadd.f32 %v2800_v17, %v2434_v45  ;;  %v2522_v20 = vpop.f32.mrb[14].mxu0 }
 0x428   : > { %v2806_v21 = vadd.f32 %v2805_v18, %v2436_v15  ;;  %v2527_v22 = vsel %vm3819_vm11, %v2522_v20, 0.0  ;;  %v2524_v23 = vpop.f32.mrb[15].mxu0 }
 0x429   : > { %v2529_v24 = vadd.f32 %v2801_v19, %v2527_v22  ;;  %v2528_v29 = vsel %vm3826_vm12, %v2524_v23, 0.0 }
 0x42a   : > { %v2530_v5 = vadd.f32 %v2806_v21, %v2528_v29 }
 0x42b   : > { %v2537_v26 = vadd.f32 %v2535_v25, %v2529_v24 }
 0x42c   : > { %v2538_v27 = vadd.f32 %v2535_v25, %v2530_v5 }
 0x42d   : > { %2539 = vst [vmem:[%s224_s13] sm:$0xff] %v2537_v26 }
 0x42e   : > { %2540 = vst [vmem:[%s224_s13 + $0x8] sm:$0xff] %v2538_v27 }
 0x42f PF: > { %s15_s18 = sadd.s32 1, %s3327_s18  }
 0x430   : > { %p12_p4 = scmp.ge.s32.totalorder %s15_s18, 4  }
 0x432   :  { %14 = sbr.rel (!%p12_p4) target bundleno = 1 (0x1), region = 86 }

</bundles_post_ra>
